<compile_context>
chip_gen: v5e
topology: v5e:2x2
jax: 0.10.0
libtpu: 0.0.40
codegen_flags: <defaults>
</compile_context>

<pallas_src>
import functools
import math

import jax
import jax.numpy as jnp
import numpy as np
from jax.experimental import pallas as pl
from jax.experimental.pallas import tpu as pltpu


# ------------------------- static geometry helpers --------------------------

def _geometry(obSize):
    """Static geometry of the conv/pool pipeline (flat, stride-aware frames)."""
    W0 = obSize
    K1 = 5
    H1 = W0 - K1 + 1                       # conv1 output grid (36)
    L1 = (H1 - 1) * W0 + H1                # conv1 flat-frame length (1436)
    Lq1 = L1 - W0 - 1                      # pool1 strided-frame length (1395)
    P1 = H1 // 2                           # pool1 grid (18)
    S1r, S1c = 2 * W0, 2                   # pool1 frame strides (row / col)
    K2 = 3
    H2 = P1 - K2 + 1                       # conv2 output grid (16)
    L2 = (S1r + S1c) * (H2 - 1) + 1        # conv2 strided-frame length (1231)
    O2 = tuple(S1r * dy + S1c * dx for dy in range(K2) for dx in range(K2))
    P2 = H2 // 2                           # pool2 grid (8), compacted
    K3 = 3
    H3 = P2 - K3 + 1                       # conv3 output grid (6)
    L3 = (H3 - 1) * P2 + H3                # conv3 compact-frame length (46)
    O3 = tuple(P2 * dy + dx for dy in range(K3) for dx in range(K3))
    P3 = H3 - 1                            # pool3 (2x2, stride 1) grid (5)
    return dict(W0=W0, K1=K1, H1=H1, L1=L1, Lq1=Lq1, P1=P1, S1r=S1r, S1c=S1c,
                K2=K2, H2=H2, L2=L2, O2=O2, P2=P2, K3=K3, H3=H3, L3=L3, O3=O3,
                P3=P3)


# ------------------------------ Pallas kernel --------------------------------

def _critic_kernel(g,
                   x_ref, add_ref, act_ref,
                   w1_ref, b1_ref,
                   w2_ref, b2_ref, p2c_ref,
                   w3_ref, b3_ref,
                   w1f_ref, b1f_ref, w2t_ref, b2f_ref, w3t_ref, b3f_ref,
                   out_ref):
    """One sample per grid step; everything resident in VMEM."""
    f32, bf16 = jnp.float32, jnp.bfloat16
    K1, W0, L1, Lq1 = g["K1"], g["W0"], g["L1"], g["Lq1"]
    L2, L3 = g["L2"], g["L3"]

    x = x_ref[0]                                      # (1, W0*W0) f32

    # ---- Stage 1: conv1 (5x5, 1->5 chans, padded to 8) on the VPU (f32) ----
    Lu = L1 + (K1 - 1) * W0
    # K1 column-shifted copies of the input row, broadcast once over 8 sublanes.
    xs = [jnp.broadcast_to(x[:, dx:dx + Lu], (8, Lu)) for dx in range(K1)]
    o1 = None
    for dy in range(K1):
        u = None
        for dx in range(K1):
            col = w1_ref[:, dy * K1 + dx: dy * K1 + dx + 1]        # (8, 1)
            term = col * xs[dx]
            u = term if u is None else u + term
        v = u[:, dy * W0: dy * W0 + L1]
        o1 = v if o1 is None else o1 + v
    o1 = jnp.maximum(o1 + b1_ref[...], 0.0)                        # (8, L1)

    # pool1: 2x2/s2 average via 4 lane-shifted adds; frame kept un-compacted
    # (valid entries at p = 2*W0*y + 2*x).
    q1 = 0.25 * (o1[:, :Lq1] + o1[:, 1:Lq1 + 1]
                 + o1[:, W0:Lq1 + W0] + o1[:, W0 + 1:Lq1 + W0 + 1])
    q1b = q1.astype(bf16)                                          # (8, Lq1)

    # ---- Stage 2: conv2 (3x3, 5->18 chans, padded 8->24) on the MXU (bf16) ----
    patches2 = jnp.concatenate([q1b[:, o:o + L2] for o in g["O2"]], axis=0)
    o2 = jnp.dot(w2_ref[...], patches2, preferred_element_type=f32)
    o2 = jnp.maximum(o2 + b2_ref[...], 0.0)                        # (24, L2)

    # pool2 (2x2/s2) + compaction folded into one small constant matmul.
    q2 = jnp.dot(o2.astype(bf16), p2c_ref[...], preferred_element_type=f32)
    q2b = q2.astype(bf16)                                          # (24, P2*P2)

    # ---- Stage 3: conv3 (3x3, 18->3 chans) on the compact 8x8 frame ----
    patches3 = jnp.concatenate([q2b[:, o:o + L3] for o in g["O3"]], axis=0)
    o3 = jnp.dot(w3_ref[...], patches3, preferred_element_type=f32)
    o3 = jnp.maximum(o3 + b3_ref[...], 0.0)                        # (3, L3)

    # ---- Fused fc head: pool3 + NCHW-flatten selection folded into w1f ----
    state = jnp.concatenate(
        [o3[c:c + 1, :] for c in range(o3.shape[0])] + [add_ref[0], act_ref[0]],
        axis=1)                                                    # (1, 3*L3+3+nA)
    h = jnp.maximum(jnp.dot(state, w1f_ref[...], preferred_element_type=f32)
                    + b1f_ref[...], 0.0)                           # fc1
    h = jnp.maximum(jnp.dot(h, w2t_ref[...], preferred_element_type=f32)
                    + b2f_ref[...], 0.0)                           # fc2
    out = jnp.dot(h, w3t_ref[...], preferred_element_type=f32) + b3f_ref[...]
    out_ref[0] = out.astype(out_ref.dtype)             # (1, 128), col 0 = Q-value


# ------------------------------ forward wrapper -------------------------------

def critic_forward(kparams, spaceMatrix, additionalData, action):
    """Matches Critic.forward(spaceMatrix, additionalData, action) (f32)."""
    B = spaceMatrix.shape[0]
    obSize = spaceMatrix.shape[1]
    g = _geometry(obSize)

    x3 = spaceMatrix.reshape(B, 1, obSize * obSize).astype(jnp.float32)
    add3 = additionalData.reshape(B, 1, -1).astype(jnp.float32)
    act3 = action.reshape(B, 1, -1).astype(jnp.float32)

    weight_names = ("w1", "b1", "w2", "b2", "p2c", "w3", "b3",
                    "w1f", "b1f", "w2t", "b2f", "w3t", "b3f")
    weights = [kparams[n] for n in weight_names]

    def batch_spec(arr):
        zeros = (0,) * (arr.ndim - 1)
        return pl.BlockSpec((1,) + arr.shape[1:], lambda b, _z=zeros: (b,) + _z)

    def const_spec(arr):
        idx = (0,) * arr.ndim
        return pl.BlockSpec(arr.shape, lambda b, _i=idx: _i)

    in_specs = [batch_spec(x3), batch_spec(add3), batch_spec(act3)]
    in_specs += [const_spec(w) for w in weights]

    # Advisory cost hint for the XLA scheduler.
    flops = B * (
        2 * 8 * g["K1"] ** 2 * g["L1"]
        + 2 * kparams["w2"].shape[0] * kparams["w2"].shape[1] * g["L2"]
        + 2 * kparams["w2"].shape[0] * g["L2"] * g["P2"] ** 2
        + 2 * kparams["w3"].shape[0] * kparams["w3"].shape[1] * g["L3"]
        + 2 * (kparams["w1f"].shape[0] * 80 + 80 * 80 + 80 * 128))
    bytes_accessed = (
        sum(int(np.prod(kparams[n].shape)) * kparams[n].dtype.itemsize
            for n in weight_names)
        + 4 * (int(np.prod(x3.shape)) + int(np.prod(add3.shape))
               + int(np.prod(act3.shape)) + B * 128))

    out = pl.pallas_call(
        functools.partial(_critic_kernel, g),
        grid=(B,),
        out_shape=jax.ShapeDtypeStruct((B, 1, 128), jnp.float32),
        in_specs=in_specs,
        out_specs=pl.BlockSpec((1, 1, 128), lambda b: (b, 0, 0)),
        compiler_params=pltpu.CompilerParams(
            dimension_semantics=("parallel",)),
        cost_estimate=pl.CostEstimate(flops=int(flops), transcendentals=0,
                                      bytes_accessed=int(bytes_accessed)),
    )(x3, add3, act3, *weights)
    return out[:, 0, :1]          # real Q-value lives in lane-dense column 0


# ------------------- one-time parameter repack (at init) ---------------------

def prepare_params(params, obSize, numActions):
    """Repack PyTorch-layout parameters into kernel-ready layout (runs once)."""
    g = _geometry(obSize)
    K1, K2, K3 = g["K1"], g["K2"], g["K3"]
    W0, L1, L2, L3 = g["W0"], g["L1"], g["L2"], g["L3"]
    S1r, S1c, P2, P3 = g["S1r"], g["S1c"], g["P2"], g["P3"]

    fc1_w = np.asarray(params["fc1_w"], np.float32)          # (80, 78+nA)
    n_obs = 3 * P3 * P3
    assert fc1_w.shape[1] == n_obs + 3 + numActions

    # conv1: (5,1,5,5) -> (8, 25) f32, rows 5..7 zero (VPU path).
    c1 = np.asarray(params["conv1_w"], np.float32)
    w1 = np.zeros((8, K1 * K1), np.float32)
    w1[:c1.shape[0], :] = c1[:, 0, :, :].reshape(c1.shape[0], -1)
    b1 = np.zeros((8, 1), np.float32)
    b1[:c1.shape[0], 0] = np.asarray(params["conv1_b"], np.float32)

    # conv2: (18,5,3,3) -> (24, 9*8) bf16, blocks ordered (dy,dx), cols = channel.
    c2 = np.asarray(params["conv2_w"], np.float32)
    oc2, ci2 = c2.shape[0], c2.shape[1]
    w2 = np.zeros((24, K2 * K2 * 8), np.float32)
    for dy in range(K2):
        for dx in range(K2):
            blk = dy * K2 + dx
            w2[:oc2, blk * 8: blk * 8 + ci2] = c2[:, :, dy, dx]
    b2 = np.zeros((24, 1), np.float32)
    b2[:oc2, 0] = np.asarray(params["conv2_b"], np.float32)

    # pool2 + compaction: (L2, P2*P2), entries in {0, 0.25} (exact in bf16).
    p2c = np.zeros((L2, P2 * P2), np.float32)
    for y in range(P2):
        for x in range(P2):
            for dy in range(2):
                for dx in range(2):
                    p = S1r * (2 * y + dy) + S1c * (2 * x + dx)
                    p2c[p, y * P2 + x] = 0.25

    # conv3: (3,18,3,3) -> (3, 9*24) bf16.
    c3 = np.asarray(params["conv3_w"], np.float32)
    oc3, ci3 = c3.shape[0], c3.shape[1]
    w3 = np.zeros((oc3, K3 * K3 * 24), np.float32)
    for dy in range(K3):
        for dx in range(K3):
            blk = dy * K3 + dx
            w3[:, blk * 24: blk * 24 + ci3] = c3[:, :, dy, dx]
    b3 = np.asarray(params["conv3_b"], np.float32).reshape(-1, 1)

    # fc1: fold avg_pool3 (2x2, stride 1) + NCHW-flatten selection into the obs rows.
    w1f = np.zeros((oc3 * L3 + 3 + numActions, fc1_w.shape[0]), np.float32)
    for c in range(oc3):
        for y in range(P3):
            for x in range(P3):
                col = fc1_w[:, c * P3 * P3 + y * P3 + x]
                for dy in range(2):
                    for dx in range(2):
                        p = P2 * (y + dy) + (x + dx)
                        w1f[c * L3 + p, :] += 0.25 * col
    w1f[oc3 * L3: oc3 * L3 + 3, :] = fc1_w[:, n_obs:n_obs + 3].T
    w1f[oc3 * L3 + 3:, :] = fc1_w[:, n_obs + 3:].T

    # fc3: pad 1 -> 128 output lanes for a lane-dense store.
    fc3_w = np.asarray(params["fc3_w"], np.float32)
    w3t = np.zeros((fc3_w.shape[1], 128), np.float32)
    w3t[:, 0] = fc3_w[0]
    b3f = np.zeros((1, 128), np.float32)
    b3f[0, 0] = float(np.asarray(params["fc3_b"], np.float32)[0])

    bf16 = jnp.bfloat16
    return {
        "w1": jnp.asarray(w1), "b1": jnp.asarray(b1),
        "w2": jnp.asarray(w2, dtype=bf16), "b2": jnp.asarray(b2),
        "p2c": jnp.asarray(p2c, dtype=bf16),
        "w3": jnp.asarray(w3, dtype=bf16), "b3": jnp.asarray(b3),
        "w1f": jnp.asarray(w1f),
        "b1f": jnp.asarray(np.asarray(params["fc1_b"], np.float32).reshape(1, -1)),
        "w2t": jnp.asarray(np.asarray(params["fc2_w"], np.float32).T),
        "b2f": jnp.asarray(np.asarray(params["fc2_b"], np.float32).reshape(1, -1)),
        "w3t": jnp.asarray(w3t), "b3f": jnp.asarray(b3f),
    }


# --------------------------- deterministic params ----------------------------

def init_params(key, numActions):
    def _uniform(k, shape, fan_in):
        bound = 1.0 / math.sqrt(fan_in)
        return jax.random.uniform(k, shape, jnp.float32, -bound, bound)

    ks = jax.random.split(key, 12)
    return {
        "conv1_w": _uniform(ks[0], (5, 1, 5, 5), 1 * 5 * 5),
        "conv1_b": _uniform(ks[1], (5,), 1 * 5 * 5),
        "conv2_w": _uniform(ks[2], (18, 5, 3, 3), 5 * 3 * 3),
        "conv2_b": _uniform(ks[3], (18,), 5 * 3 * 3),
        "conv3_w": _uniform(ks[4], (3, 18, 3, 3), 18 * 3 * 3),
        "conv3_b": _uniform(ks[5], (3,), 18 * 3 * 3),
        "fc1_w": _uniform(ks[6], (80, 78 + numActions), 78 + numActions),
        "fc1_b": _uniform(ks[7], (80,), 78 + numActions),
        "fc2_w": _uniform(ks[8], (80, 80), 80),
        "fc2_b": _uniform(ks[9], (80,), 80),
        "fc3_w": _uniform(ks[10], (1, 80), 80),
        "fc3_b": _uniform(ks[11], (1,), 80),
    }


# ----------------------- pure-JAX reference (for parity) ---------------------

def critic_reference(params, spaceMatrix, additionalData, action):
    hp = jax.lax.Precision.HIGHEST
    B, H, _ = spaceMatrix.shape
    x = spaceMatrix.reshape(B, 1, H, H).astype(jnp.float32)

    def conv(x, w, b):
        y = jax.lax.conv_general_dilated(
            x, w, (1, 1), "VALID",
            dimension_numbers=("NCHW", "OIHW", "NCHW"), precision=hp)
        return jax.nn.relu(y + b.reshape(1, -1, 1, 1))

    def pool(x, k, s):
        y = jax.lax.reduce_window(x, 0.0, jax.lax.add,
                                  (1, 1, k, k), (1, 1, s, s), "VALID")
        return y / float(k * k)

    x = pool(conv(x, params["conv1_w"], params["conv1_b"]), 2, 2)
    x = pool(conv(x, params["conv2_w"], params["conv2_b"]), 2, 2)
    x = pool(conv(x, params["conv3_w"], params["conv3_b"]), 2, 1)
    obs = x.reshape(B, -1)
    state = jnp.concatenate([obs, additionalData, action], axis=1)
    h = jax.nn.relu(jnp.dot(state, params["fc1_w"].T, precision=hp) + params["fc1_b"])
    h = jax.nn.relu(jnp.dot(h, params["fc2_w"].T, precision=hp) + params["fc2_b"])
    return jnp.dot(h, params["fc3_w"].T, precision=hp) + params["fc3_b"]


# ----------------------------------- main ------------------------------------

if __name__ == "__main__":
    # obSize must be 40 so the flattened conv features are 75 and fc1's input
    # (78 + numActions) matches, exactly as the PyTorch module implies.
    B, obSize, numActions = 2, 40, 4

    key = jax.random.PRNGKey(0)
    k1, k2, k3 = jax.random.split(key, 3)
    spaceMatrix = jax.random.normal(k1, (B, obSize, obSize), dtype=jnp.float32)
    additionalData = jax.random.normal(k2, (B, 3), dtype=jnp.float32)
    action = jax.random.normal(k3, (B, numActions), dtype=jnp.float32)

    params = init_params(jax.random.PRNGKey(42), numActions)
    kparams = prepare_params(params, obSize, numActions)     # one-time repack

    fwd = jax.jit(critic_forward)
    out = jax.block_until_ready(fwd(kparams, spaceMatrix, additionalData, action))
    assert out.shape == (B, 1), out.shape

    ref = critic_reference(params, spaceMatrix, additionalData, action)
    assert jnp.allclose(out, ref, rtol=5e-2, atol=5e-2), (
        "mismatch vs reference", out, ref)
    print("KERNEL_OK")
</pallas_src>

<mosaic_0001>
module attributes {stable_mosaic.version = 11 : i64} {
  func.func @_critic_kernel(%arg0: i32, %arg1: memref<1x1x1600xf32, #tpu.memory_space<vmem>>, %arg2: memref<1x1x3xf32, #tpu.memory_space<vmem>>, %arg3: memref<1x1x4xf32, #tpu.memory_space<vmem>>, %arg4: memref<8x25xf32, #tpu.memory_space<vmem>>, %arg5: memref<8x1xf32, #tpu.memory_space<vmem>>, %arg6: memref<24x72xbf16, #tpu.memory_space<vmem>>, %arg7: memref<24x1xf32, #tpu.memory_space<vmem>>, %arg8: memref<1231x64xbf16, #tpu.memory_space<vmem>>, %arg9: memref<3x216xbf16, #tpu.memory_space<vmem>>, %arg10: memref<3x1xf32, #tpu.memory_space<vmem>>, %arg11: memref<145x80xf32, #tpu.memory_space<vmem>>, %arg12: memref<1x80xf32, #tpu.memory_space<vmem>>, %arg13: memref<80x80xf32, #tpu.memory_space<vmem>>, %arg14: memref<1x80xf32, #tpu.memory_space<vmem>>, %arg15: memref<80x128xf32, #tpu.memory_space<vmem>>, %arg16: memref<1x128xf32, #tpu.memory_space<vmem>>, %arg17: memref<1x1x128xf32, #tpu.memory_space<vmem>>) attributes {dimension_semantics = [#tpu.dimension_semantics<parallel>], iteration_bounds = array<i64: 2>, scalar_prefetch = 0 : i64, scratch_operands = 0 : i64, tpu.core_type = #tpu.core_type<tc>, window_params = [{transform_indices = @transform_0, window_bounds = array<i64: 1, 1, 1600>}, {transform_indices = @transform_1, window_bounds = array<i64: 1, 1, 3>}, {transform_indices = @transform_2, window_bounds = array<i64: 1, 1, 4>}, {pipeline_mode = #tpu.pipeline_mode<synchronous>, transform_indices = @transform_3, window_bounds = array<i64: 8, 25>}, {pipeline_mode = #tpu.pipeline_mode<synchronous>, transform_indices = @transform_4, window_bounds = array<i64: 8, 1>}, {pipeline_mode = #tpu.pipeline_mode<synchronous>, transform_indices = @transform_5, window_bounds = array<i64: 24, 72>}, {pipeline_mode = #tpu.pipeline_mode<synchronous>, transform_indices = @transform_6, window_bounds = array<i64: 24, 1>}, {pipeline_mode = #tpu.pipeline_mode<synchronous>, transform_indices = @transform_7, window_bounds = array<i64: 1231, 64>}, {pipeline_mode = #tpu.pipeline_mode<synchronous>, transform_indices = @transform_8, window_bounds = array<i64: 3, 216>}, {pipeline_mode = #tpu.pipeline_mode<synchronous>, transform_indices = @transform_9, window_bounds = array<i64: 3, 1>}, {pipeline_mode = #tpu.pipeline_mode<synchronous>, transform_indices = @transform_10, window_bounds = array<i64: 145, 80>}, {pipeline_mode = #tpu.pipeline_mode<synchronous>, transform_indices = @transform_11, window_bounds = array<i64: 1, 80>}, {pipeline_mode = #tpu.pipeline_mode<synchronous>, transform_indices = @transform_12, window_bounds = array<i64: 80, 80>}, {pipeline_mode = #tpu.pipeline_mode<synchronous>, transform_indices = @transform_13, window_bounds = array<i64: 1, 80>}, {pipeline_mode = #tpu.pipeline_mode<synchronous>, transform_indices = @transform_14, window_bounds = array<i64: 80, 128>}, {pipeline_mode = #tpu.pipeline_mode<synchronous>, transform_indices = @transform_15, window_bounds = array<i64: 1, 128>}, {transform_indices = @transform_16, window_bounds = array<i64: 1, 1, 128>}]} {
    %c0 = arith.constant 0 : index
    %c0_0 = arith.constant 0 : index
    %c0_1 = arith.constant 0 : index
    %0 = vector.load %arg1[%c0, %c0_0, %c0_1] : memref<1x1x1600xf32, #tpu.memory_space<vmem>>, vector<1x1x1600xf32>
    %1 = vector.shape_cast %0 : vector<1x1x1600xf32> to vector<1x1600xf32>
    %2 = vector.extract_strided_slice %1 {offsets = [0, 0], sizes = [1, 1596], strides = [1, 1]} : vector<1x1600xf32> to vector<1x1596xf32>
    %3 = vector.shape_cast %2 : vector<1x1596xf32> to vector<1x1596xf32>
    %4 = vector.broadcast %3 : vector<1x1596xf32> to vector<8x1596xf32>
    %5 = vector.extract_strided_slice %1 {offsets = [0, 1], sizes = [1, 1596], strides = [1, 1]} : vector<1x1600xf32> to vector<1x1596xf32>
    %6 = vector.shape_cast %5 : vector<1x1596xf32> to vector<1x1596xf32>
    %7 = vector.broadcast %6 : vector<1x1596xf32> to vector<8x1596xf32>
    %8 = vector.extract_strided_slice %1 {offsets = [0, 2], sizes = [1, 1596], strides = [1, 1]} : vector<1x1600xf32> to vector<1x1596xf32>
    %9 = vector.shape_cast %8 : vector<1x1596xf32> to vector<1x1596xf32>
    %10 = vector.broadcast %9 : vector<1x1596xf32> to vector<8x1596xf32>
    %11 = vector.extract_strided_slice %1 {offsets = [0, 3], sizes = [1, 1596], strides = [1, 1]} : vector<1x1600xf32> to vector<1x1596xf32>
    %12 = vector.shape_cast %11 : vector<1x1596xf32> to vector<1x1596xf32>
    %13 = vector.broadcast %12 : vector<1x1596xf32> to vector<8x1596xf32>
    %14 = vector.extract_strided_slice %1 {offsets = [0, 4], sizes = [1, 1596], strides = [1, 1]} : vector<1x1600xf32> to vector<1x1596xf32>
    %15 = vector.shape_cast %14 : vector<1x1596xf32> to vector<1x1596xf32>
    %16 = vector.broadcast %15 : vector<1x1596xf32> to vector<8x1596xf32>
    %c0_2 = arith.constant 0 : index
    %c0_3 = arith.constant 0 : index
    %17 = vector.load %arg4[%c0_2, %c0_3] : memref<8x25xf32, #tpu.memory_space<vmem>>, vector<8x1xf32>
    %18 = vector.broadcast %17 : vector<8x1xf32> to vector<8x1596xf32>
    %19 = arith.mulf %18, %4 : vector<8x1596xf32>
    %c0_4 = arith.constant 0 : index
    %c1 = arith.constant 1 : index
    %20 = vector.load %arg4[%c0_4, %c1] : memref<8x25xf32, #tpu.memory_space<vmem>>, vector<8x1xf32>
    %21 = vector.broadcast %20 : vector<8x1xf32> to vector<8x1596xf32>
    %22 = arith.mulf %21, %7 : vector<8x1596xf32>
    %23 = arith.addf %19, %22 : vector<8x1596xf32>
    %c0_5 = arith.constant 0 : index
    %c2 = arith.constant 2 : index
    %24 = vector.load %arg4[%c0_5, %c2] : memref<8x25xf32, #tpu.memory_space<vmem>>, vector<8x1xf32>
    %25 = vector.broadcast %24 : vector<8x1xf32> to vector<8x1596xf32>
    %26 = arith.mulf %25, %10 : vector<8x1596xf32>
    %27 = arith.addf %23, %26 : vector<8x1596xf32>
    %c0_6 = arith.constant 0 : index
    %c3 = arith.constant 3 : index
    %28 = vector.load %arg4[%c0_6, %c3] : memref<8x25xf32, #tpu.memory_space<vmem>>, vector<8x1xf32>
    %29 = vector.broadcast %28 : vector<8x1xf32> to vector<8x1596xf32>
    %30 = arith.mulf %29, %13 : vector<8x1596xf32>
    %31 = arith.addf %27, %30 : vector<8x1596xf32>
    %c0_7 = arith.constant 0 : index
    %c4 = arith.constant 4 : index
    %32 = vector.load %arg4[%c0_7, %c4] : memref<8x25xf32, #tpu.memory_space<vmem>>, vector<8x1xf32>
    %33 = vector.broadcast %32 : vector<8x1xf32> to vector<8x1596xf32>
    %34 = arith.mulf %33, %16 : vector<8x1596xf32>
    %35 = arith.addf %31, %34 : vector<8x1596xf32>
    %36 = vector.extract_strided_slice %35 {offsets = [0, 0], sizes = [8, 1436], strides = [1, 1]} : vector<8x1596xf32> to vector<8x1436xf32>
    %c0_8 = arith.constant 0 : index
    %c5 = arith.constant 5 : index
    %37 = vector.load %arg4[%c0_8, %c5] : memref<8x25xf32, #tpu.memory_space<vmem>>, vector<8x1xf32>
    %38 = vector.broadcast %37 : vector<8x1xf32> to vector<8x1596xf32>
    %39 = arith.mulf %38, %4 : vector<8x1596xf32>
    %c0_9 = arith.constant 0 : index
    %c6 = arith.constant 6 : index
    %40 = vector.load %arg4[%c0_9, %c6] : memref<8x25xf32, #tpu.memory_space<vmem>>, vector<8x1xf32>
    %41 = vector.broadcast %40 : vector<8x1xf32> to vector<8x1596xf32>
    %42 = arith.mulf %41, %7 : vector<8x1596xf32>
    %43 = arith.addf %39, %42 : vector<8x1596xf32>
    %c0_10 = arith.constant 0 : index
    %c7 = arith.constant 7 : index
    %44 = vector.load %arg4[%c0_10, %c7] : memref<8x25xf32, #tpu.memory_space<vmem>>, vector<8x1xf32>
    %45 = vector.broadcast %44 : vector<8x1xf32> to vector<8x1596xf32>
    %46 = arith.mulf %45, %10 : vector<8x1596xf32>
    %47 = arith.addf %43, %46 : vector<8x1596xf32>
    %c0_11 = arith.constant 0 : index
    %c8 = arith.constant 8 : index
    %48 = vector.load %arg4[%c0_11, %c8] : memref<8x25xf32, #tpu.memory_space<vmem>>, vector<8x1xf32>
    %49 = vector.broadcast %48 : vector<8x1xf32> to vector<8x1596xf32>
    %50 = arith.mulf %49, %13 : vector<8x1596xf32>
    %51 = arith.addf %47, %50 : vector<8x1596xf32>
    %c0_12 = arith.constant 0 : index
    %c9 = arith.constant 9 : index
    %52 = vector.load %arg4[%c0_12, %c9] : memref<8x25xf32, #tpu.memory_space<vmem>>, vector<8x1xf32>
    %53 = vector.broadcast %52 : vector<8x1xf32> to vector<8x1596xf32>
    %54 = arith.mulf %53, %16 : vector<8x1596xf32>
    %55 = arith.addf %51, %54 : vector<8x1596xf32>
    %56 = vector.extract_strided_slice %55 {offsets = [0, 40], sizes = [8, 1436], strides = [1, 1]} : vector<8x1596xf32> to vector<8x1436xf32>
    %57 = arith.addf %36, %56 : vector<8x1436xf32>
    %c0_13 = arith.constant 0 : index
    %c10 = arith.constant 10 : index
    %58 = vector.load %arg4[%c0_13, %c10] : memref<8x25xf32, #tpu.memory_space<vmem>>, vector<8x1xf32>
    %59 = vector.broadcast %58 : vector<8x1xf32> to vector<8x1596xf32>
    %60 = arith.mulf %59, %4 : vector<8x1596xf32>
    %c0_14 = arith.constant 0 : index
    %c11 = arith.constant 11 : index
    %61 = vector.load %arg4[%c0_14, %c11] : memref<8x25xf32, #tpu.memory_space<vmem>>, vector<8x1xf32>
    %62 = vector.broadcast %61 : vector<8x1xf32> to vector<8x1596xf32>
    %63 = arith.mulf %62, %7 : vector<8x1596xf32>
    %64 = arith.addf %60, %63 : vector<8x1596xf32>
    %c0_15 = arith.constant 0 : index
    %c12 = arith.constant 12 : index
    %65 = vector.load %arg4[%c0_15, %c12] : memref<8x25xf32, #tpu.memory_space<vmem>>, vector<8x1xf32>
    %66 = vector.broadcast %65 : vector<8x1xf32> to vector<8x1596xf32>
    %67 = arith.mulf %66, %10 : vector<8x1596xf32>
    %68 = arith.addf %64, %67 : vector<8x1596xf32>
    %c0_16 = arith.constant 0 : index
    %c13 = arith.constant 13 : index
    %69 = vector.load %arg4[%c0_16, %c13] : memref<8x25xf32, #tpu.memory_space<vmem>>, vector<8x1xf32>
    %70 = vector.broadcast %69 : vector<8x1xf32> to vector<8x1596xf32>
    %71 = arith.mulf %70, %13 : vector<8x1596xf32>
    %72 = arith.addf %68, %71 : vector<8x1596xf32>
    %c0_17 = arith.constant 0 : index
    %c14 = arith.constant 14 : index
    %73 = vector.load %arg4[%c0_17, %c14] : memref<8x25xf32, #tpu.memory_space<vmem>>, vector<8x1xf32>
    %74 = vector.broadcast %73 : vector<8x1xf32> to vector<8x1596xf32>
    %75 = arith.mulf %74, %16 : vector<8x1596xf32>
    %76 = arith.addf %72, %75 : vector<8x1596xf32>
    %77 = vector.extract_strided_slice %76 {offsets = [0, 80], sizes = [8, 1436], strides = [1, 1]} : vector<8x1596xf32> to vector<8x1436xf32>
    %78 = arith.addf %57, %77 : vector<8x1436xf32>
    %c0_18 = arith.constant 0 : index
    %c15 = arith.constant 15 : index
    %79 = vector.load %arg4[%c0_18, %c15] : memref<8x25xf32, #tpu.memory_space<vmem>>, vector<8x1xf32>
    %80 = vector.broadcast %79 : vector<8x1xf32> to vector<8x1596xf32>
    %81 = arith.mulf %80, %4 : vector<8x1596xf32>
    %c0_19 = arith.constant 0 : index
    %c16 = arith.constant 16 : index
    %82 = vector.load %arg4[%c0_19, %c16] : memref<8x25xf32, #tpu.memory_space<vmem>>, vector<8x1xf32>
    %83 = vector.broadcast %82 : vector<8x1xf32> to vector<8x1596xf32>
    %84 = arith.mulf %83, %7 : vector<8x1596xf32>
    %85 = arith.addf %81, %84 : vector<8x1596xf32>
    %c0_20 = arith.constant 0 : index
    %c17 = arith.constant 17 : index
    %86 = vector.load %arg4[%c0_20, %c17] : memref<8x25xf32, #tpu.memory_space<vmem>>, vector<8x1xf32>
    %87 = vector.broadcast %86 : vector<8x1xf32> to vector<8x1596xf32>
    %88 = arith.mulf %87, %10 : vector<8x1596xf32>
    %89 = arith.addf %85, %88 : vector<8x1596xf32>
    %c0_21 = arith.constant 0 : index
    %c18 = arith.constant 18 : index
    %90 = vector.load %arg4[%c0_21, %c18] : memref<8x25xf32, #tpu.memory_space<vmem>>, vector<8x1xf32>
    %91 = vector.broadcast %90 : vector<8x1xf32> to vector<8x1596xf32>
    %92 = arith.mulf %91, %13 : vector<8x1596xf32>
    %93 = arith.addf %89, %92 : vector<8x1596xf32>
    %c0_22 = arith.constant 0 : index
    %c19 = arith.constant 19 : index
    %94 = vector.load %arg4[%c0_22, %c19] : memref<8x25xf32, #tpu.memory_space<vmem>>, vector<8x1xf32>
    %95 = vector.broadcast %94 : vector<8x1xf32> to vector<8x1596xf32>
    %96 = arith.mulf %95, %16 : vector<8x1596xf32>
    %97 = arith.addf %93, %96 : vector<8x1596xf32>
    %98 = vector.extract_strided_slice %97 {offsets = [0, 120], sizes = [8, 1436], strides = [1, 1]} : vector<8x1596xf32> to vector<8x1436xf32>
    %99 = arith.addf %78, %98 : vector<8x1436xf32>
    %c0_23 = arith.constant 0 : index
    %c20 = arith.constant 20 : index
    %100 = vector.load %arg4[%c0_23, %c20] : memref<8x25xf32, #tpu.memory_space<vmem>>, vector<8x1xf32>
    %101 = vector.broadcast %100 : vector<8x1xf32> to vector<8x1596xf32>
    %102 = arith.mulf %101, %4 : vector<8x1596xf32>
    %c0_24 = arith.constant 0 : index
    %c21 = arith.constant 21 : index
    %103 = vector.load %arg4[%c0_24, %c21] : memref<8x25xf32, #tpu.memory_space<vmem>>, vector<8x1xf32>
    %104 = vector.broadcast %103 : vector<8x1xf32> to vector<8x1596xf32>
    %105 = arith.mulf %104, %7 : vector<8x1596xf32>
    %106 = arith.addf %102, %105 : vector<8x1596xf32>
    %c0_25 = arith.constant 0 : index
    %c22 = arith.constant 22 : index
    %107 = vector.load %arg4[%c0_25, %c22] : memref<8x25xf32, #tpu.memory_space<vmem>>, vector<8x1xf32>
    %108 = vector.broadcast %107 : vector<8x1xf32> to vector<8x1596xf32>
    %109 = arith.mulf %108, %10 : vector<8x1596xf32>
    %110 = arith.addf %106, %109 : vector<8x1596xf32>
    %c0_26 = arith.constant 0 : index
    %c23 = arith.constant 23 : index
    %111 = vector.load %arg4[%c0_26, %c23] : memref<8x25xf32, #tpu.memory_space<vmem>>, vector<8x1xf32>
    %112 = vector.broadcast %111 : vector<8x1xf32> to vector<8x1596xf32>
    %113 = arith.mulf %112, %13 : vector<8x1596xf32>
    %114 = arith.addf %110, %113 : vector<8x1596xf32>
    %c0_27 = arith.constant 0 : index
    %c24 = arith.constant 24 : index
    %115 = vector.load %arg4[%c0_27, %c24] : memref<8x25xf32, #tpu.memory_space<vmem>>, vector<8x1xf32>
    %116 = vector.broadcast %115 : vector<8x1xf32> to vector<8x1596xf32>
    %117 = arith.mulf %116, %16 : vector<8x1596xf32>
    %118 = arith.addf %114, %117 : vector<8x1596xf32>
    %119 = vector.extract_strided_slice %118 {offsets = [0, 160], sizes = [8, 1436], strides = [1, 1]} : vector<8x1596xf32> to vector<8x1436xf32>
    %120 = arith.addf %99, %119 : vector<8x1436xf32>
    %c0_28 = arith.constant 0 : index
    %c0_29 = arith.constant 0 : index
    %121 = vector.load %arg5[%c0_28, %c0_29] : memref<8x1xf32, #tpu.memory_space<vmem>>, vector<8x1xf32>
    %122 = vector.broadcast %121 : vector<8x1xf32> to vector<8x1436xf32>
    %123 = arith.addf %120, %122 : vector<8x1436xf32>
    %cst = arith.constant 0.000000e+00 : f32
    %124 = vector.broadcast %cst : f32 to vector<8x1436xf32>
    %125 = arith.maximumf %123, %124 : vector<8x1436xf32>
    %126 = vector.extract_strided_slice %125 {offsets = [0, 0], sizes = [8, 1395], strides = [1, 1]} : vector<8x1436xf32> to vector<8x1395xf32>
    %127 = vector.extract_strided_slice %125 {offsets = [0, 1], sizes = [8, 1395], strides = [1, 1]} : vector<8x1436xf32> to vector<8x1395xf32>
    %128 = arith.addf %126, %127 : vector<8x1395xf32>
    %129 = vector.extract_strided_slice %125 {offsets = [0, 40], sizes = [8, 1395], strides = [1, 1]} : vector<8x1436xf32> to vector<8x1395xf32>
    %130 = arith.addf %128, %129 : vector<8x1395xf32>
    %131 = vector.extract_strided_slice %125 {offsets = [0, 41], sizes = [8, 1395], strides = [1, 1]} : vector<8x1436xf32> to vector<8x1395xf32>
    %132 = arith.addf %130, %131 : vector<8x1395xf32>
    %cst_30 = arith.constant 2.500000e-01 : f32
    %133 = vector.broadcast %cst_30 : f32 to vector<8x1395xf32>
    %134 = arith.mulf %133, %132 : vector<8x1395xf32>
    %135 = arith.truncf %134 : vector<8x1395xf32> to vector<8x1395xbf16>
    %136 = vector.extract_strided_slice %135 {offsets = [0, 0], sizes = [8, 1231], strides = [1, 1]} : vector<8x1395xbf16> to vector<8x1231xbf16>
    %137 = vector.extract_strided_slice %135 {offsets = [0, 2], sizes = [8, 1231], strides = [1, 1]} : vector<8x1395xbf16> to vector<8x1231xbf16>
    %138 = vector.extract_strided_slice %135 {offsets = [0, 4], sizes = [8, 1231], strides = [1, 1]} : vector<8x1395xbf16> to vector<8x1231xbf16>
    %139 = vector.extract_strided_slice %135 {offsets = [0, 80], sizes = [8, 1231], strides = [1, 1]} : vector<8x1395xbf16> to vector<8x1231xbf16>
    %140 = vector.extract_strided_slice %135 {offsets = [0, 82], sizes = [8, 1231], strides = [1, 1]} : vector<8x1395xbf16> to vector<8x1231xbf16>
    %141 = vector.extract_strided_slice %135 {offsets = [0, 84], sizes = [8, 1231], strides = [1, 1]} : vector<8x1395xbf16> to vector<8x1231xbf16>
    %142 = vector.extract_strided_slice %135 {offsets = [0, 160], sizes = [8, 1231], strides = [1, 1]} : vector<8x1395xbf16> to vector<8x1231xbf16>
    %143 = vector.extract_strided_slice %135 {offsets = [0, 162], sizes = [8, 1231], strides = [1, 1]} : vector<8x1395xbf16> to vector<8x1231xbf16>
    %144 = vector.extract_strided_slice %135 {offsets = [0, 164], sizes = [8, 1231], strides = [1, 1]} : vector<8x1395xbf16> to vector<8x1231xbf16>
    %145 = tpu.concatenate %136, %137, %138, %139, %140, %141, %142, %143, %144 in 0 : vector<8x1231xbf16>, vector<8x1231xbf16>, vector<8x1231xbf16>, vector<8x1231xbf16>, vector<8x1231xbf16>, vector<8x1231xbf16>, vector<8x1231xbf16>, vector<8x1231xbf16>, vector<8x1231xbf16> -> vector<72x1231xbf16>
    %c0_31 = arith.constant 0 : index
    %c0_32 = arith.constant 0 : index
    %146 = vector.load %arg6[%c0_31, %c0_32] : memref<24x72xbf16, #tpu.memory_space<vmem>>, vector<24x72xbf16>
    %cst_33 = arith.constant dense<0.000000e+00> : vector<24x1231xf32>
    %147 = tpu.matmul %146, %145, %cst_33 {dimension_numbers = #tpu.dot_dimension_numbers<[1], [0], [0], [1], [0, 0, 1, 1], [], []>} : vector<24x72xbf16>, vector<72x1231xbf16>, vector<24x1231xf32> -> vector<24x1231xf32>
    %c0_34 = arith.constant 0 : index
    %c0_35 = arith.constant 0 : index
    %148 = vector.load %arg7[%c0_34, %c0_35] : memref<24x1xf32, #tpu.memory_space<vmem>>, vector<24x1xf32>
    %149 = vector.broadcast %148 : vector<24x1xf32> to vector<24x1231xf32>
    %150 = arith.addf %147, %149 : vector<24x1231xf32>
    %cst_36 = arith.constant 0.000000e+00 : f32
    %151 = vector.broadcast %cst_36 : f32 to vector<24x1231xf32>
    %152 = arith.maximumf %150, %151 : vector<24x1231xf32>
    %153 = arith.truncf %152 : vector<24x1231xf32> to vector<24x1231xbf16>
    %c0_37 = arith.constant 0 : index
    %c0_38 = arith.constant 0 : index
    %154 = vector.load %arg8[%c0_37, %c0_38] : memref<1231x64xbf16, #tpu.memory_space<vmem>>, vector<1231x64xbf16>
    %cst_39 = arith.constant dense<0.000000e+00> : vector<24x64xf32>
    %155 = tpu.matmul %153, %154, %cst_39 {dimension_numbers = #tpu.dot_dimension_numbers<[1], [0], [0], [1], [0, 0, 1, 1], [], []>} : vector<24x1231xbf16>, vector<1231x64xbf16>, vector<24x64xf32> -> vector<24x64xf32>
    %156 = arith.truncf %155 : vector<24x64xf32> to vector<24x64xbf16>
    %157 = vector.extract_strided_slice %156 {offsets = [0, 0], sizes = [24, 46], strides = [1, 1]} : vector<24x64xbf16> to vector<24x46xbf16>
    %158 = vector.extract_strided_slice %156 {offsets = [0, 1], sizes = [24, 46], strides = [1, 1]} : vector<24x64xbf16> to vector<24x46xbf16>
    %159 = vector.extract_strided_slice %156 {offsets = [0, 2], sizes = [24, 46], strides = [1, 1]} : vector<24x64xbf16> to vector<24x46xbf16>
    %160 = vector.extract_strided_slice %156 {offsets = [0, 8], sizes = [24, 46], strides = [1, 1]} : vector<24x64xbf16> to vector<24x46xbf16>
    %161 = vector.extract_strided_slice %156 {offsets = [0, 9], sizes = [24, 46], strides = [1, 1]} : vector<24x64xbf16> to vector<24x46xbf16>
    %162 = vector.extract_strided_slice %156 {offsets = [0, 10], sizes = [24, 46], strides = [1, 1]} : vector<24x64xbf16> to vector<24x46xbf16>
    %163 = vector.extract_strided_slice %156 {offsets = [0, 16], sizes = [24, 46], strides = [1, 1]} : vector<24x64xbf16> to vector<24x46xbf16>
    %164 = vector.extract_strided_slice %156 {offsets = [0, 17], sizes = [24, 46], strides = [1, 1]} : vector<24x64xbf16> to vector<24x46xbf16>
    %165 = vector.extract_strided_slice %156 {offsets = [0, 18], sizes = [24, 46], strides = [1, 1]} : vector<24x64xbf16> to vector<24x46xbf16>
    %166 = tpu.concatenate %157, %158, %159, %160, %161, %162, %163, %164, %165 in 0 : vector<24x46xbf16>, vector<24x46xbf16>, vector<24x46xbf16>, vector<24x46xbf16>, vector<24x46xbf16>, vector<24x46xbf16>, vector<24x46xbf16>, vector<24x46xbf16>, vector<24x46xbf16> -> vector<216x46xbf16>
    %c0_40 = arith.constant 0 : index
    %c0_41 = arith.constant 0 : index
    %167 = vector.load %arg9[%c0_40, %c0_41] : memref<3x216xbf16, #tpu.memory_space<vmem>>, vector<3x216xbf16>
    %cst_42 = arith.constant dense<0.000000e+00> : vector<3x46xf32>
    %168 = tpu.matmul %167, %166, %cst_42 {dimension_numbers = #tpu.dot_dimension_numbers<[1], [0], [0], [1], [0, 0, 1, 1], [], []>} : vector<3x216xbf16>, vector<216x46xbf16>, vector<3x46xf32> -> vector<3x46xf32>
    %c0_43 = arith.constant 0 : index
    %c0_44 = arith.constant 0 : index
    %169 = vector.load %arg10[%c0_43, %c0_44] : memref<3x1xf32, #tpu.memory_space<vmem>>, vector<3x1xf32>
    %170 = vector.broadcast %169 : vector<3x1xf32> to vector<3x46xf32>
    %171 = arith.addf %168, %170 : vector<3x46xf32>
    %cst_45 = arith.constant 0.000000e+00 : f32
    %172 = vector.broadcast %cst_45 : f32 to vector<3x46xf32>
    %173 = arith.maximumf %171, %172 : vector<3x46xf32>
    %174 = vector.extract_strided_slice %173 {offsets = [0, 0], sizes = [1, 46], strides = [1, 1]} : vector<3x46xf32> to vector<1x46xf32>
    %175 = vector.extract_strided_slice %173 {offsets = [1, 0], sizes = [1, 46], strides = [1, 1]} : vector<3x46xf32> to vector<1x46xf32>
    %176 = vector.extract_strided_slice %173 {offsets = [2, 0], sizes = [1, 46], strides = [1, 1]} : vector<3x46xf32> to vector<1x46xf32>
    %c0_46 = arith.constant 0 : index
    %c0_47 = arith.constant 0 : index
    %c0_48 = arith.constant 0 : index
    %177 = vector.load %arg2[%c0_46, %c0_47, %c0_48] : memref<1x1x3xf32, #tpu.memory_space<vmem>>, vector<1x1x3xf32>
    %178 = vector.shape_cast %177 : vector<1x1x3xf32> to vector<1x3xf32>
    %c0_49 = arith.constant 0 : index
    %c0_50 = arith.constant 0 : index
    %c0_51 = arith.constant 0 : index
    %179 = vector.load %arg3[%c0_49, %c0_50, %c0_51] : memref<1x1x4xf32, #tpu.memory_space<vmem>>, vector<1x1x4xf32>
    %180 = vector.shape_cast %179 : vector<1x1x4xf32> to vector<1x4xf32>
    %181 = tpu.concatenate %174, %175, %176, %178, %180 in 1 : vector<1x46xf32>, vector<1x46xf32>, vector<1x46xf32>, vector<1x3xf32>, vector<1x4xf32> -> vector<1x145xf32>
    %c0_52 = arith.constant 0 : index
    %c0_53 = arith.constant 0 : index
    %182 = vector.load %arg11[%c0_52, %c0_53] : memref<145x80xf32, #tpu.memory_space<vmem>>, vector<145x80xf32>
    %cst_54 = arith.constant dense<0.000000e+00> : vector<1x80xf32>
    %183 = tpu.matmul %181, %182, %cst_54 {dimension_numbers = #tpu.dot_dimension_numbers<[1], [0], [0], [1], [0, 0, 1, 1], [], []>} : vector<1x145xf32>, vector<145x80xf32>, vector<1x80xf32> -> vector<1x80xf32>
    %c0_55 = arith.constant 0 : index
    %c0_56 = arith.constant 0 : index
    %184 = vector.load %arg12[%c0_55, %c0_56] : memref<1x80xf32, #tpu.memory_space<vmem>>, vector<1x80xf32>
    %185 = arith.addf %183, %184 : vector<1x80xf32>
    %cst_57 = arith.constant 0.000000e+00 : f32
    %186 = vector.broadcast %cst_57 : f32 to vector<1x80xf32>
    %187 = arith.maximumf %185, %186 : vector<1x80xf32>
    %c0_58 = arith.constant 0 : index
    %c0_59 = arith.constant 0 : index
    %188 = vector.load %arg13[%c0_58, %c0_59] : memref<80x80xf32, #tpu.memory_space<vmem>>, vector<80x80xf32>
    %cst_60 = arith.constant dense<0.000000e+00> : vector<1x80xf32>
    %189 = tpu.matmul %187, %188, %cst_60 {dimension_numbers = #tpu.dot_dimension_numbers<[1], [0], [0], [1], [0, 0, 1, 1], [], []>} : vector<1x80xf32>, vector<80x80xf32>, vector<1x80xf32> -> vector<1x80xf32>
    %c0_61 = arith.constant 0 : index
    %c0_62 = arith.constant 0 : index
    %190 = vector.load %arg14[%c0_61, %c0_62] : memref<1x80xf32, #tpu.memory_space<vmem>>, vector<1x80xf32>
    %191 = arith.addf %189, %190 : vector<1x80xf32>
    %cst_63 = arith.constant 0.000000e+00 : f32
    %192 = vector.broadcast %cst_63 : f32 to vector<1x80xf32>
    %193 = arith.maximumf %191, %192 : vector<1x80xf32>
    %c0_64 = arith.constant 0 : index
    %c0_65 = arith.constant 0 : index
    %194 = vector.load %arg15[%c0_64, %c0_65] : memref<80x128xf32, #tpu.memory_space<vmem>>, vector<80x128xf32>
    %cst_66 = arith.constant dense<0.000000e+00> : vector<1x128xf32>
    %195 = tpu.matmul %193, %194, %cst_66 {dimension_numbers = #tpu.dot_dimension_numbers<[1], [0], [0], [1], [0, 0, 1, 1], [], []>} : vector<1x80xf32>, vector<80x128xf32>, vector<1x128xf32> -> vector<1x128xf32>
    %c0_67 = arith.constant 0 : index
    %c0_68 = arith.constant 0 : index
    %196 = vector.load %arg16[%c0_67, %c0_68] : memref<1x128xf32, #tpu.memory_space<vmem>>, vector<1x128xf32>
    %197 = arith.addf %195, %196 : vector<1x128xf32>
    %c0_69 = arith.constant 0 : index
    %c0_70 = arith.constant 0 : index
    %c0_71 = arith.constant 0 : index
    %198 = vector.load %arg17[%c0_69, %c0_70, %c0_71] : memref<1x1x128xf32, #tpu.memory_space<vmem>>, vector<1x1x128xf32>
    %199 = vector.shape_cast %198 : vector<1x1x128xf32> to vector<1x128xf32>
    %200 = vector.shape_cast %197 : vector<1x128xf32> to vector<1x1x128xf32>
    tpu.vector_store %arg17[%c0_69, %c0_70, %c0_71], %200 {strides = array<i32>} : memref<1x1x128xf32, #tpu.memory_space<vmem>>, vector<1x1x128xf32>,
    return
  }
  func.func @transform_0(%arg0: i32) -> (i32, i32, i32) {
    %c0_i32 = arith.constant 0 : i32
    %c0_i32_0 = arith.constant 0 : i32
    %c0_i32_1 = arith.constant 0 : i32
    return %arg0, %c0_i32, %c0_i32_0 : i32, i32, i32
  }
  func.func @transform_1(%arg0: i32) -> (i32, i32, i32) {
    %c0_i32 = arith.constant 0 : i32
    %c0_i32_0 = arith.constant 0 : i32
    %c0_i32_1 = arith.constant 0 : i32
    return %arg0, %c0_i32, %c0_i32_0 : i32, i32, i32
  }
  func.func @transform_2(%arg0: i32) -> (i32, i32, i32) {
    %c0_i32 = arith.constant 0 : i32
    %c0_i32_0 = arith.constant 0 : i32
    %c0_i32_1 = arith.constant 0 : i32
    return %arg0, %c0_i32, %c0_i32_0 : i32, i32, i32
  }
  func.func @transform_3(%arg0: i32) -> (i32, i32) {
    %c0_i32 = arith.constant 0 : i32
    %c0_i32_0 = arith.constant 0 : i32
    %c0_i32_1 = arith.constant 0 : i32
    return %c0_i32, %c0_i32_0 : i32, i32
  }
  func.func @transform_4(%arg0: i32) -> (i32, i32) {
    %c0_i32 = arith.constant 0 : i32
    %c0_i32_0 = arith.constant 0 : i32
    %c0_i32_1 = arith.constant 0 : i32
    return %c0_i32, %c0_i32_0 : i32, i32
  }
  func.func @transform_5(%arg0: i32) -> (i32, i32) {
    %c0_i32 = arith.constant 0 : i32
    %c0_i32_0 = arith.constant 0 : i32
    %c0_i32_1 = arith.constant 0 : i32
    return %c0_i32, %c0_i32_0 : i32, i32
  }
  func.func @transform_6(%arg0: i32) -> (i32, i32) {
    %c0_i32 = arith.constant 0 : i32
    %c0_i32_0 = arith.constant 0 : i32
    %c0_i32_1 = arith.constant 0 : i32
    return %c0_i32, %c0_i32_0 : i32, i32
  }
  func.func @transform_7(%arg0: i32) -> (i32, i32) {
    %c0_i32 = arith.constant 0 : i32
    %c0_i32_0 = arith.constant 0 : i32
    %c0_i32_1 = arith.constant 0 : i32
    return %c0_i32, %c0_i32_0 : i32, i32
  }
  func.func @transform_8(%arg0: i32) -> (i32, i32) {
    %c0_i32 = arith.constant 0 : i32
    %c0_i32_0 = arith.constant 0 : i32
    %c0_i32_1 = arith.constant 0 : i32
    return %c0_i32, %c0_i32_0 : i32, i32
  }
  func.func @transform_9(%arg0: i32) -> (i32, i32) {
    %c0_i32 = arith.constant 0 : i32
    %c0_i32_0 = arith.constant 0 : i32
    %c0_i32_1 = arith.constant 0 : i32
    return %c0_i32, %c0_i32_0 : i32, i32
  }
  func.func @transform_10(%arg0: i32) -> (i32, i32) {
    %c0_i32 = arith.constant 0 : i32
    %c0_i32_0 = arith.constant 0 : i32
    %c0_i32_1 = arith.constant 0 : i32
    return %c0_i32, %c0_i32_0 : i32, i32
  }
  func.func @transform_11(%arg0: i32) -> (i32, i32) {
    %c0_i32 = arith.constant 0 : i32
    %c0_i32_0 = arith.constant 0 : i32
    %c0_i32_1 = arith.constant 0 : i32
    return %c0_i32, %c0_i32_0 : i32, i32
  }
  func.func @transform_12(%arg0: i32) -> (i32, i32) {
    %c0_i32 = arith.constant 0 : i32
    %c0_i32_0 = arith.constant 0 : i32
    %c0_i32_1 = arith.constant 0 : i32
    return %c0_i32, %c0_i32_0 : i32, i32
  }
  func.func @transform_13(%arg0: i32) -> (i32, i32) {
    %c0_i32 = arith.constant 0 : i32
    %c0_i32_0 = arith.constant 0 : i32
    %c0_i32_1 = arith.constant 0 : i32
    return %c0_i32, %c0_i32_0 : i32, i32
  }
  func.func @transform_14(%arg0: i32) -> (i32, i32) {
    %c0_i32 = arith.constant 0 : i32
    %c0_i32_0 = arith.constant 0 : i32
    %c0_i32_1 = arith.constant 0 : i32
    return %c0_i32, %c0_i32_0 : i32, i32
  }
  func.func @transform_15(%arg0: i32) -> (i32, i32) {
    %c0_i32 = arith.constant 0 : i32
    %c0_i32_0 = arith.constant 0 : i32
    %c0_i32_1 = arith.constant 0 : i32
    return %c0_i32, %c0_i32_0 : i32, i32
  }
  func.func @transform_16(%arg0: i32) -> (i32, i32, i32) {
    %c0_i32 = arith.constant 0 : i32
    %c0_i32_0 = arith.constant 0 : i32
    %c0_i32_1 = arith.constant 0 : i32
    return %arg0, %c0_i32, %c0_i32_0 : i32, i32, i32
  }
}

</mosaic_0001>

<bundles_post_ra>
// kernel: critic_forward.1
= control target key start
LH: loop header
LB: loop body
LE: loop exit
PB: predicated region body
PF: predicated region fallthrough
CT: control target
= control target key end

     0   :  { %s5549_s21 = smov 0   ;;  %s9004_s0 = inlined_call_operand.vmem [shape: f32[2,1,1600], index: 0, kind: input, shape index: {}]   ;;  %s9005_s1 = inlined_call_operand.vmem [shape: f32[2,1,3], index: 1, kind: input, shape index: {}]   ;;  %s9006_s2 = inlined_call_operand.vmem [shape: f32[2,1,4], index: 2, kind: input, shape index: {}]   ;;  %s9007_s3 = inlined_call_operand.vmem [shape: f32[8,25], index: 3, kind: input, shape index: {}]   ;;  %s9008_s4 = inlined_call_operand.vmem [shape: f32[8,1], index: 4, kind: input, shape index: {}]   ;;  %s9009_s5 = inlined_call_operand.vmem [shape: bf16[24,72], index: 5, kind: input, shape index: {}]   ;;  %s9010_s6 = inlined_call_operand.vmem [shape: f32[24,1], index: 6, kind: input, shape index: {}]   ;;  %s9011_s7 = inlined_call_operand.vmem [shape: bf16[1231,64], index: 7, kind: input, shape index: {}]   ;;  %s9012_s8 = inlined_call_operand.vmem [shape: bf16[3,216], index: 8, kind: input, shape index: {}]   ;;  %s9013_s9 = inlined_call_operand.vmem [shape: f32[3,1], index: 9, kind: input, shape index: {}]   ;;  %s9014_s10 = inlined_call_operand.vmem [shape: f32[145,80], index: 10, kind: input, shape index: {}]   ;;  %s9015_s11 = inlined_call_operand.vmem [shape: f32[1,80], index: 11, kind: input, shape index: {}]   ;;  %s9016_s12 = inlined_call_operand.vmem [shape: f32[80,80], index: 12, kind: input, shape index: {}]   ;;  %s9017_s13 = inlined_call_operand.vmem [shape: f32[1,80], index: 13, kind: input, shape index: {}]   ;;  %s9018_s14 = inlined_call_operand.vmem [shape: f32[80,128], index: 14, kind: input, shape index: {}]   ;;  %s9019_s15 = inlined_call_operand.vmem [shape: f32[1,128], index: 15, kind: input, shape index: {}]   ;;  %s9020_s16 = inlined_call_operand.vmem [shape: f32[2,1,128], index: 16, kind: output, shape index: {}]  }
   0x1   :  { %9245 = sst [smem:[#allocation177_spill]] %s9004_s0 }
   0x2 LB: > { %s4900_s22 = sadd.s32 4294967295, %s5415_s21   ;;  %p4904_p0 = scmp.ge.s32.totalorder %s5415_s21, 1  ;;  %s5415_s21 = sphi %s5549_s21, %s26_s21  }
   0x3   : > { %p477_p1 = scmp.lt.s32.totalorder %s5415_s21, 3 }
   0x5   : > { %p478_p2 = pnand %p4904_p0, %p477_p1 }
   0x7   : > { %481 = sbr.rel (%p478_p2) target bundleno = 3001 (0xbb9), region = 84 }
   0xc   : > { %v5560_v0 = vld [vmem:[%s9007_s3] sm:$0xff]  ;;  %v5417_v1 = vmov 1   ;;  %v5418_v2 = vmov 2   ;;  %v5419_v3 = vmov 3   ;;  %p530_p3 = scmp.lt.s32.totalorder %s4900_s22, 1  ;;  %s9246_s28 = sld [smem:[#allocation177_spill]] }
   0xd   : > { %5380 = vset.pattern.permute.xlu0 %v5417_v1  ;;  %5381 = vset.pattern.permute.xlu1 %v5418_v2  ;;  %s5420_s30 = smov 127   ;;  %s5421_s0 = smov 126   ;;  %v5422_v39 = vmov 4   ;;  %vm648_vm0 = vcmask 1039360   ;;  %vm741_vm1 = vcmask 1031168   ;;  %vm834_vm2 = vcmask 1022976  }
   0xe   : > { %593 = vperm.xlu0 %5380, %v5560_v0   ;;  %686 = vperm.xlu1 %5381, %v5560_v0   ;;  %s9713_s22 = smov (!%p530_p3, %s4900_s22), 1  ;;  %s5423_s17 = smov 125   ;;  %vm927_vm3 = vcmask 1014784   ;;  %vm1384_vm4 = vcmask 719872   ;;  %vm1840_vm5 = vcmask 392192   ;;  %vm2308_vm6 = vcmask 64512  }
   0xf   : > { %s5324_s25 = smul.u32 13, %s9713_s22  ;;  %s5424_s18 = smov 124   ;;  %vm2745_vm7 = vcmask 785408   ;;  %vm2958_vm8 = vcmask 711680   ;;  %vm3276_vm9 = vcmask 752640   ;;  %vm3286_vm10 = vcmask 1043456  }
  0x10   : > { %s5446_s19 = smov 88   ;;  %s5447_s20 = smov 48   ;;  %vm3246_vm11 = vcmask 769024   ;;  %vm3152_vm12 = vcmask 375808   ;;  %vm3185_vm13 = vcmask 359424   ;;  %vm3476_vm14 = vcmask 588800  }
  0x11   : > { %s5448_s23 = smov 8   ;;  %s5449_s24 = smov 96   ;;  %vm4365_vm15 = vcmask 1046528  }
  0x12   : > { %s533_s29 = scalar_lea.vmem %s9246_s28, %s5324_s25  ;;  %s5450_s27 = smov 87  }
  0x13   : > { %v544_v4 = vld [vmem:[%s533_s29] sm:$0xff]  ;;  %v545_v12 = vld [vmem:[%s533_s29 + $0x8] sm:$0x1f]  ;;  %s5451_s28 = smov 92   ;;  %s5452_s29 = smov 94  }
  0x14   : > { %v5571_v5 = vperm.slane %v544_v4, 6  ;;  %v5573_v6 = vperm.slane %v544_v4, 2  ;;  %v5575_v7 = vperm.slane %v544_v4, 0  ;;  %v5583_v13 = vperm.slane %v545_v12, 1  ;;  %s5461_s25 = smov 111  }
  0x15   : > { %v5585_v14 = vperm.slane %v544_v4, 3  ;;  %v5587_v15 = vperm.slane %v544_v4, 1  ;;  %v5595_v19 = vperm.slane %v545_v12, 4  ;;  %v5597_v20 = vperm.slane %v544_v4, 5 }
  0x16   : > { %5382 = vset.pattern.permute.xlu0 %v5419_v3  ;;  %9247 = vst [vmem:[#allocation2_spill] sm:$0xff] %v5571_v5  ;;  %v5599_v21 = vperm.slane %v544_v4, 4  ;;  %v5607_v26 = vperm.slane %v545_v12, 0  ;;  %v5609_v27 = vperm.slane %v544_v4, 7  ;;  %v5617_v31 = vperm.slane %v545_v12, 3 }
  0x17   : > { %779 = vperm.xlu0 %5382, %v5560_v0   ;;  %9248 = vst [vmem:[#allocation3_spill] sm:$0xff] %v5583_v13  ;;  %v5619_v32 = vperm.slane %v545_v12, 2 }
  0x18   : > { %9249 = vst [vmem:[#allocation4_spill] sm:$0xff] %v5595_v19 }
  0x19   : > { %9250 = vst [vmem:[#allocation5_spill] sm:$0xff] %v5597_v20 }
  0x1a   : > { %9251 = vst [vmem:[#allocation6_spill] sm:$0xff] %v5607_v26 }
  0x1b   : > { %9252 = vst [vmem:[#allocation7_spill] sm:$0xff] %v5609_v27 }
  0x1c   : > { %9253 = vst [vmem:[#allocation8_spill] sm:$0xff] %v5617_v31 }
  0x1d   : > { %9254 = vst [vmem:[#allocation9_spill] sm:$0xff] %v5619_v32 }
  0x1f   : > { %5383 = vset.pattern.permute.xlu0 %v5422_v39 }
  0x80   : > { %v594_v8 = vpop.permute.xlu0 %593  ;;  %v687_v25 = vpop.permute.xlu1 %686 }
  0x81   : > { %v602_v9 = vmul.f32 %v594_v8, %v5571_v5  ;;  %v598_v10 = vmul.f32 %v594_v8, %v5573_v6  ;;  %v596_v11 = vmul.f32 %v594_v8, %v5575_v7  ;;  %v605_v16 = vmul.f32 %v594_v8, %v5583_v13 }
  0x82   : > { %v599_v17 = vmul.f32 %v594_v8, %v5585_v14  ;;  %v597_v18 = vmul.f32 %v594_v8, %v5587_v15  ;;  %v608_v22 = vmul.f32 %v594_v8, %v5595_v19  ;;  %v601_v23 = vmul.f32 %v594_v8, %v5597_v20 }
  0x83   : > { %634 = vrot.lane.b32.xlu0 %v602_v9, %s5420_s30  ;;  %626 = vrot.lane.b32.xlu2 %v598_v10, %s5420_s30  ;;  %v600_v24 = vmul.f32 %v594_v8, %v5599_v21  ;;  %v690_v28 = vmul.f32 %v687_v25, %v5587_v15  ;;  %v604_v29 = vmul.f32 %v594_v8, %v5607_v26 }
  0x84   : > { %622 = vrot.lane.b32.xlu1 %v596_v11, %s5420_s30  ;;  %v603_v30 = vmul.f32 %v594_v8, %v5609_v27  ;;  %v607_v33 = vmul.f32 %v594_v8, %v5617_v31  ;;  %v693_v34 = vmul.f32 %v687_v25, %v5599_v21  ;;  %v606_v35 = vmul.f32 %v594_v8, %v5619_v32 }
  0x85   : > { %v696_v36 = vmul.f32 %v687_v25, %v5609_v27  ;;  %v689_v37 = vmul.f32 %v687_v25, %v5575_v7  ;;  %v691_v38 = vmul.f32 %v687_v25, %v5573_v6  ;;  %v699_v40 = vmul.f32 %v687_v25, %v5619_v32 }
  0x86   : > { %v692_v41 = vmul.f32 %v687_v25, %v5585_v14  ;;  %v694_v42 = vmul.f32 %v687_v25, %v5597_v20  ;;  %v695_v45 = vmul.f32 %v687_v25, %v5571_v5  ;;  %v697_v46 = vmul.f32 %v687_v25, %v5607_v26 }
  0x87   : > { %v698_v48 = vmul.f32 %v687_v25, %v5583_v13  ;;  %v700_v49 = vmul.f32 %v687_v25, %v5617_v31  ;;  %v701_v51 = vmul.f32 %v687_v25, %v5595_v19  ;;  %v5425_v25 = vmov 6  }
  0x88   : > { %5385 = vset.pattern.permute.xlu1 %v5425_v25 }
  0x89   : > { %v780_v43 = vpop.permute.xlu0 %779 }
  0x8a   : > { %v786_v44 = vmul.f32 %v780_v43, %v5599_v21  ;;  %v789_v47 = vmul.f32 %v780_v43, %v5609_v27  ;;  %v792_v50 = vmul.f32 %v780_v43, %v5619_v32  ;;  %v782_v52 = vmul.f32 %v780_v43, %v5575_v7 }
  0x8b   : > { %640 = vrot.lane.b32.xlu0 %v605_v16, %s5420_s30  ;;  %628 = vrot.lane.b32.xlu2 %v599_v17, %s5420_s30  ;;  %v783_v53 = vmul.f32 %v780_v43, %v5587_v15  ;;  %v784_v54 = vmul.f32 %v780_v43, %v5573_v6  ;;  %v785_v55 = vmul.f32 %v780_v43, %v5585_v14 }
  0x8c   : > { %624 = vrot.lane.b32.xlu1 %v597_v18, %s5420_s30  ;;  %v787_v56 = vmul.f32 %v780_v43, %v5597_v20  ;;  %v788_v57 = vmul.f32 %v780_v43, %v5571_v5  ;;  %v790_v58 = vmul.f32 %v780_v43, %v5607_v26  ;;  %v791_v59 = vmul.f32 %v780_v43, %v5583_v13 }
  0x8d   : > { %v793_v60 = vmul.f32 %v780_v43, %v5617_v31  ;;  %v794_v61 = vmul.f32 %v780_v43, %v5595_v19 }
  0x93   : > { %646 = vrot.lane.b32.xlu0 %v608_v22, %s5420_s30  ;;  %632 = vrot.lane.b32.xlu2 %v601_v23, %s5420_s30 }
  0x94   : > { %630 = vrot.lane.b32.xlu1 %v600_v24, %s5420_s30 }
  0x9b   : > { %638 = vrot.lane.b32.xlu2 %v604_v29, %s5420_s30  ;;  %717 = vrot.lane.b32.xlu0 %v690_v28, %s5421_s0 }
  0x9c   : > { %636 = vrot.lane.b32.xlu1 %v603_v30, %s5420_s30 }
  0xa3   : > { %644 = vrot.lane.b32.xlu2 %v607_v33, %s5420_s30  ;;  %723 = vrot.lane.b32.xlu0 %v693_v34, %s5421_s0 }
  0xa4   : > { %642 = vrot.lane.b32.xlu1 %v606_v35, %s5420_s30 }
  0xab   : > { %729 = vrot.lane.b32.xlu0 %v696_v36, %s5421_s0  ;;  %715 = vrot.lane.b32.xlu2 %v689_v37, %s5421_s0 }
  0xac   : > { %719 = vrot.lane.b32.xlu1 %v691_v38, %s5421_s0 }
  0xb3   : > { %735 = vrot.lane.b32.xlu0 %v699_v40, %s5421_s0  ;;  %721 = vrot.lane.b32.xlu2 %v692_v41, %s5421_s0 }
  0xb4   : > { %725 = vrot.lane.b32.xlu1 %v694_v42, %s5421_s0 }
  0xbb   : > { %816 = vrot.lane.b32.xlu0 %v786_v44, %s5423_s17  ;;  %727 = vrot.lane.b32.xlu2 %v695_v45, %s5421_s0 }
  0xbc   : > { %731 = vrot.lane.b32.xlu1 %v697_v46, %s5421_s0 }
  0xc3   : > { %822 = vrot.lane.b32.xlu0 %v789_v47, %s5423_s17  ;;  %733 = vrot.lane.b32.xlu2 %v698_v48, %s5421_s0 }
  0xc4   : > { %737 = vrot.lane.b32.xlu1 %v700_v49, %s5421_s0 }
  0xcb   : > { %828 = vrot.lane.b32.xlu0 %v792_v50, %s5423_s17  ;;  %739 = vrot.lane.b32.xlu2 %v701_v51, %s5421_s0 }
  0xcc   : > { %808 = vrot.lane.b32.xlu1 %v782_v52, %s5423_s17  ;;  %v5426_v52 = vmov 5  }
  0xd3   : > { %872 = vperm.xlu0 %5383, %v5560_v0   ;;  %810 = vrot.lane.b32.xlu2 %v783_v53, %s5423_s17 }
  0xd4   : > { %812 = vrot.lane.b32.xlu1 %v784_v54, %s5423_s17 }
  0xdb   : > { %814 = vrot.lane.b32.xlu2 %v785_v55, %s5423_s17  ;;  %5384 = vset.pattern.permute.xlu0 %v5426_v52 }
  0xdc   : > { %818 = vrot.lane.b32.xlu1 %v787_v56, %s5423_s17 }
  0xe3   : > { %820 = vrot.lane.b32.xlu2 %v788_v57, %s5423_s17  ;;  %v5427_v57 = vmov 7  }
  0xe4   : > { %824 = vrot.lane.b32.xlu1 %v790_v58, %s5423_s17  ;;  %v5762_v58 = vpop.permute.xlu2 %626 }
  0xe5   : > { %9284 = vst [vmem:[#allocation39_spill] sm:$0xff] %v5762_v58 }
  0xeb   : > { %826 = vrot.lane.b32.xlu2 %v791_v59, %s5423_s17 }
  0xec   : > { %830 = vrot.lane.b32.xlu1 %v793_v60, %s5423_s17 }
  0xf3   : > { %832 = vrot.lane.b32.xlu2 %v794_v61, %s5423_s17 }
  0xf5   : > { %v5676_v62 = vpop.permute.xlu0 %634 }
  0xf6   : > { %9255 = vst [vmem:[#allocation10_spill] sm:$0xff] %v5676_v62  ;;  %v5692_v10 = vpop.permute.xlu1 %622 }
  0xf7   : > { %9263 = vst [vmem:[#allocation18_spill] sm:$0xff] %v5692_v10 }
  0xfd   : > { %v5678_v63 = vpop.permute.xlu0 %640 }
  0xfe   : > { %9256 = vst [vmem:[#allocation11_spill] sm:$0xff] %v5678_v63  ;;  %v5696_v12 = vpop.permute.xlu1 %624 }
  0xff   : > { %9265 = vst [vmem:[#allocation20_spill] sm:$0xff] %v5696_v12 }
 0x105   : > { %v5680_v1 = vpop.permute.xlu0 %646 }
 0x106   : > { %9257 = vst [vmem:[#allocation12_spill] sm:$0xff] %v5680_v1  ;;  %v5700_v17 = vpop.permute.xlu1 %630 }
 0x107   : > { %9267 = vst [vmem:[#allocation22_spill] sm:$0xff] %v5700_v17 }
 0x10d   : > { %v5682_v2 = vpop.permute.xlu0 %717 }
 0x10e   : > { %9258 = vst [vmem:[#allocation13_spill] sm:$0xff] %v5682_v2  ;;  %v5710_v30 = vpop.permute.xlu1 %636 }
 0x10f   : > { %9268 = vst [vmem:[#allocation23_spill] sm:$0xff] %v5710_v30 }
 0x115   : > { %v5684_v3 = vpop.permute.xlu0 %723 }
 0x116   : > { %9259 = vst [vmem:[#allocation14_spill] sm:$0xff] %v5684_v3  ;;  %v5721_v37 = vpop.permute.xlu1 %642 }
 0x117   : > { %9269 = vst [vmem:[#allocation24_spill] sm:$0xff] %v5721_v37  ;;  %v5439_v37 = vmov 14  }
 0x11d   : > { %v5686_v4 = vpop.permute.xlu0 %729 }
 0x11e   : > { %9260 = vst [vmem:[#allocation15_spill] sm:$0xff] %v5686_v4  ;;  %v5728_v40 = vpop.permute.xlu1 %719 }
 0x11f   : > { %9270 = vst [vmem:[#allocation25_spill] sm:$0xff] %v5728_v40 }
 0x125   : > { %v5688_v8 = vpop.permute.xlu0 %735 }
 0x126   : > { %9261 = vst [vmem:[#allocation16_spill] sm:$0xff] %v5688_v8  ;;  %v5734_v43 = vpop.permute.xlu1 %725  ;;  %v5436_v8 = vmov 13  }
 0x127   : > { %9271 = vst [vmem:[#allocation26_spill] sm:$0xff] %v5734_v43 }
 0x12d   : > { %v5690_v9 = vpop.permute.xlu0 %816 }
 0x12e   : > { %9262 = vst [vmem:[#allocation17_spill] sm:$0xff] %v5690_v9  ;;  %v5737_v44 = vpop.permute.xlu1 %731 }
 0x12f   : > { %9272 = vst [vmem:[#allocation27_spill] sm:$0xff] %v5737_v44 }
 0x135   : > { %v5694_v11 = vpop.permute.xlu0 %822 }
 0x136   : > { %9264 = vst [vmem:[#allocation19_spill] sm:$0xff] %v5694_v11  ;;  %v5739_v45 = vpop.permute.xlu1 %737 }
 0x137   : > { %9273 = vst [vmem:[#allocation28_spill] sm:$0xff] %v5739_v45  ;;  %v5431_v45 = vmov 9  }
 0x13d   : > { %v5698_v16 = vpop.permute.xlu0 %828 }
 0x13e   : > { %9266 = vst [vmem:[#allocation21_spill] sm:$0xff] %v5698_v16  ;;  %v5741_v46 = vpop.permute.xlu1 %808  ;;  %v5432_v16 = vmov 17  }
 0x13f   : > { %9274 = vst [vmem:[#allocation29_spill] sm:$0xff] %v5741_v46 }
 0x145   : > { %v873_v18 = vpop.permute.xlu0 %872 }
 0x146   : > { %v879_v22 = vmul.f32 %v873_v18, %v5599_v21  ;;  %v876_v23 = vmul.f32 %v873_v18, %v5587_v15  ;;  %v875_v24 = vmul.f32 %v873_v18, %v5575_v7  ;;  %v882_v28 = vmul.f32 %v873_v18, %v5609_v27  ;;  %v5743_v47 = vpop.permute.xlu1 %812 }
 0x147   : > { %v878_v29 = vmul.f32 %v873_v18, %v5585_v14  ;;  %v877_v33 = vmul.f32 %v873_v18, %v5573_v6  ;;  %v885_v34 = vmul.f32 %v873_v18, %v5619_v32  ;;  %v881_v35 = vmul.f32 %v873_v18, %v5571_v5  ;;  %9275 = vst [vmem:[#allocation30_spill] sm:$0xff] %v5743_v47 }
 0x148   : > { %909 = vrot.lane.b32.xlu0 %v879_v22, %s5424_s18  ;;  %903 = vrot.lane.b32.xlu2 %v876_v23, %s5424_s18  ;;  %v880_v36 = vmul.f32 %v873_v18, %v5597_v20  ;;  %v884_v38 = vmul.f32 %v873_v18, %v5583_v13  ;;  %v883_v39 = vmul.f32 %v873_v18, %v5607_v26  ;;  %v5770_v22 = vpop.permute.xlu2 %628 }
 0x149   : > { %901 = vrot.lane.b32.xlu1 %v875_v24, %s5424_s18  ;;  %v887_v41 = vmul.f32 %v873_v18, %v5595_v19  ;;  %v886_v42 = vmul.f32 %v873_v18, %v5617_v31  ;;  %9285 = vst [vmem:[#allocation40_spill] sm:$0xff] %v5770_v22 }
 0x14e   : > { %v5745_v48 = vpop.permute.xlu1 %818 }
 0x14f   : > { %9276 = vst [vmem:[#allocation31_spill] sm:$0xff] %v5745_v48 }
 0x150   : > { %915 = vrot.lane.b32.xlu0 %v882_v28, %s5424_s18  ;;  %907 = vrot.lane.b32.xlu2 %v878_v29, %s5424_s18 }
 0x151   : > { %905 = vrot.lane.b32.xlu1 %v877_v33, %s5424_s18 }
 0x156   : > { %v5747_v49 = vpop.permute.xlu1 %824 }
 0x157   : > { %9277 = vst [vmem:[#allocation32_spill] sm:$0xff] %v5747_v49 }
 0x158   : > { %921 = vrot.lane.b32.xlu0 %v885_v34, %s5424_s18  ;;  %913 = vrot.lane.b32.xlu2 %v881_v35, %s5424_s18  ;;  %v5781_v34 = vpop.permute.xlu2 %632 }
 0x159   : > { %911 = vrot.lane.b32.xlu1 %v880_v36, %s5424_s18  ;;  %9286 = vst [vmem:[#allocation41_spill] sm:$0xff] %v5781_v34 }
 0x15e   : > { %v5749_v50 = vpop.permute.xlu1 %830 }
 0x15f   : > { %9278 = vst [vmem:[#allocation33_spill] sm:$0xff] %v5749_v50 }
 0x160   : > { %919 = vrot.lane.b32.xlu2 %v884_v38, %s5424_s18  ;;  %965 = vperm.xlu0 %5384, %v5560_v0  }
 0x161   : > { %917 = vrot.lane.b32.xlu1 %v883_v39, %s5424_s18  ;;  %v5792_v39 = vpop.permute.xlu2 %638 }
 0x162   : > { %9287 = vst [vmem:[#allocation42_spill] sm:$0xff] %v5792_v39 }
 0x168   : > { %925 = vrot.lane.b32.xlu2 %v887_v41, %s5424_s18 }
 0x169   : > { %923 = vrot.lane.b32.xlu1 %v886_v42, %s5424_s18  ;;  %v5797_v42 = vpop.permute.xlu2 %644 }
 0x16a   : > { %9288 = vst [vmem:[#allocation43_spill] sm:$0xff] %v5797_v42  ;;  %v5433_v42 = vmov 16  }
 0x171   : > { %981 = vperm.xlu1 %5385, %v5560_v0   ;;  %v5799_v52 = vpop.permute.xlu2 %715 }
 0x172   : > { %9289 = vst [vmem:[#allocation44_spill] sm:$0xff] %v5799_v52 }
 0x179   : > { %5386 = vset.pattern.permute.xlu1 %v5427_v57  ;;  %v5801_v57 = vpop.permute.xlu2 %721 }
 0x17a   : > { %9290 = vst [vmem:[#allocation45_spill] sm:$0xff] %v5801_v57 }
 0x1bb   : > { %v5751_v51 = vpop.permute.xlu1 %901 }
 0x1bc   : > { %9279 = vst [vmem:[#allocation34_spill] sm:$0xff] %v5751_v51 }
 0x1c3   : > { %v5754_v53 = vpop.permute.xlu1 %905 }
 0x1c4   : > { %9280 = vst [vmem:[#allocation35_spill] sm:$0xff] %v5754_v53  ;;  %v5445_v53 = vmov 20  }
 0x1cb   : > { %v5756_v54 = vpop.permute.xlu1 %911 }
 0x1cc   : > { %9281 = vst [vmem:[#allocation36_spill] sm:$0xff] %v5756_v54 }
 0x1d3   : > { %v5758_v55 = vpop.permute.xlu1 %917 }
 0x1d4   : > { %9282 = vst [vmem:[#allocation37_spill] sm:$0xff] %v5758_v55  ;;  %v5443_v55 = vmov 24  }
 0x1db   : > { %v5760_v56 = vpop.permute.xlu1 %923 }
 0x1dc   : > { %9283 = vst [vmem:[#allocation38_spill] sm:$0xff] %v5760_v56 }
 0x1e3   : > { %v982_v59 = vpop.permute.xlu1 %981 }
 0x1e4   : > { %v987_v60 = vmul.f32 %v982_v59, %v5585_v14  ;;  %v985_v61 = vmul.f32 %v982_v59, %v5587_v15  ;;  %v984_v18 = vmul.f32 %v982_v59, %v5575_v7  ;;  %v990_v23 = vmul.f32 %v982_v59, %v5571_v5 }
 0x1e5   : > { %v988_v24 = vmul.f32 %v982_v59, %v5599_v21  ;;  %v986_v25 = vmul.f32 %v982_v59, %v5573_v6  ;;  %v993_v28 = vmul.f32 %v982_v59, %v5583_v13  ;;  %v991_v29 = vmul.f32 %v982_v59, %v5609_v27 }
 0x1e6   : > { %1016 = vrot.lane.b32.xlu0 %v987_v60, %s5420_s30  ;;  %1012 = vrot.lane.b32.xlu1 %v985_v61, %s5420_s30  ;;  %v989_v33 = vmul.f32 %v982_v59, %v5597_v20  ;;  %v996_v35 = vmul.f32 %v982_v59, %v5595_v19  ;;  %v994_v36 = vmul.f32 %v982_v59, %v5619_v32  ;;  %v5803_v60 = vpop.permute.xlu2 %727 }
 0x1e7   : > { %1010 = vrot.lane.b32.xlu2 %v984_v18, %s5420_s30  ;;  %v992_v38 = vmul.f32 %v982_v59, %v5607_v26  ;;  %v995_v41 = vmul.f32 %v982_v59, %v5617_v31  ;;  %9291 = vst [vmem:[#allocation46_spill] sm:$0xff] %v5803_v60 }
 0x1ee   : > { %1022 = vrot.lane.b32.xlu0 %v990_v23, %s5420_s30  ;;  %1018 = vrot.lane.b32.xlu1 %v988_v24, %s5420_s30  ;;  %v5805_v61 = vpop.permute.xlu2 %733 }
 0x1ef   : > { %1014 = vrot.lane.b32.xlu2 %v986_v25, %s5420_s30  ;;  %9292 = vst [vmem:[#allocation47_spill] sm:$0xff] %v5805_v61  ;;  %v5444_v61 = vmov 15  }
 0x1f6   : > { %1028 = vrot.lane.b32.xlu0 %v993_v28, %s5420_s30  ;;  %1024 = vrot.lane.b32.xlu1 %v991_v29, %s5420_s30  ;;  %v5807_v18 = vpop.permute.xlu2 %739  ;;  %v5428_v28 = vmov 11   ;;  %v5429_v29 = vmov 8  }
 0x1f7   : > { %1020 = vrot.lane.b32.xlu2 %v989_v33, %s5420_s30  ;;  %9293 = vst [vmem:[#allocation48_spill] sm:$0xff] %v5807_v18  ;;  %5388 = vset.pattern.permute.xlu0 %v5429_v29  ;;  %v5430_v33 = vmov 12  }
 0x1f8   : > { %5387 = vset.pattern.permute.xlu2 %v5428_v28 }
 0x1fe   : > { %1034 = vrot.lane.b32.xlu0 %v996_v35, %s5420_s30  ;;  %1030 = vrot.lane.b32.xlu1 %v994_v36, %s5420_s30  ;;  %v5809_v23 = vpop.permute.xlu2 %810 }
 0x1ff   : > { %1026 = vrot.lane.b32.xlu2 %v992_v38, %s5420_s30  ;;  %9294 = vst [vmem:[#allocation49_spill] sm:$0xff] %v5809_v23 }
 0x206   : > { %1073 = vperm.xlu1 %5386, %v5560_v0   ;;  %v5811_v24 = vpop.permute.xlu2 %814 }
 0x207   : > { %1032 = vrot.lane.b32.xlu2 %v995_v41, %s5420_s30  ;;  %9295 = vst [vmem:[#allocation50_spill] sm:$0xff] %v5811_v24 }
 0x20e   : > { %v5815_v25 = vpop.permute.xlu2 %820  ;;  %5389 = vset.pattern.permute.xlu1 %v5430_v33 }
 0x20f   : > { %9296 = vst [vmem:[#allocation51_spill] sm:$0xff] %v5815_v25 }
 0x216   : > { %v5819_v36 = vpop.permute.xlu2 %826 }
 0x217   : > { %9297 = vst [vmem:[#allocation52_spill] sm:$0xff] %v5819_v36 }
 0x21e   : > { %v5823_v41 = vpop.permute.xlu2 %832 }
 0x21f   : > { %9299 = vst [vmem:[#allocation54_spill] sm:$0xff] %v5823_v41 }
 0x226   : > { %v5827_v1 = vpop.permute.xlu2 %903 }
 0x227   : > { %9301 = vst [vmem:[#allocation56_spill] sm:$0xff] %v5827_v1 }
 0x22e   : > { %v5840_v41 = vpop.permute.xlu2 %907 }
 0x22f   : > { %9303 = vst [vmem:[#allocation58_spill] sm:$0xff] %v5840_v41 }
 0x236   : > { %v5845_v50 = vpop.permute.xlu2 %913 }
 0x237   : > { %9304 = vst [vmem:[#allocation59_spill] sm:$0xff] %v5845_v50 }
 0x258   : > { %v5813_v59 = vpop.permute.xlu1 %1012 }
 0x260   : > { %v5817_v35 = vpop.permute.xlu1 %1018 }
 0x268   : > { %v5821_v38 = vpop.permute.xlu1 %1024 }
 0x269   : > { %9298 = vst [vmem:[#allocation53_spill] sm:$0xff] %v5821_v38 }
 0x270   : > { %v5825_v18 = vpop.permute.xlu1 %1030 }
 0x271   : > { %9300 = vst [vmem:[#allocation55_spill] sm:$0xff] %v5825_v18 }
 0x278   : > { %v5829_v56 = vpop.permute.xlu1 %1073 }
 0x279   : > { %9302 = vst [vmem:[#allocation57_spill] sm:$0xff] %v5829_v56  ;;  %v1078_v28 = vmul.f32 %v5829_v56, %v5573_v6  ;;  %v1077_v29 = vmul.f32 %v5829_v56, %v5587_v15  ;;  %v1076_v33 = vmul.f32 %v5829_v56, %v5575_v7 }
 0x27b   : > { %1106 = vrot.lane.b32.xlu1 %v1078_v28, %s5421_s0  ;;  %1104 = vrot.lane.b32.xlu0 %v1077_v29, %s5421_s0  ;;  %v5850_v28 = vpop.permute.xlu2 %919  ;;  %v5434_v29 = vmov 21  }
 0x27c   : > { %1102 = vrot.lane.b32.xlu2 %v1076_v33, %s5421_s0  ;;  %9305 = vst [vmem:[#allocation60_spill] sm:$0xff] %v5850_v28  ;;  %v5435_v33 = vmov 19   ;;  %v5442_v28 = vmov 10  }
 0x283   : > { %1529 = vperm.xlu1 %5389, %v5560_v0   ;;  %1165 = vperm.xlu0 %5388, %v5560_v0  }
 0x284   : > { %1437 = vperm.xlu2 %5387, %v5560_v0  }
 0x28b   : > { %5391 = vset.pattern.permute.xlu1 %v5431_v45  ;;  %5393 = vset.pattern.permute.xlu0 %v5432_v16  ;;  %v5855_v16 = vpop.permute.xlu2 %925  ;;  %v5437_v45 = vmov 18  }
 0x28c   : > { %5390 = vset.pattern.permute.xlu2 %v5433_v42  ;;  %1257 = vperm.xlu1 %5391, %v5560_v0   ;;  %9306 = vst [vmem:[#allocation61_spill] sm:$0xff] %v5855_v16  ;;  %v9028_v42 = vmov 0   ;;  %v5440_v16 = vmov 23  }
 0x28d   : > { %1988 = vperm.xlu0 %5393, %v5560_v0   ;;  %1894 = vperm.xlu2 %5390, %v5560_v0  }
 0x294   : > { %5394 = vset.pattern.permute.xlu1 %v5434_v29  ;;  %v5863_v29 = vpop.permute.xlu2 %1010 }
 0x295   : > { %5398 = vset.pattern.permute.xlu0 %v5435_v33  ;;  %5392 = vset.pattern.permute.xlu2 %v5436_v8  ;;  %v5861_v8 = vpop.permute.xlu0 %909  ;;  %v1080_v33 = vmul.f32 %v5829_v56, %v5599_v21 }
 0x296   : > { %2362 = vperm.xlu1 %5394, %v5560_v0   ;;  %2176 = vperm.xlu0 %5398, %v5560_v0   ;;  %9307 = vst [vmem:[#allocation62_spill] sm:$0xff] %v5861_v8 }
 0x297   : > { %1621 = vperm.xlu2 %5392, %v5560_v0  }
 0x29e   : > { %5396 = vset.pattern.permute.xlu1 %v5437_v45  ;;  %5399 = vset.pattern.permute.xlu0 %v9028_v42  ;;  %v5441_v45 = vmov 22   ;;  %v5872_v42 = vpop.permute.xlu2 %1014 }
 0x29f   : > { %5395 = vset.pattern.permute.xlu2 %v5439_v37  ;;  %2082 = vperm.xlu1 %5396, %v5560_v0   ;;  %v5870_v37 = vpop.permute.xlu0 %915 }
 0x2a0   : > { %577 = vperm.xlu0 %5399, %v5560_v0   ;;  %1713 = vperm.xlu2 %5395, %v5560_v0   ;;  %9308 = vst [vmem:[#allocation63_spill] sm:$0xff] %v5870_v37 }
 0x2a6   : > { %v5882_v36 = vpop.permute.xlu2 %1020 }
 0x2a7   : > { %5400 = vset.pattern.permute.xlu1 %v5440_v16  ;;  %v5876_v16 = vpop.permute.xlu0 %921 }
 0x2a8   : > { %1110 = vrot.lane.b32.xlu0 %v1080_v33, %s5421_s0  ;;  %5397 = vset.pattern.permute.xlu2 %v5441_v45  ;;  %9309 = vst [vmem:[#allocation64_spill] sm:$0xff] %v5876_v16  ;;  %v1081_v33 = vmul.f32 %v5829_v56, %v5597_v20  ;;  %v1079_v45 = vmul.f32 %v5829_v56, %v5585_v14 }
 0x2a9   : > { %2536 = vperm.xlu1 %5400, %v5560_v0   ;;  %2449 = vperm.xlu2 %5397, %v5560_v0  }
 0x2ae   : > { %v5891_v16 = vpop.permute.xlu2 %1026 }
 0x2af   : > { %9311 = vst [vmem:[#allocation66_spill] sm:$0xff] %v5891_v16 }
 0x2b1   : > { %5402 = vset.pattern.permute.xlu1 %v5442_v28  ;;  %5401 = vset.pattern.permute.xlu2 %v5443_v55  ;;  %v5886_v28 = vpop.permute.xlu0 %965  ;;  %v1082_v55 = vmul.f32 %v5829_v56, %v5571_v5 }
 0x2b2   : > { %1421 = vperm.xlu1 %5402, %v5560_v0   ;;  %2623 = vperm.xlu2 %5401, %v5560_v0   ;;  %9310 = vst [vmem:[#allocation65_spill] sm:$0xff] %v5886_v28 }
 0x2b6   : > { %v5895_v37 = vpop.permute.xlu2 %1032 }
 0x2b7   : > { %9312 = vst [vmem:[#allocation67_spill] sm:$0xff] %v5895_v37 }
 0x2b9   : > { %v5893_v49 = vpop.permute.xlu0 %1016 }
 0x2ba   : > { %1112 = vrot.lane.b32.xlu1 %v1081_v33, %s5421_s0  ;;  %1108 = vrot.lane.b32.xlu2 %v1079_v45, %s5421_s0 }
 0x2bb   : > { %5403 = vset.pattern.permute.xlu1 %v5444_v61  ;;  %5404 = vset.pattern.permute.xlu2 %v5445_v53 }
 0x2c1   : > { %v5897_v44 = vpop.permute.xlu0 %1022 }
 0x2c2   : > { %1114 = vrot.lane.b32.xlu2 %v1082_v55, %s5421_s0 }
 0x2c9   : > { %v5901_v45 = vpop.permute.xlu0 %1028 }
 0x2ca   : > { %9313 = vst [vmem:[#allocation68_spill] sm:$0xff] %v5901_v45 }
 0x2d1   : > { %v5914_v61 = vpop.permute.xlu0 %1034 }
 0x2d2   : > { %9315 = vst [vmem:[#allocation70_spill] sm:$0xff] %v5914_v61 }
 0x2d6   : > { %v5899_v33 = vpop.permute.xlu2 %1102 }
 0x2de   : > { %v5903_v11 = vpop.permute.xlu2 %1437 }
 0x2df   : > { %9314 = vst [vmem:[#allocation69_spill] sm:$0xff] %v5903_v11  ;;  %v1442_v39 = vmul.f32 %v5903_v11, %v5573_v6  ;;  %v1441_v55 = vmul.f32 %v5903_v11, %v5587_v15  ;;  %v1440_v63 = vmul.f32 %v5903_v11, %v5575_v7  ;;  %v1445_v4 = vmul.f32 %v5903_v11, %v5597_v20 }
 0x2e0   : > { %v1444_v30 = vmul.f32 %v5903_v11, %v5599_v21  ;;  %v1443_v50 = vmul.f32 %v5903_v11, %v5585_v14 }
 0x2e1   : > { %1470 = vrot.lane.b32.xlu2 %v1442_v39, %s5420_s30  ;;  %1468 = vrot.lane.b32.xlu1 %v1441_v55, %s5420_s30 }
 0x2e2   : > { %1466 = vrot.lane.b32.xlu0 %v1440_v63, %s5420_s30  ;;  %v1446_v63 = vmul.f32 %v5903_v11, %v5571_v5 }
 0x2e9   : > { %1476 = vrot.lane.b32.xlu2 %v1445_v4, %s5420_s30  ;;  %1474 = vrot.lane.b32.xlu1 %v1444_v30, %s5420_s30 }
 0x2ea   : > { %1472 = vrot.lane.b32.xlu0 %v1443_v50, %s5420_s30  ;;  %v9317_v50 = vmov 0  }
 0x2ed   : > { %v5925_v39 = vpop.permute.xlu0 %1104  ;;  %v5945_v60 = vpop.permute.xlu1 %1106 }
 0x2f1   : > { %1877 = vperm.xlu1 %5403, %v5560_v0  }
 0x2f2   : > { %1478 = vrot.lane.b32.xlu0 %v1446_v63, %s5420_s30  ;;  %v5943_v63 = vpop.permute.xlu2 %1894 }
 0x2f3   : > { %9318 = vst [vmem:[#allocation72_spill] sm:$0xff] %v5943_v63  ;;  %v1903_v8 = vmul.f32 %v5943_v63, %v5571_v5  ;;  %v1902_v48 = vmul.f32 %v5943_v63, %v5597_v20 }
 0x2f5   : > { %v5931_v55 = vpop.permute.xlu0 %1165 }
 0x2f6   : > { %9316 = vst [vmem:[#allocation71_spill] sm:$0xff] %v5931_v55  ;;  %v1168_v25 = vmul.f32 %v5931_v55, %v5575_v7  ;;  %v1170_v4 = vmul.f32 %v5931_v55, %v5573_v6  ;;  %v1169_v30 = vmul.f32 %v5931_v55, %v5587_v15  ;;  %v1171_v62 = vmul.f32 %v5931_v55, %v5585_v14 }
 0x2f7   : > { %v1173_v61 = vmul.f32 %v5931_v55, %v5597_v20  ;;  %v1174_v54 = vmul.f32 %v5931_v55, %v5571_v5 }
 0x2f8   : > { %1194 = vrot.lane.b32.xlu2 %v1168_v25, %s5423_s17  ;;  %v1172_v25 = vmul.f32 %v5931_v55, %v5599_v21 }
 0x2f9   : > { %1198 = vrot.lane.b32.xlu1 %v1170_v4, %s5423_s17  ;;  %v5956_v4 = vpop.permute.xlu1 %1529 }
 0x2fa   : > { %1196 = vrot.lane.b32.xlu0 %v1169_v30, %s5423_s17  ;;  %5405 = vset.pattern.permute.xlu1 %v9317_v50  ;;  %9319 = vst [vmem:[#allocation73_spill] sm:$0xff] %v5956_v4  ;;  %v1533_v30 = vmul.f32 %v5956_v4, %v5587_v15  ;;  %v5960_v37 = vpop.permute.xlu2 %1621  ;;  %v1535_v1 = vmul.f32 %v5956_v4, %v5585_v14 }
 0x2fb   : > { %9320 = vst [vmem:[#allocation74_spill] sm:$0xff] %v5960_v37  ;;  %v1538_v53 = vmul.f32 %v5956_v4, %v5571_v5  ;;  %v1626_v23 = vmul.f32 %v5960_v37, %v5573_v6  ;;  %v1630_v24 = vmul.f32 %v5960_v37, %v5571_v5  ;;  %v1629_v9 = vmul.f32 %v5960_v37, %v5597_v20 }
 0x300   : > { %1200 = vrot.lane.b32.xlu2 %v1171_v62, %s5423_s17  ;;  %v1532_v62 = vmul.f32 %v5956_v4, %v5575_v7 }
 0x301   : > { %1204 = vrot.lane.b32.xlu1 %v1173_v61, %s5423_s17  ;;  %v1534_v61 = vmul.f32 %v5956_v4, %v5573_v6 }
 0x302   : > { %1202 = vrot.lane.b32.xlu0 %v1172_v25, %s5423_s17  ;;  %v1536_v25 = vmul.f32 %v5956_v4, %v5599_v21  ;;  %v5973_v51 = vpop.permute.xlu2 %1713 }
 0x308   : > { %1206 = vrot.lane.b32.xlu2 %v1174_v54, %s5423_s17  ;;  %v1897_v54 = vmul.f32 %v5943_v63, %v5575_v7 }
 0x309   : > { %1560 = vrot.lane.b32.xlu1 %v1533_v30, %s5421_s0  ;;  %v1537_v30 = vmul.f32 %v5956_v4, %v5597_v20 }
 0x30a   : > { %1558 = vrot.lane.b32.xlu0 %v1532_v62, %s5421_s0  ;;  %v5987_v62 = vpop.permute.xlu1 %1257 }
 0x30b   : > { %9321 = vst [vmem:[#allocation75_spill] sm:$0xff] %v5987_v62  ;;  %v1261_v18 = vmul.f32 %v5987_v62, %v5587_v15  ;;  %v1260_v16 = vmul.f32 %v5987_v62, %v5575_v7  ;;  %v1263_v38 = vmul.f32 %v5987_v62, %v5585_v14  ;;  %v1266_v46 = vmul.f32 %v5987_v62, %v5571_v5 }
 0x310   : > { %1562 = vrot.lane.b32.xlu2 %v1534_v61, %s5421_s0  ;;  %v5990_v61 = vpop.permute.xlu2 %2449 }
 0x311   : > { %1566 = vrot.lane.b32.xlu1 %v1536_v25, %s5421_s0  ;;  %v1900_v25 = vmul.f32 %v5943_v63, %v5585_v14 }
 0x312   : > { %1564 = vrot.lane.b32.xlu0 %v1535_v1, %s5421_s0  ;;  %v1898_v1 = vmul.f32 %v5943_v63, %v5587_v15 }
 0x318   : > { %1568 = vrot.lane.b32.xlu2 %v1537_v30, %s5421_s0  ;;  %v1899_v30 = vmul.f32 %v5943_v63, %v5573_v6  ;;  %v6004_v41 = vpop.permute.xlu2 %2623 }
 0x319   : > { %1923 = vrot.lane.b32.xlu1 %v1897_v54, %s5420_s30  ;;  %v6002_v54 = vpop.permute.xlu1 %2362 }
 0x31a   : > { %1570 = vrot.lane.b32.xlu0 %v1538_v53, %s5421_s0  ;;  %9322 = vst [vmem:[#allocation76_spill] sm:$0xff] %v6002_v54  ;;  %v1901_v53 = vmul.f32 %v5943_v63, %v5599_v21  ;;  %v2366_v17 = vmul.f32 %v6002_v54, %v5573_v6  ;;  %v2365_v10 = vmul.f32 %v6002_v54, %v5587_v15 }
 0x31b   : > { %v2367_v12 = vmul.f32 %v6002_v54, %v5585_v14  ;;  %v2369_v58 = vmul.f32 %v6002_v54, %v5597_v20  ;;  %v2368_v22 = vmul.f32 %v6002_v54, %v5599_v21  ;;  %v2370_v19 = vmul.f32 %v6002_v54, %v5571_v5 }
 0x320   : > { %1925 = vrot.lane.b32.xlu2 %v1898_v1, %s5420_s30 }
 0x321   : > { %1929 = vrot.lane.b32.xlu1 %v1900_v25, %s5420_s30  ;;  %v6015_v1 = vpop.permute.xlu1 %2082  ;;  %v6017_v25 = vpop.permute.xlu0 %1988 }
 0x322   : > { %1927 = vrot.lane.b32.xlu0 %v1899_v30, %s5420_s30  ;;  %9323 = vst [vmem:[#allocation77_spill] sm:$0xff] %v6017_v25  ;;  %v6019_v30 = vpop.permute.xlu2 %1108  ;;  %v1991_v43 = vmul.f32 %v6017_v25, %v5575_v7  ;;  %v1993_v40 = vmul.f32 %v6017_v25, %v5573_v6  ;;  %v1992_v57 = vmul.f32 %v6017_v25, %v5587_v15 }
 0x323   : > { %v1994_v3 = vmul.f32 %v6017_v25, %v5585_v14  ;;  %v1996_v52 = vmul.f32 %v6017_v25, %v5597_v20  ;;  %v1995_v2 = vmul.f32 %v6017_v25, %v5599_v21  ;;  %v1997_v34 = vmul.f32 %v6017_v25, %v5571_v5 }
 0x328   : > { %1931 = vrot.lane.b32.xlu2 %v1901_v53, %s5420_s30  ;;  %v1264_v53 = vmul.f32 %v5987_v62, %v5599_v21 }
 0x329   : > { %1935 = vrot.lane.b32.xlu1 %v1903_v8, %s5420_s30  ;;  %v6030_v8 = vpop.permute.xlu1 %2536  ;;  %v6034_v45 = vpop.permute.xlu0 %2176 }
 0x32a   : > { %1933 = vrot.lane.b32.xlu0 %v1902_v48, %s5420_s30  ;;  %v1262_v48 = vmul.f32 %v5987_v62, %v5573_v6  ;;  %9324 = vst [vmem:[#allocation78_spill] sm:$0xff] %v6030_v8  ;;  %v6036_v47 = vpop.permute.xlu2 %1114 }
 0x32b   : > { %9325 = vst [vmem:[#allocation79_spill] sm:$0xff] %v6036_v47  ;;  %v2182_v47 = vmul.f32 %v6034_v45, %v5585_v14 }
 0x330   : > { %2346 = vperm.xlu2 %5404, %v5560_v0   ;;  %v1265_v0 = vmul.f32 %v5987_v62, %v5597_v20 }
 0x331   : > { %1288 = vrot.lane.b32.xlu1 %v1261_v18, %s5424_s18  ;;  %v1624_v18 = vmul.f32 %v5960_v37, %v5575_v7 }
 0x332   : > { %1286 = vrot.lane.b32.xlu0 %v1260_v16, %s5424_s18 }
 0x338   : > { %1290 = vrot.lane.b32.xlu2 %v1262_v48, %s5424_s18  ;;  %v6053_v48 = vpop.permute.xlu1 %1421 }
 0x339   : > { %1294 = vrot.lane.b32.xlu1 %v1264_v53, %s5424_s18  ;;  %5406 = vset.pattern.permute.xlu2 %v9317_v50  ;;  %v6056_v50 = vpop.permute.xlu0 %577  ;;  %v1627_v53 = vmul.f32 %v5960_v37, %v5585_v14 }
 0x33a   : > { %1292 = vrot.lane.b32.xlu0 %v1263_v38, %s5424_s18  ;;  %9327 = vst [vmem:[#allocation81_spill] sm:$0xff] %v6056_v50  ;;  %v1625_v38 = vmul.f32 %v5960_v37, %v5587_v15  ;;  %v1628_v50 = vmul.f32 %v5960_v37, %v5599_v21 }
 0x33b   : > { %v6048_v16 = vpop.permute.xlu2 %1470 }
 0x33c   : > { %9326 = vst [vmem:[#allocation80_spill] sm:$0xff] %v6048_v16  ;;  %v2456_v16 = vmul.f32 %v5990_v61, %v5597_v20 }
 0x340   : > { %1296 = vrot.lane.b32.xlu2 %v1265_v0, %s5424_s18 }
 0x341   : > { %1650 = vrot.lane.b32.xlu1 %v1624_v18, %s5423_s17  ;;  %v6070_v18 = vpop.permute.xlu1 %1112 }
 0x342   : > { %1298 = vrot.lane.b32.xlu0 %v1266_v46, %s5424_s18  ;;  %v6072_v46 = vpop.permute.xlu0 %1110 }
 0x343   : > { %v6067_v0 = vpop.permute.xlu2 %1476 }
 0x344   : > { %9328 = vst [vmem:[#allocation82_spill] sm:$0xff] %v6067_v0  ;;  %v1719_v0 = vmul.f32 %v5973_v51, %v5585_v14 }
 0x348   : > { %1652 = vrot.lane.b32.xlu2 %v1625_v38, %s5423_s17 }
 0x349   : > { %1656 = vrot.lane.b32.xlu1 %v1627_v53, %s5423_s17 }
 0x34a   : > { %1654 = vrot.lane.b32.xlu0 %v1626_v23, %s5423_s17 }
 0x350   : > { %1658 = vrot.lane.b32.xlu2 %v1628_v50, %s5423_s17 }
 0x351   : > { %1662 = vrot.lane.b32.xlu1 %v1630_v24, %s5423_s17 }
 0x352   : > { %1660 = vrot.lane.b32.xlu0 %v1629_v9, %s5423_s17  ;;  %v6083_v23 = vpop.permute.xlu2 %1194 }
 0x353   : > { %v6085_v38 = vpop.permute.xlu1 %1468 }
 0x354   : > { %v6087_v53 = vpop.permute.xlu0 %1466 }
 0x358   : > { %2017 = vrot.lane.b32.xlu2 %v1991_v43, %s5421_s0 }
 0x359   : > { %2021 = vrot.lane.b32.xlu1 %v1993_v40, %s5421_s0 }
 0x35a   : > { %2019 = vrot.lane.b32.xlu0 %v1992_v57, %s5421_s0  ;;  %v6098_v9 = vpop.permute.xlu2 %1200 }
 0x35b   : > { %v6100_v24 = vpop.permute.xlu1 %1474 }
 0x35c   : > { %9329 = vst [vmem:[#allocation83_spill] sm:$0xff] %v6100_v24  ;;  %v6102_v50 = vpop.permute.xlu0 %1472  ;;  %v1721_v24 = vmul.f32 %v5973_v51, %v5597_v20 }
 0x35d   : > { %9330 = vst [vmem:[#allocation84_spill] sm:$0xff] %v6102_v50  ;;  %v1722_v50 = vmul.f32 %v5973_v51, %v5571_v5 }
 0x360   : > { %2023 = vrot.lane.b32.xlu2 %v1994_v3, %s5421_s0 }
 0x361   : > { %2027 = vrot.lane.b32.xlu1 %v1996_v52, %s5421_s0 }
 0x362   : > { %2025 = vrot.lane.b32.xlu0 %v1995_v2, %s5421_s0  ;;  %v6113_v40 = vpop.permute.xlu2 %1206 }
 0x363   : > { %9331 = vst [vmem:[#allocation85_spill] sm:$0xff] %v6113_v40  ;;  %v6115_v43 = vpop.permute.xlu1 %1877  ;;  %v2457_v40 = vmul.f32 %v5990_v61, %v5571_v5 }
 0x364   : > { %9332 = vst [vmem:[#allocation86_spill] sm:$0xff] %v6115_v43  ;;  %v6117_v57 = vpop.permute.xlu0 %1478  ;;  %v1716_v43 = vmul.f32 %v5973_v51, %v5575_v7 }
 0x365   : > { %9333 = vst [vmem:[#allocation87_spill] sm:$0xff] %v6117_v57  ;;  %v2371_v57 = vmul.f32 %v6002_v54, %v5609_v27 }
 0x368   : > { %2029 = vrot.lane.b32.xlu2 %v1997_v34, %s5421_s0 }
 0x369   : > { %2391 = vrot.lane.b32.xlu1 %v2366_v17, %s5420_s30 }
 0x36a   : > { %2389 = vrot.lane.b32.xlu0 %v2365_v10, %s5420_s30  ;;  %v6128_v2 = vpop.permute.xlu2 %1562 }
 0x36b   : > { %9334 = vst [vmem:[#allocation88_spill] sm:$0xff] %v6128_v2  ;;  %v6130_v3 = vpop.permute.xlu1 %1198  ;;  %v1718_v2 = vmul.f32 %v5973_v51, %v5573_v6 }
 0x36c   : > { %v6132_v52 = vpop.permute.xlu0 %1196 }
 0x370   : > { %2393 = vrot.lane.b32.xlu2 %v2367_v12, %s5420_s30 }
 0x371   : > { %2397 = vrot.lane.b32.xlu1 %v2369_v58, %s5420_s30 }
 0x372   : > { %2395 = vrot.lane.b32.xlu0 %v2368_v22, %s5420_s30  ;;  %v6143_v10 = vpop.permute.xlu2 %1568 }
 0x373   : > { %9335 = vst [vmem:[#allocation89_spill] sm:$0xff] %v6143_v10  ;;  %v6145_v17 = vpop.permute.xlu1 %1204  ;;  %v1717_v10 = vmul.f32 %v5973_v51, %v5587_v15 }
 0x374   : > { %9336 = vst [vmem:[#allocation90_spill] sm:$0xff] %v6145_v17  ;;  %v6147_v34 = vpop.permute.xlu0 %1202  ;;  %v2180_v17 = vmul.f32 %v6034_v45, %v5587_v15 }
 0x378   : > { %2399 = vrot.lane.b32.xlu2 %v2370_v19, %s5420_s30 }
 0x379   : > { %1742 = vrot.lane.b32.xlu1 %v1716_v43, %s5424_s18 }
 0x37a   : > { %2401 = vrot.lane.b32.xlu0 %v2371_v57, %s5420_s30  ;;  %v6158_v12 = vpop.permute.xlu2 %1925 }
 0x37b   : > { %9337 = vst [vmem:[#allocation91_spill] sm:$0xff] %v6158_v12  ;;  %v6160_v58 = vpop.permute.xlu1 %1560  ;;  %v1720_v12 = vmul.f32 %v5973_v51, %v5599_v21 }
 0x37c   : > { %v6162_v22 = vpop.permute.xlu0 %1558 }
 0x380   : > { %1744 = vrot.lane.b32.xlu2 %v1717_v10, %s5424_s18 }
 0x381   : > { %1748 = vrot.lane.b32.xlu1 %v1719_v0, %s5424_s18 }
 0x382   : > { %1746 = vrot.lane.b32.xlu0 %v1718_v2, %s5424_s18  ;;  %v6173_v19 = vpop.permute.xlu2 %1931 }
 0x383   : > { %9338 = vst [vmem:[#allocation92_spill] sm:$0xff] %v6173_v19  ;;  %v6175_v43 = vpop.permute.xlu1 %1566  ;;  %v2085_v19 = vmul.f32 %v6015_v1, %v5575_v7 }
 0x384   : > { %9339 = vst [vmem:[#allocation93_spill] sm:$0xff] %v6175_v43  ;;  %v6177_v57 = vpop.permute.xlu0 %1564  ;;  %v2086_v43 = vmul.f32 %v6015_v1, %v5587_v15 }
 0x385   : > { %9340 = vst [vmem:[#allocation94_spill] sm:$0xff] %v6177_v57  ;;  %v2087_v57 = vmul.f32 %v6015_v1, %v5573_v6 }
 0x388   : > { %1750 = vrot.lane.b32.xlu2 %v1720_v12, %s5424_s18 }
 0x389   : > { %1754 = vrot.lane.b32.xlu1 %v1722_v50, %s5424_s18 }
 0x38a   : > { %1752 = vrot.lane.b32.xlu0 %v1721_v24, %s5424_s18  ;;  %v6188_v0 = vpop.permute.xlu2 %2346 }
 0x38b   : > { %9341 = vst [vmem:[#allocation95_spill] sm:$0xff] %v6188_v0  ;;  %v6190_v2 = vpop.permute.xlu1 %1923  ;;  %v2088_v0 = vmul.f32 %v6015_v1, %v5585_v14 }
 0x38c   : > { %9342 = vst [vmem:[#allocation96_spill] sm:$0xff] %v6190_v2  ;;  %v6192_v10 = vpop.permute.xlu0 %1570  ;;  %v2089_v2 = vmul.f32 %v6015_v1, %v5599_v21 }
 0x38d   : > { %9343 = vst [vmem:[#allocation97_spill] sm:$0xff] %v6192_v10  ;;  %v2090_v10 = vmul.f32 %v6015_v1, %v5597_v20 }
 0x390   : > { %2111 = vrot.lane.b32.xlu2 %v2085_v19, %s5423_s17 }
 0x391   : > { %2115 = vrot.lane.b32.xlu1 %v2087_v57, %s5423_s17 }
 0x392   : > { %2113 = vrot.lane.b32.xlu0 %v2086_v43, %s5423_s17  ;;  %v6203_v24 = vpop.permute.xlu2 %1290 }
 0x393   : > { %v6205_v50 = vpop.permute.xlu1 %1929 }
 0x394   : > { %9344 = vst [vmem:[#allocation98_spill] sm:$0xff] %v6205_v50  ;;  %v6207_v12 = vpop.permute.xlu0 %1927  ;;  %v2091_v50 = vmul.f32 %v6015_v1, %v5571_v5 }
 0x395   : > { %9345 = vst [vmem:[#allocation99_spill] sm:$0xff] %v6207_v12  ;;  %v2453_v12 = vmul.f32 %v5990_v61, %v5573_v6 }
 0x398   : > { %2117 = vrot.lane.b32.xlu2 %v2088_v0, %s5423_s17  ;;  %v2452_v0 = vmul.f32 %v5990_v61, %v5587_v15 }
 0x399   : > { %2121 = vrot.lane.b32.xlu1 %v2090_v10, %s5423_s17 }
 0x39a   : > { %2119 = vrot.lane.b32.xlu0 %v2089_v2, %s5423_s17  ;;  %v6218_v19 = vpop.permute.xlu2 %1296 }
 0x39b   : > { %9346 = vst [vmem:[#allocation100_spill] sm:$0xff] %v6218_v19  ;;  %v6220_v43 = vpop.permute.xlu1 %1935 }
 0x39c   : > { %9347 = vst [vmem:[#allocation101_spill] sm:$0xff] %v6220_v43  ;;  %v6222_v57 = vpop.permute.xlu0 %1933 }
 0x39d   : > { %9348 = vst [vmem:[#allocation102_spill] sm:$0xff] %v6222_v57  ;;  %v2454_v57 = vmul.f32 %v5990_v61, %v5585_v14 }
 0x3a0   : > { %2123 = vrot.lane.b32.xlu2 %v2091_v50, %s5423_s17  ;;  %v2455_v50 = vmul.f32 %v5990_v61, %v5599_v21 }
 0x3a1   : > { %2478 = vrot.lane.b32.xlu1 %v2453_v12, %s5421_s0 }
 0x3a2   : > { %2476 = vrot.lane.b32.xlu0 %v2452_v0, %s5421_s0  ;;  %v6233_v2 = vpop.permute.xlu2 %1652 }
 0x3a3   : > { %9349 = vst [vmem:[#allocation103_spill] sm:$0xff] %v6233_v2  ;;  %v6235_v10 = vpop.permute.xlu1 %1288  ;;  %v2179_v2 = vmul.f32 %v6034_v45, %v5575_v7 }
 0x3a4   : > { %v6237_v43 = vpop.permute.xlu0 %1286 }
 0x3a8   : > { %2480 = vrot.lane.b32.xlu2 %v2454_v57, %s5421_s0  ;;  %v2458_v57 = vmul.f32 %v5990_v61, %v5609_v27 }
 0x3a9   : > { %2484 = vrot.lane.b32.xlu1 %v2456_v16, %s5421_s0 }
 0x3aa   : > { %2482 = vrot.lane.b32.xlu0 %v2455_v50, %s5421_s0  ;;  %v6248_v12 = vpop.permute.xlu2 %1658 }
 0x3ab   : > { %9350 = vst [vmem:[#allocation104_spill] sm:$0xff] %v6248_v12  ;;  %v6250_v0 = vpop.permute.xlu1 %1294 }
 0x3ac   : > { %v6252_v19 = vpop.permute.xlu0 %1292 }
 0x3b0   : > { %2486 = vrot.lane.b32.xlu2 %v2457_v40, %s5421_s0  ;;  %v2181_v40 = vmul.f32 %v6034_v45, %v5573_v6 }
 0x3b1   : > { %2205 = vrot.lane.b32.xlu1 %v2179_v2, %s5424_s18 }
 0x3b2   : > { %2488 = vrot.lane.b32.xlu0 %v2458_v57, %s5421_s0  ;;  %v6263_v16 = vpop.permute.xlu2 %2017 }
 0x3b3   : > { %9351 = vst [vmem:[#allocation105_spill] sm:$0xff] %v6263_v16  ;;  %v6265_v50 = vpop.permute.xlu1 %1650 }
 0x3b4   : > { %9352 = vst [vmem:[#allocation106_spill] sm:$0xff] %v6265_v50  ;;  %v6267_v12 = vpop.permute.xlu0 %1298  ;;  %v2185_v50 = vmul.f32 %v6034_v45, %v5571_v5 }
 0x3b5   : > { %9353 = vst [vmem:[#allocation107_spill] sm:$0xff] %v6267_v12  ;;  %v2183_v12 = vmul.f32 %v6034_v45, %v5599_v21 }
 0x3b8   : > { %2207 = vrot.lane.b32.xlu2 %v2180_v17, %s5424_s18  ;;  %v2184_v17 = vmul.f32 %v6034_v45, %v5597_v20 }
 0x3b9   : > { %2211 = vrot.lane.b32.xlu1 %v2182_v47, %s5424_s18 }
 0x3ba   : > { %2209 = vrot.lane.b32.xlu0 %v2181_v40, %s5424_s18  ;;  %v6278_v2 = vpop.permute.xlu2 %2023 }
 0x3bb   : > { %9354 = vst [vmem:[#allocation108_spill] sm:$0xff] %v6278_v2  ;;  %v6280_v57 = vpop.permute.xlu1 %1656 }
 0x3bc   : > { %9355 = vst [vmem:[#allocation109_spill] sm:$0xff] %v6280_v57  ;;  %v6282_v16 = vpop.permute.xlu0 %1654  ;;  %v2539_v57 = vmul.f32 %v6030_v8, %v5587_v15 }
 0x3bd   : > { %9356 = vst [vmem:[#allocation110_spill] sm:$0xff] %v6282_v16  ;;  %v2541_v16 = vmul.f32 %v6030_v8, %v5585_v14 }
 0x3c0   : > { %2213 = vrot.lane.b32.xlu2 %v2183_v12, %s5424_s18  ;;  %v2540_v12 = vmul.f32 %v6030_v8, %v5573_v6 }
 0x3c1   : > { %2217 = vrot.lane.b32.xlu1 %v2185_v50, %s5424_s18 }
 0x3c2   : > { %2215 = vrot.lane.b32.xlu0 %v2184_v17, %s5424_s18  ;;  %v6293_v47 = vpop.permute.xlu2 %2029 }
 0x3c3   : > { %9357 = vst [vmem:[#allocation111_spill] sm:$0xff] %v6293_v47  ;;  %v6295_v40 = vpop.permute.xlu1 %1662 }
 0x3c4   : > { %9358 = vst [vmem:[#allocation112_spill] sm:$0xff] %v6295_v40  ;;  %v6297_v2 = vpop.permute.xlu0 %1660  ;;  %v2542_v40 = vmul.f32 %v6030_v8, %v5599_v21 }
 0x3c5   : > { %9359 = vst [vmem:[#allocation113_spill] sm:$0xff] %v6297_v2  ;;  %v2544_v2 = vmul.f32 %v6030_v8, %v5571_v5 }
 0x3c8   : > { %2563 = vrot.lane.b32.xlu2 %v2539_v57, %s5423_s17  ;;  %v2543_v57 = vmul.f32 %v6030_v8, %v5597_v20 }
 0x3c9   : > { %2567 = vrot.lane.b32.xlu1 %v2541_v16, %s5423_s17 }
 0x3ca   : > { %2565 = vrot.lane.b32.xlu0 %v2540_v12, %s5423_s17  ;;  %v6308_v50 = vpop.permute.xlu2 %2393 }
 0x3cb   : > { %9360 = vst [vmem:[#allocation114_spill] sm:$0xff] %v6308_v50  ;;  %v6310_v17 = vpop.permute.xlu1 %2021 }
 0x3cc   : > { %9361 = vst [vmem:[#allocation115_spill] sm:$0xff] %v6310_v17  ;;  %v6312_v47 = vpop.permute.xlu0 %2019  ;;  %v2545_v17 = vmul.f32 %v6030_v8, %v5609_v27 }
 0x3cd   : > { %9362 = vst [vmem:[#allocation116_spill] sm:$0xff] %v6312_v47  ;;  %v2627_v47 = vmul.f32 %v6004_v41, %v5573_v6 }
 0x3d0   : > { %2569 = vrot.lane.b32.xlu2 %v2542_v40, %s5423_s17  ;;  %v2626_v40 = vmul.f32 %v6004_v41, %v5587_v15 }
 0x3d1   : > { %2573 = vrot.lane.b32.xlu1 %v2544_v2, %s5423_s17 }
 0x3d2   : > { %2571 = vrot.lane.b32.xlu0 %v2543_v57, %s5423_s17  ;;  %v6323_v16 = vpop.permute.xlu2 %2399 }
 0x3d3   : > { %9363 = vst [vmem:[#allocation117_spill] sm:$0xff] %v6323_v16  ;;  %v6325_v12 = vpop.permute.xlu1 %2027 }
 0x3d4   : > { %9364 = vst [vmem:[#allocation118_spill] sm:$0xff] %v6325_v12  ;;  %v6327_v50 = vpop.permute.xlu0 %2025  ;;  %v2628_v12 = vmul.f32 %v6004_v41, %v5585_v14 }
 0x3d5   : > { %9365 = vst [vmem:[#allocation119_spill] sm:$0xff] %v6327_v50  ;;  %v2630_v50 = vmul.f32 %v6004_v41, %v5597_v20 }
 0x3d8   : > { %2575 = vrot.lane.b32.xlu2 %v2545_v17, %s5423_s17  ;;  %v2629_v17 = vmul.f32 %v6004_v41, %v5599_v21 }
 0x3d9   : > { %2652 = vrot.lane.b32.xlu1 %v2627_v47, %s5424_s18 }
 0x3da   : > { %2650 = vrot.lane.b32.xlu0 %v2626_v40, %s5424_s18  ;;  %v6338_v2 = vpop.permute.xlu2 %1744 }
 0x3db   : > { %9366 = vst [vmem:[#allocation120_spill] sm:$0xff] %v6338_v2  ;;  %v6340_v57 = vpop.permute.xlu1 %2391  ;;  %v1083_v2 = vmul.f32 %v5829_v56, %v5609_v27 }
 0x3dc   : > { %9367 = vst [vmem:[#allocation121_spill] sm:$0xff] %v6340_v57  ;;  %v6342_v16 = vpop.permute.xlu0 %2389  ;;  %v2631_v57 = vmul.f32 %v6004_v41, %v5571_v5  ;;  %v1084_v5 = vmul.f32 %v5829_v56, %v5607_v26 }
 0x3dd   : > { %9368 = vst [vmem:[#allocation122_spill] sm:$0xff] %v6342_v16 }
 0x3e0   : > { %2654 = vrot.lane.b32.xlu2 %v2628_v12, %s5424_s18  ;;  %v2632_v12 = vmul.f32 %v6004_v41, %v5609_v27 }
 0x3e1   : > { %2658 = vrot.lane.b32.xlu1 %v2630_v50, %s5424_s18 }
 0x3e2   : > { %2656 = vrot.lane.b32.xlu0 %v2629_v17, %s5424_s18  ;;  %v6353_v47 = vpop.permute.xlu2 %1750 }
 0x3e3   : > { %9369 = vst [vmem:[#allocation123_spill] sm:$0xff] %v6353_v47  ;;  %v6355_v40 = vpop.permute.xlu1 %2397  ;;  %v1539_v47 = vmul.f32 %v5956_v4, %v5609_v27 }
 0x3e4   : > { %9370 = vst [vmem:[#allocation124_spill] sm:$0xff] %v6355_v40  ;;  %v6357_v16 = vpop.permute.xlu0 %2395  ;;  %v1448_v40 = vmul.f32 %v5903_v11, %v5607_v26 }
 0x3e5   : > { %9371 = vst [vmem:[#allocation125_spill] sm:$0xff] %v6357_v16 }
 0x3e8   : > { %2660 = vrot.lane.b32.xlu2 %v2631_v57, %s5424_s18  ;;  %v1447_v57 = vmul.f32 %v5903_v11, %v5609_v27 }
 0x3e9   : > { %1116 = vrot.lane.b32.xlu1 %v1083_v2, %s5421_s0 }
 0x3ea   : > { %2662 = vrot.lane.b32.xlu0 %v2632_v12, %s5424_s18  ;;  %v6368_v50 = vpop.permute.xlu2 %2111 }
 0x3eb   : > { %9372 = vst [vmem:[#allocation126_spill] sm:$0xff] %v6368_v50  ;;  %v6370_v17 = vpop.permute.xlu1 %1742  ;;  %v1175_v50 = vmul.f32 %v5931_v55, %v5609_v27 }
 0x3ec   : > { %v6372_v16 = vpop.permute.xlu0 %2401 }
 0x3ed   : > { %9373 = vst [vmem:[#allocation127_spill] sm:$0xff] %v6372_v16 }
 0x3f0   : > { %1118 = vrot.lane.b32.xlu2 %v1084_v5, %s5421_s0  ;;  %v1176_v5 = vmul.f32 %v5931_v55, %v5607_v26 }
 0x3f1   : > { %1482 = vrot.lane.b32.xlu1 %v1448_v40, %s5420_s30 }
 0x3f2   : > { %1480 = vrot.lane.b32.xlu0 %v1447_v57, %s5420_s30  ;;  %v6383_v2 = vpop.permute.xlu2 %2117 }
 0x3f3   : > { %9374 = vst [vmem:[#allocation128_spill] sm:$0xff] %v6383_v2  ;;  %v6385_v12 = vpop.permute.xlu1 %1748 }
 0x3f4   : > { %9375 = vst [vmem:[#allocation129_spill] sm:$0xff] %v6385_v12  ;;  %v6387_v16 = vpop.permute.xlu0 %1746  ;;  %v1540_v12 = vmul.f32 %v5956_v4, %v5607_v26 }
 0x3f5   : > { %9376 = vst [vmem:[#allocation130_spill] sm:$0xff] %v6387_v16  ;;  %v1905_v16 = vmul.f32 %v5943_v63, %v5607_v26 }
 0x3f8   : > { %1208 = vrot.lane.b32.xlu2 %v1175_v50, %s5423_s17  ;;  %v1904_v50 = vmul.f32 %v5943_v63, %v5609_v27 }
 0x3f9   : > { %1572 = vrot.lane.b32.xlu1 %v1539_v47, %s5421_s0 }
 0x3fa   : > { %1210 = vrot.lane.b32.xlu0 %v1176_v5, %s5423_s17  ;;  %v6398_v40 = vpop.permute.xlu2 %2123 }
 0x3fb   : > { %9377 = vst [vmem:[#allocation131_spill] sm:$0xff] %v6398_v40  ;;  %v6400_v57 = vpop.permute.xlu1 %1754 }
 0x3fc   : > { %9378 = vst [vmem:[#allocation132_spill] sm:$0xff] %v6400_v57  ;;  %v6402_v2 = vpop.permute.xlu0 %1752  ;;  %v1085_v57 = vmul.f32 %v5829_v56, %v5583_v13 }
 0x3fd   : > { %9379 = vst [vmem:[#allocation133_spill] sm:$0xff] %v6402_v2  ;;  %v1267_v2 = vmul.f32 %v5987_v62, %v5609_v27 }
 0x400   : > { %1574 = vrot.lane.b32.xlu2 %v1540_v12, %s5421_s0  ;;  %v1086_v12 = vmul.f32 %v5829_v56, %v5619_v32 }
 0x401   : > { %1939 = vrot.lane.b32.xlu1 %v1905_v16, %s5420_s30 }
 0x402   : > { %1937 = vrot.lane.b32.xlu0 %v1904_v50, %s5420_s30  ;;  %v6413_v47 = vpop.permute.xlu2 %2480 }
 0x403   : > { %9380 = vst [vmem:[#allocation134_spill] sm:$0xff] %v6413_v47  ;;  %v6415_v5 = vpop.permute.xlu1 %2115 }
 0x404   : > { %9381 = vst [vmem:[#allocation135_spill] sm:$0xff] %v6415_v5  ;;  %v6417_v40 = vpop.permute.xlu0 %2113  ;;  %v1268_v5 = vmul.f32 %v5987_v62, %v5607_v26 }
 0x405   : > { %9382 = vst [vmem:[#allocation136_spill] sm:$0xff] %v6417_v40  ;;  %v1450_v40 = vmul.f32 %v5903_v11, %v5619_v32 }
 0x408   : > { %1120 = vrot.lane.b32.xlu2 %v1085_v57, %s5421_s0  ;;  %v1449_v57 = vmul.f32 %v5903_v11, %v5583_v13 }
 0x409   : > { %1300 = vrot.lane.b32.xlu1 %v1267_v2, %s5424_s18 }
 0x40a   : > { %1122 = vrot.lane.b32.xlu0 %v1086_v12, %s5421_s0  ;;  %v6428_v16 = vpop.permute.xlu2 %2486 }
 0x40b   : > { %9383 = vst [vmem:[#allocation137_spill] sm:$0xff] %v6428_v16  ;;  %v6430_v50 = vpop.permute.xlu1 %2121  ;;  %v1631_v16 = vmul.f32 %v5960_v37, %v5609_v27 }
 0x40c   : > { %9384 = vst [vmem:[#allocation138_spill] sm:$0xff] %v6430_v50  ;;  %v6432_v47 = vpop.permute.xlu0 %2119  ;;  %v1998_v50 = vmul.f32 %v6017_v25, %v5609_v27 }
 0x40d   : > { %9385 = vst [vmem:[#allocation139_spill] sm:$0xff] %v6432_v47  ;;  %v1724_v47 = vmul.f32 %v5973_v51, %v5607_v26 }
 0x410   : > { %1302 = vrot.lane.b32.xlu2 %v1268_v5, %s5424_s18  ;;  %v1632_v5 = vmul.f32 %v5960_v37, %v5607_v26 }
 0x411   : > { %1486 = vrot.lane.b32.xlu1 %v1450_v40, %s5420_s30 }
 0x412   : > { %1484 = vrot.lane.b32.xlu0 %v1449_v57, %s5420_s30  ;;  %v6443_v2 = vpop.permute.xlu2 %2207 }
 0x413   : > { %v6445_v12 = vpop.permute.xlu1 %2478 }
 0x414   : > { %9386 = vst [vmem:[#allocation140_spill] sm:$0xff] %v6445_v12  ;;  %v6447_v56 = vpop.permute.xlu0 %2476  ;;  %v2373_v12 = vmul.f32 %v6002_v54, %v5583_v13 }
 0x415   : > { %9387 = vst [vmem:[#allocation141_spill] sm:$0xff] %v6447_v56  ;;  %v1999_v56 = vmul.f32 %v6017_v25, %v5607_v26 }
 0x418   : > { %1664 = vrot.lane.b32.xlu2 %v1631_v16, %s5423_s17  ;;  %v2372_v16 = vmul.f32 %v6002_v54, %v5607_v26 }
 0x419   : > { %2031 = vrot.lane.b32.xlu1 %v1998_v50, %s5421_s0 }
 0x41a   : > { %1666 = vrot.lane.b32.xlu0 %v1632_v5, %s5423_s17  ;;  %v6458_v40 = vpop.permute.xlu2 %2213 }
 0x41b   : > { %9388 = vst [vmem:[#allocation142_spill] sm:$0xff] %v6458_v40  ;;  %v6460_v57 = vpop.permute.xlu1 %2484  ;;  %v1541_v40 = vmul.f32 %v5956_v4, %v5583_v13 }
 0x41c   : > { %9389 = vst [vmem:[#allocation143_spill] sm:$0xff] %v6460_v57  ;;  %v6462_v11 = vpop.permute.xlu0 %2482  ;;  %v1177_v57 = vmul.f32 %v5931_v55, %v5583_v13 }
 0x41d   : > { %9390 = vst [vmem:[#allocation144_spill] sm:$0xff] %v6462_v11 }
 0x420   : > { %2033 = vrot.lane.b32.xlu2 %v1999_v56, %s5421_s0  ;;  %v1178_v56 = vmul.f32 %v5931_v55, %v5619_v32 }
 0x421   : > { %2405 = vrot.lane.b32.xlu1 %v2373_v12, %s5420_s30 }
 0x422   : > { %2403 = vrot.lane.b32.xlu0 %v2372_v16, %s5420_s30  ;;  %v6473_v50 = vpop.permute.xlu2 %2563 }
 0x423   : > { %9391 = vst [vmem:[#allocation145_spill] sm:$0xff] %v6473_v50  ;;  %v6475_v5 = vpop.permute.xlu1 %2205  ;;  %v1542_v50 = vmul.f32 %v5956_v4, %v5619_v32  ;;  %v1906_v4 = vmul.f32 %v5943_v63, %v5583_v13 }
 0x424   : > { %v6477_v11 = vpop.permute.xlu0 %2488 }
 0x425   : > { %9392 = vst [vmem:[#allocation146_spill] sm:$0xff] %v6477_v11 }
 0x428   : > { %1212 = vrot.lane.b32.xlu2 %v1177_v57, %s5423_s17  ;;  %v1723_v57 = vmul.f32 %v5973_v51, %v5609_v27 }
 0x429   : > { %1576 = vrot.lane.b32.xlu1 %v1541_v40, %s5421_s0 }
 0x42a   : > { %1214 = vrot.lane.b32.xlu0 %v1178_v56, %s5423_s17  ;;  %v6488_v12 = vpop.permute.xlu2 %2569 }
 0x42b   : > { %9393 = vst [vmem:[#allocation147_spill] sm:$0xff] %v6488_v12  ;;  %v6490_v16 = vpop.permute.xlu1 %2211  ;;  %v2092_v12 = vmul.f32 %v6015_v1, %v5609_v27 }
 0x42c   : > { %v6492_v11 = vpop.permute.xlu0 %2209 }
 0x430   : > { %1578 = vrot.lane.b32.xlu2 %v1542_v50, %s5421_s0  ;;  %v1907_v50 = vmul.f32 %v5943_v63, %v5619_v32 }
 0x431   : > { %1758 = vrot.lane.b32.xlu1 %v1724_v47, %s5424_s18 }
 0x432   : > { %1756 = vrot.lane.b32.xlu0 %v1723_v57, %s5424_s18  ;;  %v6503_v40 = vpop.permute.xlu2 %2575 }
 0x433   : > { %9394 = vst [vmem:[#allocation148_spill] sm:$0xff] %v6503_v40  ;;  %v6505_v56 = vpop.permute.xlu1 %2217 }
 0x434   : > { %9395 = vst [vmem:[#allocation149_spill] sm:$0xff] %v6505_v56  ;;  %v6507_v55 = vpop.permute.xlu0 %2215  ;;  %v2093_v56 = vmul.f32 %v6015_v1, %v5607_v26 }
 0x435   : > { %9396 = vst [vmem:[#allocation150_spill] sm:$0xff] %v6507_v55  ;;  %v2460_v55 = vmul.f32 %v5990_v61, %v5583_v13 }
 0x438   : > { %1941 = vrot.lane.b32.xlu2 %v1906_v4, %s5420_s30  ;;  %v2459_v4 = vmul.f32 %v5990_v61, %v5607_v26 }
 0x439   : > { %2125 = vrot.lane.b32.xlu1 %v2092_v12, %s5423_s17 }
 0x43a   : > { %1943 = vrot.lane.b32.xlu0 %v1907_v50, %s5420_s30  ;;  %v6518_v47 = vpop.permute.xlu2 %2654 }
 0x43b   : > { %9397 = vst [vmem:[#allocation151_spill] sm:$0xff] %v6518_v47  ;;  %v6520_v57 = vpop.permute.xlu1 %2567  ;;  %v1269_v47 = vmul.f32 %v5987_v62, %v5583_v13 }
 0x43c   : > { %9398 = vst [vmem:[#allocation152_spill] sm:$0xff] %v6520_v57  ;;  %v6522_v40 = vpop.permute.xlu0 %2565  ;;  %v1633_v57 = vmul.f32 %v5960_v37, %v5583_v13 }
 0x440   : > { %2127 = vrot.lane.b32.xlu2 %v2093_v56, %s5423_s17  ;;  %v1270_v56 = vmul.f32 %v5987_v62, %v5619_v32  ;;  %v2374_v62 = vmul.f32 %v6002_v54, %v5619_v32 }
 0x441   : > { %2492 = vrot.lane.b32.xlu1 %v2460_v55, %s5421_s0 }
 0x442   : > { %2490 = vrot.lane.b32.xlu0 %v2459_v4, %s5421_s0  ;;  %v6533_v12 = vpop.permute.xlu2 %2660 }
 0x443   : > { %9399 = vst [vmem:[#allocation153_spill] sm:$0xff] %v6533_v12  ;;  %v6535_v50 = vpop.permute.xlu1 %2573 }
 0x444   : > { %9400 = vst [vmem:[#allocation154_spill] sm:$0xff] %v6535_v50  ;;  %v6537_v63 = vpop.permute.xlu0 %2571  ;;  %v1634_v50 = vmul.f32 %v5960_v37, %v5619_v32  ;;  %v2186_v37 = vmul.f32 %v6034_v45, %v5609_v27  ;;  %v2375_v27 = vmul.f32 %v6002_v54, %v5617_v31  ;;  %v2094_v54 = vmul.f32 %v6015_v1, %v5583_v13 }
 0x445   : > { %9401 = vst [vmem:[#allocation155_spill] sm:$0xff] %v6537_v63  ;;  %v2001_v63 = vmul.f32 %v6017_v25, %v5619_v32 }
 0x448   : > { %1304 = vrot.lane.b32.xlu2 %v1269_v47, %s5424_s18  ;;  %v2000_v47 = vmul.f32 %v6017_v25, %v5583_v13  ;;  %v2547_v25 = vmul.f32 %v6030_v8, %v5583_v13 }
 0x449   : > { %1668 = vrot.lane.b32.xlu1 %v1633_v57, %s5423_s17 }
 0x44a   : > { %1306 = vrot.lane.b32.xlu0 %v1270_v56, %s5424_s18  ;;  %v6548_v55 = vpop.permute.xlu2 %1118 }
 0x44b   : > { %9402 = vst [vmem:[#allocation156_spill] sm:$0xff] %v6548_v55  ;;  %v6550_v4 = vpop.permute.xlu1 %2652 }
 0x44c   : > { %v6552_v12 = vpop.permute.xlu0 %2650 }
 0x450   : > { %1670 = vrot.lane.b32.xlu2 %v1634_v50, %s5423_s17  ;;  %v2187_v50 = vmul.f32 %v6034_v45, %v5607_v26 }
 0x451   : > { %2037 = vrot.lane.b32.xlu1 %v2001_v63, %s5421_s0 }
 0x452   : > { %2035 = vrot.lane.b32.xlu0 %v2000_v47, %s5421_s0  ;;  %v6563_v57 = vpop.permute.xlu2 %1208 }
 0x453   : > { %9403 = vst [vmem:[#allocation157_spill] sm:$0xff] %v6563_v57  ;;  %v6565_v56 = vpop.permute.xlu1 %2658 }
 0x454   : > { %v6567_v55 = vpop.permute.xlu0 %2656 }
 0x458   : > { %2219 = vrot.lane.b32.xlu2 %v2186_v37, %s5424_s18  ;;  %v2546_v37 = vmul.f32 %v6030_v8, %v5607_v26 }
 0x459   : > { %2407 = vrot.lane.b32.xlu1 %v2374_v62, %s5420_s30 }
 0x45a   : > { %2221 = vrot.lane.b32.xlu0 %v2187_v50, %s5424_s18  ;;  %v6578_v63 = vpop.permute.xlu2 %1574 }
 0x45b   : > { %9404 = vst [vmem:[#allocation158_spill] sm:$0xff] %v6578_v63  ;;  %v6580_v47 = vpop.permute.xlu1 %1116 }
 0x45c   : > { %9405 = vst [vmem:[#allocation159_spill] sm:$0xff] %v6580_v47  ;;  %v6582_v57 = vpop.permute.xlu0 %2662  ;;  %v1725_v47 = vmul.f32 %v5973_v51, %v5583_v13 }
 0x45d   : > { %9406 = vst [vmem:[#allocation160_spill] sm:$0xff] %v6582_v57  ;;  %v1726_v57 = vmul.f32 %v5973_v51, %v5619_v32 }
 0x460   : > { %2409 = vrot.lane.b32.xlu2 %v2375_v27, %s5420_s30 }
 0x461   : > { %2579 = vrot.lane.b32.xlu1 %v2547_v25, %s5423_s17 }
 0x462   : > { %2577 = vrot.lane.b32.xlu0 %v2546_v37, %s5423_s17  ;;  %v6593_v62 = vpop.permute.xlu2 %1120 }
 0x463   : > { %9407 = vst [vmem:[#allocation161_spill] sm:$0xff] %v6593_v62  ;;  %v6595_v50 = vpop.permute.xlu1 %1482  ;;  %v2095_v62 = vmul.f32 %v6015_v1, %v5619_v32 }
 0x464   : > { %9408 = vst [vmem:[#allocation162_spill] sm:$0xff] %v6595_v50  ;;  %v6597_v63 = vpop.permute.xlu0 %1480  ;;  %v2461_v50 = vmul.f32 %v5990_v61, %v5619_v32 }
 0x465   : > { %9409 = vst [vmem:[#allocation163_spill] sm:$0xff] %v6597_v63  ;;  %v2462_v63 = vmul.f32 %v5990_v61, %v5617_v31 }
 0x468   : > { %1760 = vrot.lane.b32.xlu2 %v1725_v47, %s5424_s18 }
 0x469   : > { %2129 = vrot.lane.b32.xlu1 %v2094_v54, %s5423_s17 }
 0x46a   : > { %1762 = vrot.lane.b32.xlu0 %v1726_v57, %s5424_s18  ;;  %v6608_v27 = vpop.permute.xlu2 %1302 }
 0x46b   : > { %9410 = vst [vmem:[#allocation164_spill] sm:$0xff] %v6608_v27  ;;  %v6610_v25 = vpop.permute.xlu1 %1572  ;;  %v2633_v27 = vmul.f32 %v6004_v41, %v5607_v26 }
 0x46c   : > { %9411 = vst [vmem:[#allocation165_spill] sm:$0xff] %v6610_v25  ;;  %v6612_v37 = vpop.permute.xlu0 %1210  ;;  %v2634_v25 = vmul.f32 %v6004_v41, %v5583_v13 }
 0x46d   : > { %9412 = vst [vmem:[#allocation166_spill] sm:$0xff] %v6612_v37  ;;  %v2188_v37 = vmul.f32 %v6034_v45, %v5583_v13 }
 0x470   : > { %2131 = vrot.lane.b32.xlu2 %v2095_v62, %s5423_s17 }
 0x471   : > { %2496 = vrot.lane.b32.xlu1 %v2462_v63, %s5421_s0 }
 0x472   : > { %2494 = vrot.lane.b32.xlu0 %v2461_v50, %s5421_s0  ;;  %v6623_v54 = vpop.permute.xlu2 %1664 }
 0x473   : > { %9413 = vst [vmem:[#allocation167_spill] sm:$0xff] %v6623_v54  ;;  %v6625_v57 = vpop.permute.xlu1 %1939 }
 0x474   : > { %9414 = vst [vmem:[#allocation168_spill] sm:$0xff] %v6625_v57  ;;  %v6627_v47 = vpop.permute.xlu0 %1937  ;;  %v968_v57 = vmul.f32 %v5886_v28, %v5575_v7 }
 0x475   : > { %9415 = vst [vmem:[#allocation169_spill] sm:$0xff] %v6627_v47  ;;  %v1036_v47 = vsel %vm648_vm0, %v5863_v29, %v5813_v59  ;;  %v1220_v29 = vsel %vm834_vm2, %v6083_v23, %v6132_v52  ;;  %v1037_v23 = vsel %vm648_vm0, %v5813_v59, %v5872_v42  ;;  %v1129_v59 = vsel %vm741_vm1, %v5925_v39, %v5945_v60 }
 0x478   : > { %2664 = vrot.lane.b32.xlu2 %v2633_v27, %s5424_s18  ;;  %v2189_v27 = vmul.f32 %v6034_v45, %v5619_v32 }
 0x479   : > { %2223 = vrot.lane.b32.xlu1 %v2188_v37, %s5424_s18  ;;  %v1128_v37 = vsel %vm741_vm1, %v5899_v33, %v5925_v39 }
 0x47a   : > { %2666 = vrot.lane.b32.xlu0 %v2634_v25, %s5424_s18  ;;  %v6638_v63 = vpop.permute.xlu2 %2033  ;;  %v2549_v25 = vmul.f32 %v6030_v8, %v5617_v31 }
 0x47b   : > { %9416 = vst [vmem:[#allocation170_spill] sm:$0xff] %v6638_v63  ;;  %v6640_v62 = vpop.permute.xlu1 %1300  ;;  %v2548_v63 = vmul.f32 %v6030_v8, %v5619_v32  ;;  %v969_v8 = vmul.f32 %v5886_v28, %v5587_v15 }
 0x47c   : > { %9417 = vst [vmem:[#allocation171_spill] sm:$0xff] %v6640_v62  ;;  %v6642_v50 = vpop.permute.xlu0 %1122 }
 0x47d   : > { %9418 = vst [vmem:[#allocation172_spill] sm:$0xff] %v6642_v50  ;;  %v1060_v50 = vadd.f32 %v1036_v47, %v968_v57  ;;  %v1312_v57 = vsel %vm927_vm3, %v6237_v43, %v6235_v10  ;;  %v2635_v43 = vmul.f32 %v6004_v41, %v5619_v32 }
 0x47f   : > { %v1152_v62 = vadd.f32 %v1128_v37, %v1060_v50  ;;  %v970_v50 = vmul.f32 %v5886_v28, %v5573_v6  ;;  %v1038_v37 = vsel %vm648_vm0, %v5872_v42, %v5893_v49  ;;  %v1221_v42 = vsel %vm834_vm2, %v6132_v52, %v6130_v3 }
 0x480   : > { %2225 = vrot.lane.b32.xlu2 %v2189_v27, %s5424_s18 }
 0x481   : > { %2583 = vrot.lane.b32.xlu1 %v2549_v25, %s5423_s17  ;;  %v1244_v27 = vadd.f32 %v1220_v29, %v1152_v62  ;;  %v1039_v25 = vsel %vm648_vm0, %v5893_v49, %v5817_v35  ;;  %v1061_v62 = vadd.f32 %v1037_v23, %v969_v8  ;;  %v1131_v29 = vsel %vm741_vm1, %v6019_v30, %v6072_v46 }
 0x482   : > { %2581 = vrot.lane.b32.xlu0 %v2548_v63, %s5423_s17  ;;  %v6664_v54 = vpop.permute.xlu2 %1212  ;;  %v971_v63 = vmul.f32 %v5886_v28, %v5585_v14  ;;  %v1130_v49 = vsel %vm741_vm1, %v5945_v60, %v6019_v30  ;;  %v1062_v39 = vadd.f32 %v1038_v37, %v970_v50  ;;  %v1222_v60 = vsel %vm834_vm2, %v6130_v3, %v6098_v9 }
 0x483   : > { %9419 = vst [vmem:[#allocation173_spill] sm:$0xff] %v6664_v54  ;;  %v6666_v33 = vpop.permute.xlu1 %1486  ;;  %v1153_v8 = vadd.f32 %v1129_v59, %v1061_v62  ;;  %v1313_v30 = vsel %vm927_vm3, %v6235_v10, %v6203_v24  ;;  %v1314_v10 = vsel %vm927_vm3, %v6203_v24, %v6252_v19  ;;  %v1041_v62 = vsel %vm648_vm0, %v5882_v36, %v5897_v44  ;;  %v9590_v54 = vld [vmem:[#allocation157_spill] sm:$0xff] }
 0x484   : > { %9420 = vst [vmem:[#allocation174_spill] sm:$0xff] %v6666_v33  ;;  %v6673_v47 = vpop.permute.xlu0 %1484  ;;  %v2636_v33 = vmul.f32 %v6004_v41, %v5617_v31  ;;  %v1063_v32 = vadd.f32 %v1039_v25, %v971_v63  ;;  %v973_v25 = vmul.f32 %v5886_v28, %v5597_v20  ;;  %v1424_v24 = vmul.f32 %v6053_v48, %v5575_v7 }
 0x485   : > { %9421 = vst [vmem:[#allocation175_spill] sm:$0xff] %v6673_v47  ;;  %v1336_v47 = vadd.f32 %v1312_v57, %v1244_v27  ;;  %v1223_v57 = vsel %vm834_vm2, %v6098_v9, %v6147_v34  ;;  %v1154_v27 = vadd.f32 %v1130_v49, %v1062_v39  ;;  %v1245_v50 = vadd.f32 %v1221_v42, %v1153_v8  ;;  %v9423_v42 = vld [vmem:[#allocation79_spill] sm:$0xff]  ;;  %v9424_v8 = vld [vmem:[#allocation90_spill] sm:$0xff] }
 0x486   : > { %v1155_v63 = vadd.f32 %v1131_v29, %v1063_v32  ;;  %v1040_v9 = vsel %vm648_vm0, %v5817_v35, %v5882_v36  ;;  %v1132_v35 = vsel %vm741_vm1, %v6072_v46, %v6070_v18  ;;  %v1584_v49 = vsel %vm741_vm1, %v6162_v22, %v6160_v58 }
 0x487   : > { %v1246_v37 = vadd.f32 %v1222_v60, %v1154_v27  ;;  %v1337_v59 = vadd.f32 %v1313_v30, %v1245_v50  ;;  %v1133_v36 = vsel %vm741_vm1, %v6070_v18, %v9423_v42  ;;  %v1224_v46 = vsel %vm834_vm2, %v6147_v34, %v9424_v8  ;;  %v9425_v60 = vld [vmem:[#allocation103_spill] sm:$0xff]  ;;  %v9426_v30 = vld [vmem:[#allocation106_spill] sm:$0xff]  ;;  %v9428_v27 = vld [vmem:[#allocation85_spill] sm:$0xff] }
 0x488   : > { %2668 = vrot.lane.b32.xlu2 %v2635_v43, %s5424_s18  ;;  %v1247_v3 = vadd.f32 %v1223_v57, %v1155_v63  ;;  %v1492_v43 = vsel %vm648_vm0, %v6087_v53, %v6085_v38  ;;  %v1065_v57 = vadd.f32 %v1041_v62, %v973_v25  ;;  %v1676_v22 = vsel %vm834_vm2, %v9426_v30, %v9425_v60  ;;  %v9431_v25 = vld [vmem:[#allocation120_spill] sm:$0xff] }
 0x489   : > { %1360 = vrot.lane.b32.xlu1 %v1336_v47, %s5446_s19  ;;  %v972_v47 = vmul.f32 %v5886_v28, %v5599_v21  ;;  %v1338_v53 = vadd.f32 %v1314_v10, %v1246_v37  ;;  %v1516_v39 = vadd.f32 %v1492_v43, %v1424_v24  ;;  %v1225_v18 = vsel %vm834_vm2, %v9424_v8, %v9428_v27  ;;  %v9437_v8 = vld [vmem:[#allocation88_spill] sm:$0xff] }
 0x48a   : > { %2670 = vrot.lane.b32.xlu0 %v2636_v33, %s5424_s18  ;;  %v6710_v23 = vpop.permute.xlu2 %1578  ;;  %v1315_v33 = vsel %vm927_vm3, %v6252_v19, %v6250_v0  ;;  %v1768_v43 = vsel %vm927_vm3, %v6370_v17, %v9431_v25  ;;  %v1426_v30 = vmul.f32 %v6053_v48, %v5573_v6 }
 0x48b   : > { %9422 = vst [vmem:[#allocation176_spill] sm:$0xff] %v6710_v23  ;;  %v6718_v52 = vpop.permute.xlu1 %2031  ;;  %v1339_v19 = vadd.f32 %v1315_v33, %v1247_v3  ;;  %v1064_v29 = vadd.f32 %v1040_v9, %v972_v47  ;;  %v1608_v50 = vadd.f32 %v1584_v49, %v1516_v39  ;;  %v9429_v33 = vld [vmem:[#allocation100_spill] sm:$0xff]  ;;  %v1157_v3 = vadd.f32 %v1133_v36, %v1065_v57 }
 0x48c   : > { %v6725_v32 = vpop.permute.xlu0 %1666  ;;  %v1316_v34 = vsel %vm927_vm3, %v6250_v0, %v9429_v33  ;;  %v1425_v0 = vmul.f32 %v6053_v48, %v5587_v15  ;;  %v9436_v49 = vld [vmem:[#allocation84_spill] sm:$0xff]  ;;  %v1427_v39 = vmul.f32 %v6053_v48, %v5585_v14 }
 0x48d   : > { %v1156_v63 = vadd.f32 %v1132_v35, %v1064_v29  ;;  %v9434_v35 = vld [vmem:[#allocation107_spill] sm:$0xff]  ;;  %v1249_v36 = vadd.f32 %v1225_v18, %v1157_v3 }
 0x48e   : > { %v1317_v24 = vsel %vm927_vm3, %v9429_v33, %v9434_v35  ;;  %v9435_v29 = vld [vmem:[#allocation83_spill] sm:$0xff] }
 0x48f   : > { %v1248_v10 = vadd.f32 %v1224_v46, %v1156_v63  ;;  %v1585_v46 = vsel %vm741_vm1, %v6160_v58, %v9437_v8  ;;  %v1341_v33 = vadd.f32 %v1317_v24, %v1249_v36  ;;  %v9444_v36 = vld [vmem:[#allocation130_spill] sm:$0xff] }
 0x490   : > { %1362 = vrot.lane.b32.xlu2 %v1337_v59, %s5446_s19  ;;  %v9433_v59 = vld [vmem:[#allocation80_spill] sm:$0xff] }
 0x491   : > { %1366 = vrot.lane.b32.xlu1 %v1339_v19, %s5446_s19  ;;  %v1493_v62 = vsel %vm648_vm0, %v6085_v38, %v9433_v59  ;;  %v1700_v19 = vadd.f32 %v1676_v22, %v1608_v50  ;;  %v1340_v17 = vadd.f32 %v1316_v34, %v1248_v10  ;;  %v1494_v38 = vsel %vm648_vm0, %v9433_v59, %v9436_v49  ;;  %v9438_v22 = vld [vmem:[#allocation93_spill] sm:$0xff]  ;;  %v9439_v50 = vld [vmem:[#allocation94_spill] sm:$0xff] }
 0x492   : > { %1364 = vrot.lane.b32.xlu0 %v1338_v53, %s5446_s19  ;;  %v6761_v47 = vpop.permute.xlu2 %1941  ;;  %v1495_v53 = vsel %vm648_vm0, %v9436_v49, %v9435_v29  ;;  %v1517_v63 = vadd.f32 %v1493_v62, %v1425_v0  ;;  %v1587_v18 = vsel %vm741_vm1, %v9439_v50, %v9438_v22  ;;  %v1586_v3 = vsel %vm741_vm1, %v9437_v8, %v9439_v50  ;;  %v9440_v10 = vld [vmem:[#allocation110_spill] sm:$0xff]  ;;  %v9441_v62 = vld [vmem:[#allocation104_spill] sm:$0xff]  ;;  %v9446_v8 = vld [vmem:[#allocation123_spill] sm:$0xff] }
 0x493   : > { %9427 = vst [vmem:[#allocation79_spill] sm:$0xff] %v6761_v47  ;;  %v6769_v9 = vpop.permute.xlu1 %2405  ;;  %v1792_v57 = vadd.f32 %v1768_v43, %v1700_v19  ;;  %v1519_v34 = vadd.f32 %v1495_v53, %v1427_v39  ;;  %v1677_v58 = vsel %vm834_vm2, %v9425_v60, %v9440_v10  ;;  %v1518_v43 = vadd.f32 %v1494_v38, %v1426_v30  ;;  %v9442_v19 = vld [vmem:[#allocation109_spill] sm:$0xff]  ;;  %v9449_v30 = vld [vmem:[#allocation82_spill] sm:$0xff] }
 0x494   : > { %9430 = vst [vmem:[#allocation90_spill] sm:$0xff] %v6769_v9  ;;  %v6774_v37 = vpop.permute.xlu0 %2403  ;;  %v1609_v59 = vadd.f32 %v1585_v46, %v1517_v63  ;;  %v1679_v24 = vsel %vm834_vm2, %v9442_v19, %v9441_v62  ;;  %v1678_v53 = vsel %vm834_vm2, %v9440_v10, %v9442_v19  ;;  %v1769_v60 = vsel %vm927_vm3, %v9431_v25, %v9444_v36  ;;  %v9447_v46 = vld [vmem:[#allocation129_spill] sm:$0xff] }
 0x495   : > { %9432 = vst [vmem:[#allocation103_spill] sm:$0xff] %v6774_v37  ;;  %v1611_v49 = vadd.f32 %v1587_v18, %v1519_v34  ;;  %v1610_v39 = vadd.f32 %v1586_v3, %v1518_v43  ;;  %v1496_v50 = vsel %vm648_vm0, %v9435_v29, %v9449_v30  ;;  %v1428_v25 = vmul.f32 %v6053_v48, %v5599_v21  ;;  %v9450_v34 = vld [vmem:[#allocation91_spill] sm:$0xff]  ;;  %v9451_v3 = vld [vmem:[#allocation96_spill] sm:$0xff]  ;;  %v9453_v47 = vld [vmem:[#allocation89_spill] sm:$0xff] }
 0x496   : > { %v1701_v38 = vadd.f32 %v1677_v58, %v1609_v59  ;;  %v1949_v10 = vsel %vm648_vm0, %v9451_v3, %v9450_v34  ;;  %v9452_v59 = vld [vmem:[#allocation87_spill] sm:$0xff]  ;;  %v1588_v29 = vsel %vm741_vm1, %v9438_v22, %v9453_v47  ;;  %v1429_v9 = vmul.f32 %v6053_v48, %v5597_v20  ;;  %v9455_v37 = vld [vmem:[#allocation116_spill] sm:$0xff]  ;;  %v9456_v3 = vld [vmem:[#allocation105_spill] sm:$0xff] }
 0x497   : > { %v1703_v18 = vadd.f32 %v1679_v24, %v1611_v49  ;;  %v1702_v58 = vadd.f32 %v1678_v53, %v1610_v39  ;;  %v1497_v19 = vsel %vm648_vm0, %v9449_v30, %v9452_v59  ;;  %v9454_v24 = vld [vmem:[#allocation86_spill] sm:$0xff]  ;;  %v2043_v53 = vsel %vm741_vm1, %v9456_v3, %v9455_v37  ;;  %v9457_v39 = vld [vmem:[#allocation97_spill] sm:$0xff] }
 0x498   : > { %1368 = vrot.lane.b32.xlu2 %v1340_v17, %s5446_s19  ;;  %v1793_v43 = vadd.f32 %v1769_v60, %v1701_v38  ;;  %v1880_v49 = vmul.f32 %v9454_v24, %v5575_v7  ;;  %v1589_v38 = vsel %vm741_vm1, %v9453_v47, %v9457_v39  ;;  %v9458_v30 = vld [vmem:[#allocation113_spill] sm:$0xff]  ;;  %v1882_v23 = vmul.f32 %v9454_v24, %v5573_v6 }
 0x499   : > { %1816 = vrot.lane.b32.xlu1 %v1792_v57, %s5447_s20  ;;  %v1771_v57 = vsel %vm927_vm3, %v9447_v46, %v9446_v8 }
 0x49a   : > { %1370 = vrot.lane.b32.xlu0 %v1341_v33, %s5446_s19  ;;  %v6812_v0 = vpop.permute.xlu2 %2127  ;;  %v1770_v33 = vsel %vm927_vm3, %v9444_v36, %v9447_v46  ;;  %v1795_v36 = vadd.f32 %v1771_v57, %v1703_v18  ;;  %v1520_v46 = vadd.f32 %v1496_v50, %v1428_v25  ;;  %v1974_v22 = vadd.f32 %v1949_v10, %v1880_v49  ;;  %v9459_v25 = vld [vmem:[#allocation136_spill] sm:$0xff] }
 0x49b   : > { %9443 = vst [vmem:[#allocation106_spill] sm:$0xff] %v6812_v0  ;;  %v6820_v17 = vpop.permute.xlu1 %1576  ;;  %v1794_v60 = vadd.f32 %v1770_v33, %v1702_v58  ;;  %v1680_v57 = vsel %vm834_vm2, %v9441_v62, %v9458_v30  ;;  %v1521_v50 = vadd.f32 %v1497_v19, %v1429_v9  ;;  %v9460_v0 = vld [vmem:[#allocation126_spill] sm:$0xff]  ;;  %v9462_v58 = vld [vmem:[#allocation112_spill] sm:$0xff] }
 0x49c   : > { %9445 = vst [vmem:[#allocation85_spill] sm:$0xff] %v6820_v17  ;;  %v6825_v63 = vpop.permute.xlu0 %1214  ;;  %v1612_v18 = vadd.f32 %v1588_v29, %v1520_v46  ;;  %v2137_v3 = vsel %vm834_vm2, %v9460_v0, %v9459_v25  ;;  %v1681_v47 = vsel %vm834_vm2, %v9458_v30, %v9462_v58  ;;  %v2068_v10 = vadd.f32 %v2043_v53, %v1974_v22  ;;  %v9467_v30 = vld [vmem:[#allocation98_spill] sm:$0xff]  ;;  %v9468_v17 = vld [vmem:[#allocation115_spill] sm:$0xff] }
 0x49d   : > { %9448 = vst [vmem:[#allocation100_spill] sm:$0xff] %v6825_v63  ;;  %v1613_v9 = vadd.f32 %v1589_v38, %v1521_v50  ;;  %v2231_v0 = vsel %vm927_vm3, %v6475_v5, %v6443_v2  ;;  %v9466_v38 = vld [vmem:[#allocation92_spill] sm:$0xff] }
 0x49e   : > { %v1704_v19 = vadd.f32 %v1680_v57, %v1612_v18  ;;  %v2162_v22 = vadd.f32 %v2137_v3, %v2068_v10  ;;  %v1952_v57 = vsel %vm648_vm0, %v9467_v30, %v9466_v38  ;;  %v1883_v18 = vmul.f32 %v9454_v24, %v5585_v14  ;;  %v9470_v63 = vld [vmem:[#allocation108_spill] sm:$0xff] }
 0x49f   : > { %v1705_v50 = vadd.f32 %v1681_v47, %v1613_v9  ;;  %v2044_v3 = vsel %vm741_vm1, %v9455_v37, %v9468_v17 }
 0x4a0   : > { %1818 = vrot.lane.b32.xlu2 %v1793_v43, %s5447_s20  ;;  %v9463_v43 = vld [vmem:[#allocation133_spill] sm:$0xff]  ;;  %v2256_v10 = vadd.f32 %v2231_v0, %v2162_v22  ;;  %v1977_v9 = vadd.f32 %v1952_v57, %v1883_v18  ;;  %v9472_v22 = vld [vmem:[#allocation139_spill] sm:$0xff] }
 0x4a1   : > { %1822 = vrot.lane.b32.xlu1 %v1795_v36, %s5447_s20  ;;  %v1772_v62 = vsel %vm927_vm3, %v9446_v8, %v9463_v43  ;;  %v9464_v36 = vld [vmem:[#allocation99_spill] sm:$0xff]  ;;  %v1881_v8 = vmul.f32 %v9454_v24, %v5587_v15 }
 0x4a2   : > { %1820 = vrot.lane.b32.xlu0 %v1794_v60, %s5447_s20  ;;  %v6863_v33 = vpop.permute.xlu2 %1304  ;;  %v1950_v46 = vsel %vm648_vm0, %v9450_v34, %v9464_v36  ;;  %v9465_v60 = vld [vmem:[#allocation132_spill] sm:$0xff]  ;;  %v1796_v5 = vadd.f32 %v1772_v62, %v1704_v19  ;;  %v1951_v34 = vsel %vm648_vm0, %v9464_v36, %v9467_v30  ;;  %v2045_v19 = vsel %vm741_vm1, %v9468_v17, %v9470_v63  ;;  %v9471_v36 = vld [vmem:[#allocation135_spill] sm:$0xff] }
 0x4a3   : > { %9461 = vst [vmem:[#allocation120_spill] sm:$0xff] %v6863_v33  ;;  %v6871_v49 = vpop.permute.xlu1 %1758  ;;  %v1773_v53 = vsel %vm927_vm3, %v9463_v43, %v9465_v60  ;;  %v1975_v43 = vadd.f32 %v1950_v46, %v1881_v8  ;;  %v9469_v33 = vld [vmem:[#allocation119_spill] sm:$0xff]  ;;  %v2138_v37 = vsel %vm834_vm2, %v9459_v25, %v9471_v36  ;;  %v1976_v0 = vadd.f32 %v1951_v34, %v1882_v23  ;;  %v9473_v8 = vld [vmem:[#allocation128_spill] sm:$0xff] }
 0x4a4   : > { %v6876_v29 = vpop.permute.xlu0 %1756  ;;  %v2046_v47 = vsel %vm741_vm1, %v9470_v63, %v9469_v33  ;;  %v1797_v62 = vadd.f32 %v1773_v53, %v1705_v50  ;;  %v2140_v53 = vsel %vm834_vm2, %v9473_v8, %v9472_v22  ;;  %v2139_v17 = vsel %vm834_vm2, %v9471_v36, %v9473_v8  ;;  %v9482_v8 = vld [vmem:[#allocation118_spill] sm:$0xff] }
 0x4a5   : > { %v2069_v46 = vadd.f32 %v2044_v3, %v1975_v43  ;;  %v2071_v57 = vadd.f32 %v2046_v47, %v1977_v9  ;;  %v2232_v63 = vsel %vm927_vm3, %v6443_v2, %v6492_v11  ;;  %v2070_v23 = vadd.f32 %v2045_v19, %v1976_v0  ;;  %v9478_v3 = vld [vmem:[#allocation102_spill] sm:$0xff]  ;;  %v9481_v0 = vld [vmem:[#allocation101_spill] sm:$0xff] }
 0x4a6   : > { %v2233_v47 = vsel %vm927_vm3, %v6492_v11, %v6490_v16  ;;  %v1884_v2 = vmul.f32 %v9454_v24, %v5599_v21  ;;  %v9480_v9 = vld [vmem:[#allocation122_spill] sm:$0xff] }
 0x4a7   : > { %v2163_v50 = vadd.f32 %v2138_v37, %v2069_v46  ;;  %v2165_v43 = vadd.f32 %v2140_v53, %v2071_v57  ;;  %v2164_v36 = vadd.f32 %v2139_v17, %v2070_v23  ;;  %v1954_v46 = vsel %vm648_vm0, %v9478_v3, %v9481_v0  ;;  %v9483_v53 = vld [vmem:[#allocation95_spill] sm:$0xff] }
 0x4a8   : > { %1824 = vrot.lane.b32.xlu2 %v1796_v5, %s5447_s20  ;;  %v9476_v5 = vld [vmem:[#allocation142_spill] sm:$0xff]  ;;  %v2349_v11 = vmul.f32 %v9483_v53, %v5587_v15  ;;  %v9486_v23 = vld [vmem:[#allocation111_spill] sm:$0xff] }
 0x4a9   : > { %2282 = vrot.lane.b32.xlu1 %v2256_v10, %s5448_s23  ;;  %v2234_v18 = vsel %vm927_vm3, %v6490_v16, %v9476_v5  ;;  %v1953_v10 = vsel %vm648_vm0, %v9466_v38, %v9478_v3  ;;  %v2257_v37 = vadd.f32 %v2232_v63, %v2163_v50  ;;  %v2047_v38 = vsel %vm741_vm1, %v9469_v33, %v9482_v8  ;;  %v9487_v3 = vld [vmem:[#allocation138_spill] sm:$0xff] }
 0x4aa   : > { %1826 = vrot.lane.b32.xlu0 %v1797_v62, %s5447_s20  ;;  %v6914_v30 = vpop.permute.xlu2 %1670  ;;  %v9479_v62 = vld [vmem:[#allocation121_spill] sm:$0xff]  ;;  %v2259_v16 = vadd.f32 %v2234_v18, %v2165_v43  ;;  %v1978_v57 = vadd.f32 %v1953_v10, %v1884_v2  ;;  %v2258_v63 = vadd.f32 %v2233_v47, %v2164_v36  ;;  %v2048_v50 = vsel %vm741_vm1, %v9482_v8, %v9486_v23  ;;  %v9490_v36 = vld [vmem:[#allocation131_spill] sm:$0xff]  ;;  %v9491_v8 = vld [vmem:[#allocation150_spill] sm:$0xff] }
 0x4ab   : > { %9474 = vst [vmem:[#allocation80_spill] sm:$0xff] %v6914_v30  ;;  %v6922_v25 = vpop.permute.xlu1 %2125  ;;  %v2413_v19 = vsel %vm648_vm0, %v9480_v9, %v9479_v62  ;;  %v9484_v30 = vld [vmem:[#allocation140_spill] sm:$0xff]  ;;  %v9485_v9 = vld [vmem:[#allocation141_spill] sm:$0xff]  ;;  %v2141_v18 = vsel %vm834_vm2, %v9472_v22, %v9487_v3  ;;  %v2235_v22 = vsel %vm927_vm3, %v9476_v5, %v9491_v8  ;;  %v2350_v5 = vmul.f32 %v9483_v53, %v5573_v6 }
 0x4ac   : > { %9475 = vst [vmem:[#allocation107_spill] sm:$0xff] %v6922_v25  ;;  %v6927_v34 = vpop.permute.xlu0 %1943  ;;  %v2500_v17 = vsel %vm741_vm1, %v9485_v9, %v9484_v30  ;;  %v2436_v33 = vadd.f32 %v2413_v19, %v2349_v11  ;;  %v2072_v43 = vadd.f32 %v2047_v38, %v1978_v57  ;;  %v9488_v2 = vld [vmem:[#allocation145_spill] sm:$0xff]  ;;  %v2142_v19 = vsel %vm834_vm2, %v9487_v3, %v9490_v36  ;;  %v9494_v57 = vld [vmem:[#allocation114_spill] sm:$0xff]  ;;  %v9577_v25 = vld [vmem:[#allocation55_spill] sm:$0xff] }
 0x4ad   : > { %9477 = vst [vmem:[#allocation83_spill] sm:$0xff] %v6927_v34  ;;  %v1885_v34 = vmul.f32 %v9454_v24, %v5597_v20  ;;  %v2587_v9 = vsel %vm834_vm2, %v9488_v2, %v6522_v40  ;;  %v2674_v38 = vsel %vm927_vm3, %v6552_v12, %v6550_v4  ;;  %v9495_v3 = vld [vmem:[#allocation149_spill] sm:$0xff] }
 0x4af   : > { %v1979_v10 = vadd.f32 %v1954_v46, %v1885_v34  ;;  %v2166_v46 = vadd.f32 %v2141_v18, %v2072_v43  ;;  %v9497_v18 = vld [vmem:[#allocation125_spill] sm:$0xff] }
 0x4b0   : > { %2284 = vrot.lane.b32.xlu2 %v2257_v37, %s5448_s23  ;;  %v2523_v37 = vadd.f32 %v2500_v17, %v2436_v33  ;;  %v2236_v17 = vsel %vm927_vm3, %v9491_v8, %v9495_v3  ;;  %v2415_v2 = vsel %vm648_vm0, %v9494_v57, %v9497_v18  ;;  %v9499_v3 = vld [vmem:[#allocation143_spill] sm:$0xff] }
 0x4b1   : > { %2288 = vrot.lane.b32.xlu1 %v2259_v16, %s5448_s23  ;;  %v2073_v34 = vadd.f32 %v2048_v50, %v1979_v10  ;;  %v9496_v50 = vld [vmem:[#allocation124_spill] sm:$0xff]  ;;  %v2260_v12 = vadd.f32 %v2235_v22, %v2166_v46 }
 0x4b2   : > { %2286 = vrot.lane.b32.xlu0 %v2258_v63, %s5448_s23  ;;  %v6965_v47 = vpop.permute.xlu2 %2219  ;;  %v2414_v63 = vsel %vm648_vm0, %v9479_v62, %v9494_v57  ;;  %v2610_v33 = vadd.f32 %v2587_v9, %v2523_v37  ;;  %v2416_v10 = vsel %vm648_vm0, %v9497_v18, %v9496_v50  ;;  %v2352_v62 = vmul.f32 %v9483_v53, %v5599_v21  ;;  %v9501_v57 = vld [vmem:[#allocation152_spill] sm:$0xff] }
 0x4b3   : > { %9489 = vst [vmem:[#allocation84_spill] sm:$0xff] %v6965_v47  ;;  %v6973_v11 = vpop.permute.xlu1 %2492  ;;  %v2167_v43 = vadd.f32 %v2142_v19, %v2073_v34  ;;  %v2437_v8 = vadd.f32 %v2414_v63, %v2350_v5  ;;  %v9500_v47 = vld [vmem:[#allocation144_spill] sm:$0xff]  ;;  %v9503_v5 = vld [vmem:[#allocation147_spill] sm:$0xff] }
 0x4b4   : > { %9492 = vst [vmem:[#allocation88_spill] sm:$0xff] %v6973_v11  ;;  %v6978_v16 = vpop.permute.xlu0 %2490  ;;  %v9498_v11 = vld [vmem:[#allocation134_spill] sm:$0xff]  ;;  %v2697_v37 = vadd.f32 %v2674_v38, %v2610_v33  ;;  %v2503_v19 = vsel %vm741_vm1, %v9500_v47, %v9499_v3  ;;  %v2439_v34 = vadd.f32 %v2416_v10, %v2352_v62  ;;  %v9502_v33 = vld [vmem:[#allocation155_spill] sm:$0xff] }
 0x4b5   : > { %9493 = vst [vmem:[#allocation93_spill] sm:$0xff] %v6978_v16  ;;  %v2501_v9 = vsel %vm741_vm1, %v9484_v30, %v9498_v11  ;;  %v2351_v16 = vmul.f32 %v9483_v53, %v5585_v14  ;;  %v2261_v22 = vadd.f32 %v2236_v17, %v2167_v43  ;;  %v2502_v46 = vsel %vm741_vm1, %v9498_v11, %v9500_v47  ;;  %v9505_v11 = vld [vmem:[#allocation151_spill] sm:$0xff] }
 0x4b6   : > { %v2588_v30 = vsel %vm834_vm2, %v6522_v40, %v9501_v57  ;;  %v2524_v63 = vadd.f32 %v2501_v9, %v2437_v8  ;;  %v2590_v17 = vsel %vm834_vm2, %v9503_v5, %v9502_v33  ;;  %v2526_v10 = vadd.f32 %v2503_v19, %v2439_v34  ;;  %v9508_v9 = vld [vmem:[#allocation117_spill] sm:$0xff] }
 0x4b7   : > { %v2438_v38 = vadd.f32 %v2415_v2, %v2351_v16  ;;  %v2589_v47 = vsel %vm834_vm2, %v9501_v57, %v9503_v5  ;;  %v2675_v40 = vsel %vm927_vm3, %v6550_v4, %v9505_v11  ;;  %v2677_v2 = vsel %vm927_vm3, %v6567_v55, %v6565_v56  ;;  %v9511_v5 = vld [vmem:[#allocation2_spill] sm:$0xff] }
 0x4b8   : > { %2290 = vrot.lane.b32.xlu2 %v2260_v12, %s5448_s23  ;;  %v2611_v12 = vadd.f32 %v2588_v30, %v2524_v63  ;;  %v2613_v8 = vadd.f32 %v2590_v17, %v2526_v10  ;;  %v2676_v19 = vsel %vm927_vm3, %v9505_v11, %v6567_v55  ;;  %v2353_v4 = vmul.f32 %v9483_v53, %v5597_v20  ;;  %v9510_v30 = vld [vmem:[#allocation137_spill] sm:$0xff]  ;;  %v9512_v55 = vld [vmem:[#allocation146_spill] sm:$0xff] }
 0x4b9   : > { %2721 = vrot.lane.b32.xlu1 %v2697_v37, %s5449_s24  ;;  %v2525_v16 = vadd.f32 %v2502_v46, %v2438_v38  ;;  %v2417_v37 = vsel %vm648_vm0, %v9496_v50, %v9508_v9  ;;  %v9509_v46 = vld [vmem:[#allocation127_spill] sm:$0xff]  ;;  %v2504_v38 = vsel %vm741_vm1, %v9499_v3, %v9510_v30  ;;  %v2354_v17 = vmul.f32 %v9483_v53, %v9511_v5  ;;  %v9513_v11 = vld [vmem:[#allocation154_spill] sm:$0xff]  ;;  %v9576_v53 = vld [vmem:[#allocation81_spill] sm:$0xff] }
 0x4ba   : > { %2292 = vrot.lane.b32.xlu0 %v2261_v22, %s5448_s23  ;;  %v7016_v18 = vpop.permute.xlu2 %2409  ;;  %v2698_v34 = vadd.f32 %v2675_v40, %v2611_v12  ;;  %v2418_v57 = vsel %vm648_vm0, %v9508_v9, %v9509_v46  ;;  %v2700_v63 = vadd.f32 %v2677_v2, %v2613_v8  ;;  %v2440_v50 = vadd.f32 %v2417_v37, %v2353_v4  ;;  %v9515_v2 = vld [vmem:[#allocation148_spill] sm:$0xff]  ;;  %v9516_v37 = vld [vmem:[#allocation153_spill] sm:$0xff] }
 0x4bb   : > { %9504 = vst [vmem:[#allocation94_spill] sm:$0xff] %v7016_v18  ;;  %v7024_v43 = vpop.permute.xlu1 %1668  ;;  %v2612_v22 = vadd.f32 %v2589_v47, %v2525_v16  ;;  %v2505_v47 = vsel %vm741_vm1, %v9510_v30, %v9512_v55  ;;  %v2591_v40 = vsel %vm834_vm2, %v9502_v33, %v9513_v11  ;;  %v2441_v16 = vadd.f32 %v2418_v57, %v2354_v17  ;;  %v9565_v18 = vld [vmem:[#allocation17_spill] sm:$0xff]  ;;  %v9572_v55 = vld [vmem:[#allocation7_spill] sm:$0xff] }
 0x4bc   : > { %9506 = vst [vmem:[#allocation110_spill] sm:$0xff] %v7024_v43  ;;  %v7029_v62 = vpop.permute.xlu0 %1306  ;;  %v2527_v3 = vadd.f32 %v2504_v38, %v2440_v50  ;;  %v2592_v9 = vsel %vm834_vm2, %v9513_v11, %v9515_v2  ;;  %v2678_v8 = vsel %vm927_vm3, %v6565_v56, %v9516_v37  ;;  %v9568_v2 = vld [vmem:[#allocation29_spill] sm:$0xff] }
 0x4bd   : > { %9507 = vst [vmem:[#allocation104_spill] sm:$0xff] %v7029_v62  ;;  %v2699_v10 = vadd.f32 %v2676_v19, %v2612_v22  ;;  %v2528_v4 = vadd.f32 %v2505_v47, %v2441_v16  ;;  %v9523_v47 = vld [vmem:[#allocation57_spill] sm:$0xff]  ;;  %v580_v62 = vmul.f32 %v9576_v53, %v5575_v7 }
 0x4be   : > { %v2614_v33 = vadd.f32 %v2591_v40, %v2527_v3  ;;  %v1087_v11 = vmul.f32 %v9523_v47, %v5617_v31  ;;  %v9524_v40 = vld [vmem:[#allocation69_spill] sm:$0xff]  ;;  %v9525_v3 = vld [vmem:[#allocation4_spill] sm:$0xff] }
 0x4bf   : > { %v2615_v30 = vadd.f32 %v2592_v9, %v2528_v4  ;;  %v1451_v16 = vmul.f32 %v9524_v40, %v5617_v31  ;;  %v1088_v9 = vmul.f32 %v9523_v47, %v9525_v3  ;;  %v2191_v36 = vmul.f32 %v6034_v45, %v9525_v3 }
 0x4c0   : > { %2723 = vrot.lane.b32.xlu2 %v2698_v34, %s5449_s24  ;;  %v9519_v34 = vld [vmem:[#allocation160_spill] sm:$0xff]  ;;  %v2701_v38 = vadd.f32 %v2678_v8, %v2614_v33  ;;  %v1452_v33 = vmul.f32 %v9524_v40, %v9525_v3 }
 0x4c1   : > { %2727 = vrot.lane.b32.xlu1 %v2700_v63, %s5449_s24  ;;  %v2679_v57 = vsel %vm927_vm3, %v9516_v37, %v9519_v34  ;;  %v2781_v63 = vld [vmem:[%s9008_s4] sm:$0xff] }
 0x4c2   : > { %2725 = vrot.lane.b32.xlu0 %v2699_v10, %s5449_s24  ;;  %v7056_v12 = vpop.permute.xlu2 %1760  ;;  %v2702_v50 = vadd.f32 %v2679_v57, %v2615_v30  ;;  %v9529_v57 = vld [vmem:[#allocation71_spill] sm:$0xff] }
 0x4c3   : > { %9514 = vst [vmem:[#allocation109_spill] sm:$0xff] %v7056_v12  ;;  %v7064_v19 = vpop.permute.xlu1 %2037  ;;  %v1180_v30 = vmul.f32 %v9529_v57, %v9525_v3  ;;  %v975_v12 = vmul.f32 %v5886_v28, %v9572_v55 }
 0x4c4   : > { %9517 = vst [vmem:[#allocation130_spill] sm:$0xff] %v7064_v19  ;;  %v7066_v22 = vpop.permute.xlu0 %2035  ;;  %v9566_v19 = vld [vmem:[#allocation50_spill] sm:$0xff] }
 0x4c5   : > { %9518 = vst [vmem:[#allocation123_spill] sm:$0xff] %v7066_v22  ;;  %v7226_v22 = vsel %vm834_vm2, %v9566_v19, %v9565_v18 }
 0x4c8   : > { %2729 = vrot.lane.b32.xlu2 %v2701_v38, %s5449_s24  ;;  %v1179_v38 = vmul.f32 %v9529_v57, %v5617_v31 }
 0x4c9   : > { %2784 = vperm.xlu1 %5405, %v2781_v63  }
 0x4ca   : > { %2731 = vrot.lane.b32.xlu0 %v2702_v50, %s5449_s24  ;;  %v7076_v56 = vpop.permute.xlu2 %2131 }
 0x4cb   : > { %9520 = vst [vmem:[#allocation129_spill] sm:$0xff] %v7076_v56  ;;  %v7078_v17 = vpop.permute.xlu1 %2407 }
 0x4cc   : > { %9521 = vst [vmem:[#allocation82_spill] sm:$0xff] %v7078_v17  ;;  %v7080_v10 = vpop.permute.xlu0 %2221  ;;  %v9571_v17 = vld [vmem:[#allocation30_spill] sm:$0xff] }
 0x4cd   : > { %9522 = vst [vmem:[#allocation91_spill] sm:$0xff] %v7080_v10  ;;  %v977_v10 = vmul.f32 %v5886_v28, %v5583_v13 }
 0x4d0   : > { %1124 = vrot.lane.b32.xlu2 %v1087_v11, %s5421_s0  ;;  %v9533_v11 = vld [vmem:[#allocation73_spill] sm:$0xff] }
 0x4d1   : > { %1488 = vrot.lane.b32.xlu1 %v1451_v16, %s5420_s30  ;;  %v1543_v40 = vmul.f32 %v9533_v11, %v5617_v31  ;;  %v9534_v16 = vld [vmem:[#allocation72_spill] sm:$0xff]  ;;  %v1544_v57 = vmul.f32 %v9533_v11, %v9525_v3 }
 0x4d2   : > { %1126 = vrot.lane.b32.xlu0 %v1088_v9, %s5421_s0  ;;  %v7091_v37 = vpop.permute.xlu2 %2664  ;;  %v1908_v9 = vmul.f32 %v9534_v16, %v5617_v31  ;;  %v1909_v20 = vmul.f32 %v9534_v16, %v9525_v3  ;;  %v9542_v16 = vld [vmem:[#allocation74_spill] sm:$0xff] }
 0x4d3   : > { %9526 = vst [vmem:[#allocation96_spill] sm:$0xff] %v7091_v37  ;;  %v7093_v8 = vpop.permute.xlu1 %2579  ;;  %v9556_v37 = vld [vmem:[#allocation41_spill] sm:$0xff] }
 0x4d4   : > { %9527 = vst [vmem:[#allocation87_spill] sm:$0xff] %v7093_v8  ;;  %v7095_v4 = vpop.permute.xlu0 %2577  ;;  %v9558_v8 = vld [vmem:[#allocation44_spill] sm:$0xff] }
 0x4d5   : > { %9528 = vst [vmem:[#allocation89_spill] sm:$0xff] %v7095_v4 }
 0x4d8   : > { %1490 = vrot.lane.b32.xlu2 %v1452_v33, %s5420_s30 }
 0x4d9   : > { %1218 = vrot.lane.b32.xlu1 %v1180_v30, %s5423_s17 }
 0x4da   : > { %1216 = vrot.lane.b32.xlu0 %v1179_v38, %s5423_s17  ;;  %v7106_v63 = vpop.permute.xlu2 %2225 }
 0x4db   : > { %9530 = vst [vmem:[#allocation86_spill] sm:$0xff] %v7106_v63  ;;  %v7108_v50 = vpop.permute.xlu1 %2129  ;;  %v9538_v63 = vld [vmem:[#allocation75_spill] sm:$0xff] }
 0x4dc   : > { %9531 = vst [vmem:[#allocation116_spill] sm:$0xff] %v7108_v50  ;;  %v7110_v47 = vpop.permute.xlu0 %1762  ;;  %v1272_v56 = vmul.f32 %v9538_v63, %v9525_v3  ;;  %v1271_v11 = vmul.f32 %v9538_v63, %v5617_v31  ;;  %v1636_v63 = vmul.f32 %v9542_v16, %v9525_v3 }
 0x4dd   : > { %9532 = vst [vmem:[#allocation105_spill] sm:$0xff] %v7110_v47  ;;  %v9573_v47 = vld [vmem:[#allocation68_spill] sm:$0xff] }
 0x4e0   : > { %1580 = vrot.lane.b32.xlu2 %v1543_v40, %s5421_s0 }
 0x4e1   : > { %1945 = vrot.lane.b32.xlu1 %v1908_v9, %s5420_s30 }
 0x4e2   : > { %1582 = vrot.lane.b32.xlu0 %v1544_v57, %s5421_s0  ;;  %v7121_v33 = vpop.permute.xlu2 %2668 }
 0x4e3   : > { %9535 = vst [vmem:[#allocation97_spill] sm:$0xff] %v7121_v33  ;;  %v7123_v30 = vpop.permute.xlu1 %2496  ;;  %v1635_v33 = vmul.f32 %v9542_v16, %v5617_v31  ;;  %v9547_v16 = vld [vmem:[#allocation76_spill] sm:$0xff] }
 0x4e4   : > { %9536 = vst [vmem:[#allocation113_spill] sm:$0xff] %v7123_v30  ;;  %v7125_v38 = vpop.permute.xlu0 %2494  ;;  %v9543_v30 = vld [vmem:[#allocation77_spill] sm:$0xff] }
 0x4e5   : > { %9537 = vst [vmem:[#allocation136_spill] sm:$0xff] %v7125_v38  ;;  %v2002_v34 = vmul.f32 %v9543_v30, %v5617_v31  ;;  %v9561_v38 = vld [vmem:[#allocation45_spill] sm:$0xff] }
 0x4e8   : > { %1947 = vrot.lane.b32.xlu2 %v1909_v20, %s5420_s30 }
 0x4e9   : > { %1310 = vrot.lane.b32.xlu1 %v1272_v56, %s5424_s18 }
 0x4ea   : > { %1308 = vrot.lane.b32.xlu0 %v1271_v11, %s5424_s18  ;;  %v7136_v40 = vpop.permute.xlu2 %1362 }
 0x4eb   : > { %9539 = vst [vmem:[#allocation126_spill] sm:$0xff] %v7136_v40  ;;  %v7138_v9 = vpop.permute.xlu1 %2223  ;;  %v2003_v40 = vmul.f32 %v9543_v30, %v9525_v3  ;;  %v1728_v30 = vmul.f32 %v5973_v51, %v9525_v3 }
 0x4ec   : > { %9540 = vst [vmem:[#allocation112_spill] sm:$0xff] %v7138_v9  ;;  %v7140_v57 = vpop.permute.xlu0 %2666  ;;  %v2376_v9 = vmul.f32 %v9547_v16, %v9525_v3  ;;  %v2096_v16 = vmul.f32 %v6015_v1, %v5617_v31 }
 0x4ed   : > { %9541 = vst [vmem:[#allocation133_spill] sm:$0xff] %v7140_v57  ;;  %v1727_v57 = vmul.f32 %v5973_v51, %v5617_v31 }
 0x4f0   : > { %1672 = vrot.lane.b32.xlu2 %v1635_v33, %s5423_s17 }
 0x4f1   : > { %2039 = vrot.lane.b32.xlu1 %v2002_v34, %s5421_s0 }
 0x4f2   : > { %1674 = vrot.lane.b32.xlu0 %v1636_v63, %s5423_s17  ;;  %v7151_v20 = vpop.permute.xlu2 %1368 }
 0x4f3   : > { %9544 = vst [vmem:[#allocation99_spill] sm:$0xff] %v7151_v20  ;;  %v7153_v56 = vpop.permute.xlu1 %2583  ;;  %v2097_v20 = vmul.f32 %v6015_v1, %v9525_v3 }
 0x4f4   : > { %9545 = vst [vmem:[#allocation132_spill] sm:$0xff] %v7153_v56  ;;  %v7155_v11 = vpop.permute.xlu0 %2581  ;;  %v9554_v56 = vld [vmem:[#allocation18_spill] sm:$0xff] }
 0x4f5   : > { %9546 = vst [vmem:[#allocation92_spill] sm:$0xff] %v7155_v11  ;;  %v9557_v11 = vld [vmem:[#allocation13_spill] sm:$0xff] }
 0x4f6   : > { %v742_v50 = vsel %vm741_vm1, %v9558_v8, %v9557_v11  ;;  %v974_v8 = vmul.f32 %v5886_v28, %v9511_v5 }
 0x4f8   : > { %2041 = vrot.lane.b32.xlu2 %v2003_v40, %s5421_s0  ;;  %v9551_v40 = vld [vmem:[#allocation40_spill] sm:$0xff] }
 0x4f9   : > { %1764 = vrot.lane.b32.xlu1 %v1727_v57, %s5424_s18  ;;  %v9552_v57 = vld [vmem:[#allocation39_spill] sm:$0xff] }
 0x4fa   : > { %2411 = vrot.lane.b32.xlu0 %v2376_v9, %s5420_s30  ;;  %v7166_v34 = vpop.permute.xlu2 %1818  ;;  %v651_v9 = vsel %vm648_vm0, %v9552_v57, %v9551_v40 }
 0x4fb   : > { %9548 = vst [vmem:[#allocation98_spill] sm:$0xff] %v7166_v34  ;;  %v7168_v33 = vpop.permute.xlu1 %1360  ;;  %v9553_v34 = vld [vmem:[#allocation20_spill] sm:$0xff] }
 0x4fc   : > { %9549 = vst [vmem:[#allocation115_spill] sm:$0xff] %v7168_v33  ;;  %v7170_v63 = vpop.permute.xlu0 %2670  ;;  %v649_v33 = vsel %vm648_vm0, %v9554_v56, %v9553_v34  ;;  %v650_v51 = vsel %vm648_vm0, %v9553_v34, %v9552_v57  ;;  %v9560_v56 = vld [vmem:[#allocation14_spill] sm:$0xff]  ;;  %v9562_v57 = vld [vmem:[#allocation25_spill] sm:$0xff] }
 0x4fd   : > { %9550 = vst [vmem:[#allocation119_spill] sm:$0xff] %v7170_v63  ;;  %v9555_v63 = vld [vmem:[#allocation22_spill] sm:$0xff]  ;;  %v745_v34 = vsel %vm741_vm1, %v9561_v38, %v9560_v56 }
 0x4fe   : > { %v652_v1 = vsel %vm648_vm0, %v9551_v40, %v9555_v63  ;;  %v743_v40 = vsel %vm741_vm1, %v9557_v11, %v9562_v57  ;;  %v9567_v11 = vld [vmem:[#allocation49_spill] sm:$0xff] }
 0x500   : > { %1766 = vrot.lane.b32.xlu2 %v1728_v30, %s5424_s18  ;;  %v7195_v30 = vsel %vm648_vm0, %v9555_v63, %v9556_v37  ;;  %v7212_v63 = vsel %vm741_vm1, %v9562_v57, %v9561_v38  ;;  %v7231_v38 = vsel %vm834_vm2, %v9568_v2, %v9567_v11  ;;  %v9569_v57 = vld [vmem:[#allocation53_spill] sm:$0xff]  ;;  %v976_v2 = vmul.f32 %v5886_v28, %v5607_v26 }
 0x501   : > { %2135 = vrot.lane.b32.xlu1 %v2097_v20, %s5423_s17  ;;  %v1042_v4 = vsel %vm648_vm0, %v5897_v44, %v9569_v57  ;;  %v9574_v44 = vld [vmem:[#allocation66_spill] sm:$0xff]  ;;  %v1045_v28 = vsel %vm648_vm0, %v9573_v47, %v9577_v25 }
 0x502   : > { %2133 = vrot.lane.b32.xlu0 %v2096_v16, %s5423_s17  ;;  %v7201_v20 = vpop.permute.xlu2 %1824  ;;  %v9564_v16 = vld [vmem:[#allocation26_spill] sm:$0xff]  ;;  %v1066_v46 = vadd.f32 %v1042_v4, %v974_v8  ;;  %v9578_v4 = vld [vmem:[#allocation31_spill] sm:$0xff] }
 0x503   : > { %9559 = vst [vmem:[#allocation108_spill] sm:$0xff] %v7201_v20  ;;  %v7216_v37 = vpop.permute.xlu1 %1366  ;;  %v7221_v20 = vsel %vm741_vm1, %v9560_v56, %v9564_v16  ;;  %v7241_v56 = vsel %vm834_vm2, %v9567_v11, %v9571_v17  ;;  %v7246_v16 = vsel %vm834_vm2, %v9571_v17, %v9566_v19  ;;  %v9575_v11 = vld [vmem:[#allocation159_spill] sm:$0xff]  ;;  %v2463_v19 = vmul.f32 %v5990_v61, %v9525_v3  ;;  %v9580_v8 = vld [vmem:[#allocation62_spill] sm:$0xff] }
 0x504   : > { %9563 = vst [vmem:[#allocation135_spill] sm:$0xff] %v7216_v37  ;;  %v7236_v37 = vpop.permute.xlu0 %1364  ;;  %v1134_v43 = vsel %vm741_vm1, %v9423_v42, %v9575_v11  ;;  %v1043_v17 = vsel %vm648_vm0, %v9569_v57, %v9574_v44  ;;  %v583_v42 = vmul.f32 %v9576_v53, %v5585_v14  ;;  %v581_v61 = vmul.f32 %v9576_v53, %v5587_v15  ;;  %v9582_v15 = vld [vmem:[#allocation56_spill] sm:$0xff] }
 0x505   : > { %9570 = vst [vmem:[#allocation139_spill] sm:$0xff] %v7236_v37  ;;  %v1044_v37 = vsel %vm648_vm0, %v9574_v44, %v9573_v47  ;;  %v2190_v57 = vmul.f32 %v6034_v45, %v5617_v31  ;;  %v7282_v7 = vsel %vm834_vm2, %v9565_v18, %v9578_v4  ;;  %v9581_v44 = vld [vmem:[#allocation58_spill] sm:$0xff]  ;;  %v1158_v25 = vadd.f32 %v1134_v43, %v1066_v46  ;;  %v9584_v31 = vld [vmem:[#allocation35_spill] sm:$0xff]  ;;  %v9586_v43 = vld [vmem:[#allocation36_spill] sm:$0xff] }
 0x506   : > { %9579 = vst [vmem:[#allocation128_spill] sm:$0xff] %v7282_v7  ;;  %v7287_v47 = vsel %vm927_vm3, %v9581_v44, %v9580_v8  ;;  %v582_v14 = vmul.f32 %v9576_v53, %v5573_v6  ;;  %v9583_v45 = vld [vmem:[#allocation34_spill] sm:$0xff]  ;;  %v7300_v18 = vsel %vm927_vm3, %v9582_v15, %v9584_v31  ;;  %v7305_v4 = vsel %vm927_vm3, %v9584_v31, %v9581_v44  ;;  %v9591_v44 = vld [vmem:[#allocation171_spill] sm:$0xff] }
 0x507   : > { %9585 = vst [vmem:[#allocation142_spill] sm:$0xff] %v7300_v18  ;;  %v7310_v6 = vsel %vm927_vm3, %v9580_v8, %v9586_v43  ;;  %v7315_v46 = vadd.f32 %v1044_v37, %v976_v2  ;;  %v7317_v7 = vadd.f32 %v1045_v28, %v977_v10  ;;  %v1226_v31 = vsel %vm834_vm2, %v9428_v27, %v9590_v54  ;;  %v9593_v27 = vld [vmem:[#allocation162_spill] sm:$0xff] }
 0x508   : > { %2498 = vrot.lane.b32.xlu2 %v2463_v19, %s5421_s0  ;;  %v7295_v19 = vsel %vm927_vm3, %v9583_v45, %v9582_v15  ;;  %9587 = vst [vmem:[#allocation102_spill] sm:$0xff] %v7310_v6  ;;  %v1067_v45 = vadd.f32 %v1043_v17, %v975_v12  ;;  %v673_v15 = vadd.f32 %v649_v33, %v580_v62  ;;  %v9594_v33 = vld [vmem:[#allocation163_spill] sm:$0xff]  ;;  %v9596_v17 = vld [vmem:[#allocation156_spill] sm:$0xff] }
 0x509   : > { %2229 = vrot.lane.b32.xlu1 %v2191_v36, %s5424_s18  ;;  %v1318_v8 = vsel %vm927_vm3, %v9434_v35, %v9591_v44  ;;  %v676_v43 = vadd.f32 %v652_v1, %v583_v42  ;;  %v1430_v12 = vmul.f32 %v6053_v48, %v9511_v5  ;;  %v1250_v28 = vadd.f32 %v1226_v31, %v1158_v25 }
 0x50a   : > { %2227 = vrot.lane.b32.xlu0 %v2190_v57, %s5424_s18  ;;  %v7313_v36 = vpop.permute.xlu2 %2284  ;;  %v674_v57 = vadd.f32 %v650_v51, %v581_v61  ;;  %v675_v10 = vadd.f32 %v651_v9, %v582_v14  ;;  %v584_v62 = vmul.f32 %v9576_v53, %v5599_v21  ;;  %v1431_v37 = vmul.f32 %v6053_v48, %v9572_v55  ;;  %v9595_v51 = vld [vmem:[#allocation78_spill] sm:$0xff]  ;;  %v9598_v14 = vld [vmem:[#allocation165_spill] sm:$0xff] }
 0x50b   : > { %9588 = vst [vmem:[#allocation121_spill] sm:$0xff] %v7313_v36  ;;  %v7319_v18 = vpop.permute.xlu1 %1816  ;;  %v1499_v2 = vsel %vm648_vm0, %v9594_v33, %v9593_v27  ;;  %v7340_v35 = vmul.f32 %v6053_v48, %v5607_v26  ;;  %v2550_v1 = vmul.f32 %v9595_v51, %v9525_v3  ;;  %v1135_v25 = vsel %vm741_vm1, %v9575_v11, %v9596_v17  ;;  %v9597_v61 = vld [vmem:[#allocation158_spill] sm:$0xff] }
 0x50c   : > { %9589 = vst [vmem:[#allocation122_spill] sm:$0xff] %v7319_v18  ;;  %v7327_v6 = vpop.permute.xlu0 %1370  ;;  %v1498_v21 = vsel %vm648_vm0, %v9452_v59, %v9594_v33  ;;  %v1342_v9 = vadd.f32 %v1318_v8, %v1250_v28  ;;  %v766_v42 = vadd.f32 %v742_v50, %v673_v15  ;;  %v1591_v31 = vsel %vm741_vm1, %v9598_v14, %v9597_v61  ;;  %v9599_v18 = vld [vmem:[#allocation166_spill] sm:$0xff]  ;;  %v9602_v33 = vld [vmem:[#allocation169_spill] sm:$0xff] }
 0x50d   : > { %9592 = vst [vmem:[#allocation101_spill] sm:$0xff] %v7327_v6  ;;  %v769_v53 = vadd.f32 %v745_v34, %v676_v43  ;;  %v767_v6 = vadd.f32 %v743_v40, %v674_v57  ;;  %v2637_v36 = vmul.f32 %v6004_v41, %v9525_v3  ;;  %v1523_v51 = vadd.f32 %v1499_v2, %v1431_v37  ;;  %v9600_v43 = vld [vmem:[#allocation167_spill] sm:$0xff] }
 0x50e   : > { %v1590_v11 = vsel %vm741_vm1, %v9457_v39, %v9598_v14  ;;  %v1227_v59 = vsel %vm834_vm2, %v9590_v54, %v9599_v18  ;;  %v768_v50 = vadd.f32 %v7212_v63, %v675_v10  ;;  %v1159_v34 = vadd.f32 %v1135_v25, %v1067_v45  ;;  %v9601_v63 = vld [vmem:[#allocation164_spill] sm:$0xff]  ;;  %v9605_v14 = vld [vmem:[#allocation173_spill] sm:$0xff] }
 0x50f   : > { %v1522_v40 = vadd.f32 %v1498_v21, %v1430_v12  ;;  %v1683_v41 = vsel %vm834_vm2, %v9600_v43, %v6725_v32  ;;  %v677_v15 = vadd.f32 %v7195_v30, %v584_v62  ;;  %v1615_v39 = vadd.f32 %v1591_v31, %v1523_v51  ;;  %v9606_v51 = vld [vmem:[#allocation142_spill] sm:$0xff] }
 0x510   : > { %2585 = vrot.lane.b32.xlu2 %v2550_v1, %s5423_s17  ;;  %v1682_v54 = vsel %vm834_vm2, %v9462_v58, %v9600_v43  ;;  %v1319_v45 = vsel %vm927_vm3, %v9591_v44, %v9601_v63  ;;  %v859_v57 = vadd.f32 %v7231_v38, %v766_v42  ;;  %v1251_v10 = vadd.f32 %v1227_v59, %v1159_v34  ;;  %v9609_v34 = vld [vmem:[#allocation128_spill] sm:$0xff]  ;;  %s5453_s17 = smov 44  }
 0x511   : > { %1372 = vrot.lane.b32.xlu1 %v1342_v9, %s5446_s19  ;;  %v1614_v28 = vadd.f32 %v1590_v11, %v1522_v40  ;;  %v1775_v30 = vsel %vm927_vm3, %v6876_v29, %v6871_v49  ;;  %v1707_v37 = vadd.f32 %v1683_v41, %v1615_v39  ;;  %v1774_v58 = vsel %vm927_vm3, %v9465_v60, %v6876_v29  ;;  %v9608_v11 = vld [vmem:[#allocation131_spill] sm:$0xff]  ;;  %v9611_v39 = vld [vmem:[#allocation120_spill] sm:$0xff] }
 0x512   : > { %2672 = vrot.lane.b32.xlu0 %v2637_v36, %s5424_s18  ;;  %v7369_v8 = vpop.permute.xlu2 %2290  ;;  %v862_v36 = vadd.f32 %v7226_v22, %v769_v53  ;;  %v860_v44 = vadd.f32 %v7241_v56, %v767_v6  ;;  %v861_v38 = vadd.f32 %v7246_v16, %v768_v50  ;;  %v1955_v2 = vsel %vm648_vm0, %v9481_v0, %v9602_v33  ;;  %v9603_v53 = vld [vmem:[#allocation161_spill] sm:$0xff] }
 0x513   : > { %v7378_v12 = vpop.permute.xlu1 %1822  ;;  %v1706_v1 = vadd.f32 %v1682_v54, %v1614_v28  ;;  %v1343_v25 = vadd.f32 %v1319_v45, %v1251_v10  ;;  %v770_v21 = vadd.f32 %v7221_v20, %v677_v15  ;;  %v1136_v22 = vsel %vm741_vm1, %v9596_v17, %v9603_v53  ;;  %v9604_v17 = vld [vmem:[#allocation172_spill] sm:$0xff] }
 0x514   : > { %v7384_v62 = vpop.permute.xlu0 %1820  ;;  %v1886_v9 = vmul.f32 %v9454_v24, %v9511_v5  ;;  %v1433_v29 = vmul.f32 %v6053_v48, %v5583_v13  ;;  %v1799_v60 = vadd.f32 %v1775_v30, %v1707_v37  ;;  %v2049_v16 = vsel %vm741_vm1, %v9486_v23, %v6718_v52  ;;  %v9610_v15 = vld [vmem:[#allocation100_spill] sm:$0xff]  ;;  %v9613_v30 = vld [vmem:[#allocation149_spill] sm:$0xff] }
 0x515   : > { %v1798_v0 = vadd.f32 %v1774_v58, %v1706_v1  ;;  %v7406_v56 = vadd.f32 %v7295_v19, %v859_v57  ;;  %v7409_v20 = vadd.f32 %v7287_v47, %v862_v36  ;;  %v1137_v42 = vsel %vm741_vm1, %v9603_v53, %v9604_v17  ;;  %v9607_v47 = vld [vmem:[#allocation107_spill] sm:$0xff]  ;;  %v9612_v10 = vld [vmem:[#allocation84_spill] sm:$0xff]  ;;  %v9616_v1 = vld [vmem:[#allocation174_spill] sm:$0xff] }
 0x516   : > { %v1980_v6 = vadd.f32 %v1955_v2, %v1886_v9  ;;  %v1228_v31 = vsel %vm834_vm2, %v9599_v18, %v9605_v14  ;;  %v7419_v23 = vadd.f32 %v9606_v51, %v860_v44  ;;  %v1160_v19 = vadd.f32 %v1136_v22, %v7315_v46  ;;  %v9614_v58 = vld [vmem:[#allocation168_spill] sm:$0xff]  ;;  %v9618_v53 = vld [vmem:[#allocation95_spill] sm:$0xff]  ;;  %v9621_v51 = vld [vmem:[#allocation85_spill] sm:$0xff] }
 0x517   : > { %v2143_v59 = vsel %vm834_vm2, %v9608_v11, %v9607_v47  ;;  %v7427_v50 = vadd.f32 %v7305_v4, %v861_v38  ;;  %v7430_v40 = vadd.f32 %v9609_v34, %v770_v21  ;;  %v1887_v43 = vmul.f32 %v9454_v24, %v9572_v55  ;;  %v9615_v2 = vld [vmem:[#allocation104_spill] sm:$0xff]  ;;  %v9622_v34 = vld [vmem:[#allocation106_spill] sm:$0xff] }
 0x518   : > { %1374 = vrot.lane.b32.xlu2 %v1343_v25, %s5446_s19  ;;  %v2074_v41 = vadd.f32 %v2049_v16, %v1980_v6  ;;  %v1229_v46 = vsel %vm834_vm2, %v9605_v14, %v9610_v15  ;;  %v1320_v4 = vsel %vm927_vm3, %v9601_v63, %v9611_v39  ;;  %v1161_v45 = vadd.f32 %v1137_v42, %v7317_v7  ;;  %v9617_v25 = vld [vmem:[#allocation175_spill] sm:$0xff]  ;;  %v9619_v16 = vld [vmem:[#allocation170_spill] sm:$0xff] }
 0x519   : > { %1830 = vrot.lane.b32.xlu1 %v1799_v60, %s5447_s20  ;;  %v1252_v57 = vadd.f32 %v1228_v31, %v1160_v19  ;;  %v1888_v28 = vmul.f32 %v9454_v24, %v5607_v26  ;;  %v2237_v36 = vsel %vm927_vm3, %v9613_v30, %v9612_v10  ;;  %v1956_v44 = vsel %vm648_vm0, %v9602_v33, %v9614_v58  ;;  %v9620_v31 = vld [vmem:[#allocation176_spill] sm:$0xff] }
 0x51a   : > { %1828 = vrot.lane.b32.xlu0 %v1798_v0, %s5447_s20  ;;  %v7433_v18 = vpop.permute.xlu2 %2723  ;;  %v2168_v38 = vadd.f32 %v2143_v59, %v2074_v41  ;;  %v1889_v63 = vmul.f32 %v9454_v24, %v5583_v13  ;;  %v1321_v7 = vsel %vm927_vm3, %v9611_v39, %v9615_v2  ;;  %v1501_v21 = vsel %vm648_vm0, %v9617_v25, %v9616_v1  ;;  %v9626_v30 = vld [vmem:[#allocation80_spill] sm:$0xff] }
 0x51b   : > { %v7443_v54 = vpop.permute.xlu1 %2282  ;;  %v2355_v22 = vmul.f32 %v9618_v53, %v9572_v55  ;;  %v1253_v9 = vadd.f32 %v1229_v46, %v1161_v45  ;;  %v1344_v60 = vadd.f32 %v1320_v4, %v1252_v57  ;;  %v1500_v33 = vsel %vm648_vm0, %v9593_v27, %v9617_v25  ;;  %v9624_v45 = vld [vmem:[#allocation103_spill] sm:$0xff] }
 0x51c   : > { %v7451_v37 = vpop.permute.xlu0 %1826  ;;  %v2050_v0 = vsel %vm741_vm1, %v6718_v52, %v9619_v16  ;;  %v2356_v6 = vmul.f32 %v9618_v53, %v5607_v26  ;;  %v2262_v42 = vadd.f32 %v2237_v36, %v2168_v38  ;;  %v1981_v14 = vadd.f32 %v1956_v44, %v1887_v43  ;;  %v9623_v43 = vld [vmem:[#allocation9_spill] sm:$0xff]  ;;  %v9625_v57 = vld [vmem:[#allocation127_spill] sm:$0xff]  ;;  %v9627_v36 = vld [vmem:[#allocation110_spill] sm:$0xff] }
 0x51d   : > { %v1593_v19 = vsel %vm741_vm1, %v9621_v51, %v9620_v31  ;;  %v1345_v11 = vadd.f32 %v1321_v7, %v1253_v9  ;;  %v2357_v59 = vmul.f32 %v9618_v53, %v5583_v13  ;;  %v1525_v27 = vadd.f32 %v1501_v21, %v1433_v29  ;;  %v9629_v25 = vld [vmem:[#allocation91_spill] sm:$0xff] }
 0x51e   : > { %v1592_v52 = vsel %vm741_vm1, %v9597_v61, %v9621_v51  ;;  %v2144_v41 = vsel %vm834_vm2, %v9607_v47, %v9622_v34  ;;  %v2358_v46 = vmul.f32 %v9618_v53, %v9623_v43  ;;  %v1524_v39 = vadd.f32 %v1500_v33, %v7340_v35  ;;  %v9628_v47 = vld [vmem:[#allocation90_spill] sm:$0xff]  ;;  %v9632_v51 = vld [vmem:[#allocation109_spill] sm:$0xff] }
 0x51f   : > { %v2075_v4 = vadd.f32 %v2050_v0, %v1981_v14  ;;  %v2419_v29 = vsel %vm648_vm0, %v9625_v57, %v9624_v45  ;;  %v1685_v61 = vsel %vm834_vm2, %v9627_v36, %v9626_v30  ;;  %v2420_v38 = vsel %vm648_vm0, %v9624_v45, %v9628_v47  ;;  %v9631_v14 = vld [vmem:[#allocation105_spill] sm:$0xff]  ;;  %v9634_v45 = vld [vmem:[#allocation146_spill] sm:$0xff] }
 0x520   : > { %1376 = vrot.lane.b32.xlu2 %v1344_v60, %s5446_s19  ;;  %v1617_v7 = vadd.f32 %v1593_v19, %v1525_v27  ;;  %v1684_v35 = vsel %vm834_vm2, %v6725_v32, %v9627_v36  ;;  %v2238_v21 = vsel %vm927_vm3, %v9612_v10, %v9629_v25  ;;  %v9630_v60 = vld [vmem:[#allocation79_spill] sm:$0xff]  ;;  %v1616_v0 = vadd.f32 %v1592_v52, %v1524_v39  ;;  %v9633_v32 = vld [vmem:[#allocation93_spill] sm:$0xff] }
 0x521   : > { %2294 = vrot.lane.b32.xlu1 %v2262_v42, %s5448_s23  ;;  %v1957_v33 = vsel %vm648_vm0, %v9614_v58, %v9630_v60  ;;  %v2169_v42 = vadd.f32 %v2144_v41, %v2075_v4  ;;  %v1777_v19 = vsel %vm927_vm3, %v9632_v51, %v9631_v14  ;;  %v2442_v27 = vadd.f32 %v2419_v29, %v2355_v22  ;;  %v9635_v58 = vld [vmem:[#allocation83_spill] sm:$0xff]  ;;  %v9636_v4 = vld [vmem:[#allocation88_spill] sm:$0xff]  ;;  %v9637_v29 = vld [vmem:[#allocation82_spill] sm:$0xff] }
 0x522   : > { %1378 = vrot.lane.b32.xlu0 %v1345_v11, %s5446_s19  ;;  %v7497_v44 = vpop.permute.xlu2 %2729  ;;  %v2506_v57 = vsel %vm741_vm1, %v9634_v45, %v9633_v32  ;;  %v1709_v10 = vadd.f32 %v1685_v61, %v1617_v7  ;;  %v1776_v36 = vsel %vm927_vm3, %v6871_v49, %v9632_v51  ;;  %v2443_v13 = vadd.f32 %v2420_v38, %v2356_v6  ;;  %v9638_v61 = vld [vmem:[#allocation89_spill] sm:$0xff]  ;;  %v9639_v7 = vld [vmem:[#allocation148_spill] sm:$0xff]  ;;  %v9640_v38 = vld [vmem:[#allocation123_spill] sm:$0xff] }
 0x523   : > { %v7508_v9 = vpop.permute.xlu1 %2288  ;;  %v1958_v52 = vsel %vm648_vm0, %v9630_v60, %v9635_v58  ;;  %v1708_v41 = vadd.f32 %v1684_v35, %v1616_v0  ;;  %v2263_v39 = vadd.f32 %v2238_v21, %v2169_v42  ;;  %v2507_v22 = vsel %vm741_vm1, %v9633_v32, %v9636_v4  ;;  %v9641_v35 = vld [vmem:[#allocation130_spill] sm:$0xff] }
 0x524   : > { %v7516_v11 = vpop.permute.xlu0 %2286  ;;  %v2421_v45 = vsel %vm648_vm0, %v9628_v47, %v9637_v29  ;;  %v2593_v26 = vsel %vm834_vm2, %v9639_v7, %v9638_v61  ;;  %v1801_v49 = vadd.f32 %v1777_v19, %v1709_v10  ;;  %v2529_v6 = vadd.f32 %v2506_v57, %v2442_v27  ;;  %v9642_v47 = vld [vmem:[#allocation94_spill] sm:$0xff]  ;;  %v9643_v7 = vld [vmem:[#allocation136_spill] sm:$0xff] }
 0x525   : > { %v2051_v60 = vsel %vm741_vm1, %v9619_v16, %v9640_v38  ;;  %v2052_v21 = vsel %vm741_vm1, %v9640_v38, %v9641_v35  ;;  %v1800_v0 = vadd.f32 %v1776_v36, %v1708_v41  ;;  %v1982_v42 = vadd.f32 %v1957_v33, %v1888_v28  ;;  %v9644_v10 = vld [vmem:[#allocation116_spill] sm:$0xff]  ;;  %v9650_v38 = vld [vmem:[#allocation129_spill] sm:$0xff] }
 0x526   : > { %v1983_v51 = vadd.f32 %v1958_v52, %v1889_v63  ;;  %v2422_v32 = vsel %vm648_vm0, %v9637_v29, %v9642_v47  ;;  %v2508_v19 = vsel %vm741_vm1, %v9636_v4, %v9643_v7  ;;  %v2530_v16 = vadd.f32 %v2507_v22, %v2443_v13  ;;  %v9645_v52 = vld [vmem:[#allocation87_spill] sm:$0xff]  ;;  %v9647_v4 = vld [vmem:[#allocation96_spill] sm:$0xff] }
 0x527   : > { %v2444_v27 = vadd.f32 %v2421_v45, %v2357_v59  ;;  %v2616_v57 = vadd.f32 %v2593_v26, %v2529_v6  ;;  %v2145_v36 = vsel %vm834_vm2, %v9622_v34, %v9644_v10  ;;  %v2076_v63 = vadd.f32 %v2051_v60, %v1982_v42  ;;  %v9648_v22 = vld [vmem:[#allocation160_spill] sm:$0xff] }
 0x528   : > { %2296 = vrot.lane.b32.xlu2 %v2263_v39, %s5448_s23  ;;  %v2077_v33 = vadd.f32 %v2052_v21, %v1983_v51  ;;  %v2594_v41 = vsel %vm834_vm2, %v9638_v61, %v9645_v52  ;;  %v9646_v39 = vld [vmem:[#allocation92_spill] sm:$0xff]  ;;  %v2445_v26 = vadd.f32 %v2422_v32, %v2358_v46  ;;  %v2680_v34 = vsel %vm927_vm3, %v9648_v22, %v9647_v4  ;;  %v9651_v21 = vld [vmem:[#allocation113_spill] sm:$0xff] }
 0x529   : > { %1834 = vrot.lane.b32.xlu1 %v1801_v49, %s5447_s20  ;;  %v2595_v13 = vsel %vm834_vm2, %v9645_v52, %v9646_v39  ;;  %v2531_v29 = vadd.f32 %v2508_v19, %v2444_v27  ;;  %v9649_v45 = vld [vmem:[#allocation112_spill] sm:$0xff]  ;;  %v2146_v61 = vsel %vm834_vm2, %v9644_v10, %v9650_v38  ;;  %v2170_v60 = vadd.f32 %v2145_v36, %v2076_v63  ;;  %v9655_v36 = vld [vmem:[#allocation102_spill] sm:$0xff] }
 0x52a   : > { %1832 = vrot.lane.b32.xlu0 %v1800_v0, %s5447_s20  ;;  %v7554_v28 = vpop.permute.xlu2 %1124  ;;  %v2239_v49 = vsel %vm927_vm3, %v9629_v25, %v9649_v45  ;;  %v2509_v46 = vsel %vm741_vm1, %v9643_v7, %v9651_v21  ;;  %v9652_v0 = vld [vmem:[#allocation133_spill] sm:$0xff]  ;;  %v2617_v51 = vadd.f32 %v2594_v41, %v2530_v16  ;;  %v2703_v32 = vadd.f32 %v2680_v34, %v2616_v57  ;;  %v9653_v25 = vld [vmem:[#allocation86_spill] sm:$0xff]  ;;  %v9654_v22 = vld [vmem:[#allocation132_spill] sm:$0xff] }
 0x52b   : > { %v2722_v59 = vpop.permute.xlu1 %2721  ;;  %v2681_v42 = vsel %vm927_vm3, %v9647_v4, %v9652_v0  ;;  %v2618_v19 = vadd.f32 %v2595_v13, %v2531_v29  ;;  %v2240_v27 = vsel %vm927_vm3, %v9649_v45, %v9653_v25  ;;  %v2264_v52 = vadd.f32 %v2239_v49, %v2170_v60  ;;  %v9656_v16 = vld [vmem:[#allocation97_spill] sm:$0xff]  ;;  %v9657_v41 = vld [vmem:[#allocation126_spill] sm:$0xff]  ;;  %v9658_v13 = vld [vmem:[#allocation115_spill] sm:$0xff] }
 0x52c   : > { %v7568_v6 = vpop.permute.xlu0 %2292  ;;  %v2596_v10 = vsel %vm834_vm2, %v9646_v39, %v9654_v22  ;;  %v956_v7 = vadd.f32 %v9655_v36, %v7430_v40  ;;  %v2171_v63 = vadd.f32 %v2146_v61, %v2077_v33  ;;  %v2532_v55 = vadd.f32 %v2509_v46, %v2445_v26  ;;  %v9659_v34 = vld [vmem:[#allocation139_spill] sm:$0xff]  ;;  %v9662_v46 = vld [vmem:[#allocation98_spill] sm:$0xff] }
 0x52d   : > { %v2704_v5 = vadd.f32 %v2681_v42, %v2617_v51  ;;  %v2682_v57 = vsel %vm927_vm3, %v9652_v0, %v9656_v16  ;;  %v1385_v4 = vsel %vm1384_vm4, %v9658_v13, %v9657_v41  ;;  %v1386_v39 = vsel %vm1384_vm4, %v9657_v41, %v9659_v34  ;;  %v9660_v29 = vld [vmem:[#allocation135_spill] sm:$0xff]  ;;  %v9663_v0 = vld [vmem:[#allocation122_spill] sm:$0xff] }
 0x52e   : > { %v1387_v40 = vsel %vm1384_vm4, %v9659_v34, %v9660_v29  ;;  %v2265_v33 = vadd.f32 %v2240_v27, %v2171_v63  ;;  %v2619_v26 = vadd.f32 %v2596_v10, %v2532_v55  ;;  %v2705_v45 = vadd.f32 %v2682_v57, %v2618_v19  ;;  %v9661_v61 = vld [vmem:[#allocation119_spill] sm:$0xff]  ;;  %v9665_v63 = vld [vmem:[#allocation121_spill] sm:$0xff] }
 0x52f   : > { %v2683_v60 = vsel %vm927_vm3, %v9656_v16, %v9661_v61  ;;  %v1841_v42 = vsel %vm1840_vm5, %v9663_v0, %v9662_v46  ;;  %v1842_v51 = vsel %vm1840_vm5, %v9662_v46, %v7384_v62  ;;  %v1843_v55 = vsel %vm1840_vm5, %v7384_v62, %v7378_v12  ;;  %v9664_v10 = vld [vmem:[#allocation99_spill] sm:$0xff] }
 0x530   : > { %2733 = vrot.lane.b32.xlu2 %v2703_v32, %s5449_s24  ;;  %v1409_v19 = vadd.f32 %v1386_v39, %v7419_v23  ;;  %v1410_v27 = vadd.f32 %v1387_v40, %v7427_v50  ;;  %v1388_v36 = vsel %vm1384_vm4, %v9660_v29, %v9664_v10  ;;  %v2309_v16 = vsel %vm2308_vm6, %v7443_v54, %v9665_v63  ;;  %v9666_v23 = vld [vmem:[#allocation101_spill] sm:$0xff]  ;;  %v9667_v29 = vld [vmem:[#allocation108_spill] sm:$0xff] }
 0x531   : > { %2298 = vrot.lane.b32.xlu1 %v2264_v52, %s5448_s23  ;;  %v2310_v62 = vsel %vm2308_vm6, %v9665_v63, %v7516_v11  ;;  %v1389_v50 = vsel %vm1384_vm4, %v9664_v10, %v9666_v23  ;;  %v2746_v34 = vsel %vm2745_vm7, %v2722_v59, %v7433_v18  ;;  %v1845_v59 = vsel %vm1840_vm5, %v9667_v29, %v7451_v37 }
 0x532   : > { %2735 = vrot.lane.b32.xlu0 %v2704_v5, %s5449_s24  ;;  %v7602_v49 = vpop.permute.xlu2 %1490  ;;  %v1408_v5 = vadd.f32 %v1385_v4, %v7406_v56  ;;  %v2311_v56 = vsel %vm2308_vm6, %v7516_v11, %v7508_v9  ;;  %v1865_v41 = vadd.f32 %v1842_v51, %v1409_v19  ;;  %v1866_v13 = vadd.f32 %v1843_v55, %v1410_v27 }
 0x533   : > { %v2728_v32 = vpop.permute.xlu1 %2727  ;;  %v2706_v4 = vadd.f32 %v2683_v60, %v2619_v26  ;;  %v1844_v11 = vsel %vm1840_vm5, %v7378_v12, %v9667_v29  ;;  %v1412_v26 = vadd.f32 %v1389_v50, %v956_v7 }
 0x534   : > { %v2726_v52 = vpop.permute.xlu0 %2725  ;;  %v1864_v57 = vadd.f32 %v1841_v42, %v1408_v5  ;;  %v2334_v46 = vadd.f32 %v2310_v62, %v1865_v41  ;;  %v2335_v0 = vadd.f32 %v2311_v56, %v1866_v13  ;;  %v1411_v42 = vadd.f32 %v1388_v36, %v7409_v20 }
 0x535   : > { %v2747_v54 = vsel %vm2745_vm7, %v7433_v18, %v2726_v52  ;;  %v2748_v39 = vsel %vm2745_vm7, %v2726_v52, %v2728_v32  ;;  %v2312_v18 = vsel %vm2308_vm6, %v7508_v9, %v7369_v8  ;;  %v2313_v20 = vsel %vm2308_vm6, %v7369_v8, %v7568_v6 }
 0x536   : > { %v2333_v40 = vadd.f32 %v2309_v16, %v1864_v57  ;;  %v2770_v12 = vadd.f32 %v2747_v54, %v2334_v46  ;;  %v2771_v51 = vadd.f32 %v2748_v39, %v2335_v0  ;;  %v1868_v5 = vadd.f32 %v1845_v59, %v1412_v26  ;;  %v9668_v26 = vld [vmem:[#allocation65_spill] sm:$0xff] }
 0x537   : > { %v978_v59 = vmul.f32 %v9668_v26, %v9623_v43 }
 0x538   : > { %2300 = vrot.lane.b32.xlu2 %v2265_v33, %s5448_s23  ;;  %v2769_v60 = vadd.f32 %v2746_v34, %v2333_v40  ;;  %v1867_v33 = vadd.f32 %v1844_v11, %v1411_v42  ;;  %v2337_v8 = vadd.f32 %v2313_v20, %v1868_v5  ;;  %v9672_v5 = vld [vmem:[#allocation70_spill] sm:$0xff] }
 0x539   : > { %2739 = vrot.lane.b32.xlu1 %v2706_v4, %s5449_s24 }
 0x53a   : > { %2737 = vrot.lane.b32.xlu0 %v2705_v45, %s5449_s24  ;;  %v7652_v55 = vpop.permute.xlu2 %1580  ;;  %v2336_v10 = vadd.f32 %v2312_v18, %v1867_v33  ;;  %v2749_v45 = vsel %vm2745_vm7, %v2728_v32, %v7497_v44  ;;  %v9671_v33 = vld [vmem:[#allocation8_spill] sm:$0xff] }
 0x53b   : > { %v7657_v7 = vpop.permute.xlu1 %2784  ;;  %v979_v20 = vmul.f32 %v9668_v26, %v9671_v33 }
 0x53c   : > { %v7659_v19 = vpop.permute.xlu0 %2731  ;;  %v2789_v27 = vadd.f32 %v7657_v7, %v2771_v51  ;;  %v2788_v9 = vadd.f32 %v7657_v7, %v2770_v12  ;;  %v2787_v52 = vadd.f32 %v7657_v7, %v2769_v60  ;;  %v2772_v56 = vadd.f32 %v2749_v45, %v2336_v10  ;;  %v9669_v60 = vld [vmem:[#allocation67_spill] sm:$0xff] }
 0x53d   : > { %v2750_v36 = vsel %vm2745_vm7, %v7497_v44, %v7659_v19  ;;  %v9670_v12 = vld [vmem:[#allocation55_spill] sm:$0xff] }
 0x53e   : > { %v7669_v63 = vmax.f32 %v2789_v27, 0.0  ;;  %v7671_v16 = vmax.f32 %v2788_v9, 0.0  ;;  %v7673_v62 = vmax.f32 %v2787_v52, 0.0  ;;  %v2773_v50 = vadd.f32 %v2750_v36, %v2337_v8 }
 0x53f   : > { %v2790_v44 = vadd.f32 %v7657_v7, %v2772_v56  ;;  %v1046_v51 = vsel %vm648_vm0, %v9670_v12, %v9669_v60  ;;  %v1047_v27 = vsel %vm648_vm0, %v9669_v60, %v9672_v5  ;;  %v1138_v9 = vsel %vm741_vm1, %v9604_v17, %v7554_v28 }
 0x540   : > { %2822 = vrot.lane.b32.xlu2 %v7673_v62, %s5420_s30  ;;  %v2791_v41 = vadd.f32 %v7657_v7, %v2773_v50  ;;  %v1070_v52 = vadd.f32 %v1046_v51, %v978_v59  ;;  %v1071_v36 = vadd.f32 %v1047_v27, %v979_v20  ;;  %v1434_v50 = vmul.f32 %v6053_v48, %v9623_v43 }
 0x541   : > { %2826 = vrot.lane.b32.xlu1 %v7669_v63, %s5420_s30  ;;  %v7685_v4 = vmax.f32 %v2790_v44, 0.0  ;;  %v1435_v12 = vmul.f32 %v6053_v48, %v9671_v33 }
 0x542   : > { %2824 = vrot.lane.b32.xlu0 %v7671_v16, %s5420_s30  ;;  %v7681_v32 = vpop.permute.xlu2 %1947  ;;  %v7687_v34 = vmax.f32 %v2791_v41, 0.0  ;;  %v1162_v8 = vadd.f32 %v1138_v9, %v1070_v52 }
 0x543   : > { %v1489_v57 = vpop.permute.xlu1 %1488 }
 0x544   : > { %v1127_v13 = vpop.permute.xlu0 %1126  ;;  %v1502_v56 = vsel %vm648_vm0, %v9616_v1, %v1489_v57  ;;  %v1503_v1 = vsel %vm648_vm0, %v1489_v57, %v7602_v49 }
 0x545   : > { %v1139_v10 = vsel %vm741_vm1, %v7554_v28, %v1127_v13  ;;  %v1526_v59 = vadd.f32 %v1502_v56, %v1434_v50  ;;  %v1891_v56 = vmul.f32 %v9454_v24, %v9671_v33 }
 0x546   : > { %v1163_v41 = vadd.f32 %v1139_v10, %v1071_v36 }
 0x548   : > { %2828 = vrot.lane.b32.xlu2 %v7685_v4, %s5420_s30 }
 0x549   : > { %2877 = vrot.lane.b32.xlu1 %v7673_v62, %s5446_s19 }
 0x54a   : > { %2830 = vrot.lane.b32.xlu0 %v7687_v34, %s5420_s30  ;;  %v1673_v54 = vpop.permute.xlu2 %1672 }
 0x54b   : > { %v1219_v39 = vpop.permute.xlu1 %1218  ;;  %v1686_v5 = vsel %vm834_vm2, %v9626_v30, %v1673_v54 }
 0x54c   : > { %v1217_v29 = vpop.permute.xlu0 %1216 }
 0x54d   : > { %v1230_v45 = vsel %vm834_vm2, %v9610_v15, %v1217_v29  ;;  %v1231_v28 = vsel %vm834_vm2, %v1217_v29, %v1219_v39  ;;  %v1527_v29 = vadd.f32 %v1503_v1, %v1435_v12 }
 0x54e   : > { %v1254_v13 = vadd.f32 %v1230_v45, %v1162_v8  ;;  %v1255_v51 = vadd.f32 %v1231_v28, %v1163_v41 }
 0x550   : > { %2879 = vrot.lane.b32.xlu2 %v7671_v16, %s5446_s19 }
 0x551   : > { %2883 = vrot.lane.b32.xlu1 %v7685_v4, %s5446_s19 }
 0x552   : > { %2881 = vrot.lane.b32.xlu0 %v7669_v63, %s5446_s19  ;;  %v7701_v11 = vpop.permute.xlu2 %2041 }
 0x553   : > { %v7703_v40 = vpop.permute.xlu1 %1945 }
 0x554   : > { %v1583_v46 = vpop.permute.xlu0 %1582  ;;  %v1959_v8 = vsel %vm648_vm0, %v9635_v58, %v7703_v40  ;;  %v2360_v58 = vmul.f32 %v9618_v53, %v9525_v3 }
 0x555   : > { %v1595_v39 = vsel %vm741_vm1, %v7652_v55, %v1583_v46 }
 0x556   : > { %v1619_v48 = vadd.f32 %v1595_v39, %v1527_v29  ;;  %v1892_v29 = vmul.f32 %v9454_v24, %v9525_v3 }
 0x558   : > { %2885 = vrot.lane.b32.xlu2 %v7687_v34, %s5446_s19 }
 0x559   : > { %2936 = vrot.lane.b32.xlu1 %v7671_v16, %s5450_s27 }
 0x55a   : > { %2934 = vrot.lane.b32.xlu0 %v7673_v62, %s5450_s27  ;;  %v1767_v0 = vpop.permute.xlu2 %1766 }
 0x55b   : > { %v1311_v42 = vpop.permute.xlu1 %1310 }
 0x55c   : > { %v1309_v18 = vpop.permute.xlu0 %1308 }
 0x55d   : > { %v1322_v15 = vsel %vm927_vm3, %v9615_v2, %v1309_v18  ;;  %v1323_v60 = vsel %vm927_vm3, %v1309_v18, %v1311_v42  ;;  %v1594_v2 = vsel %vm741_vm1, %v9620_v31, %v7652_v55 }
 0x55e   : > { %v1346_v20 = vadd.f32 %v1322_v15, %v1254_v13  ;;  %v1347_v49 = vadd.f32 %v1323_v60, %v1255_v51  ;;  %v1618_v57 = vadd.f32 %v1594_v2, %v1526_v59 }
 0x560   : > { %2938 = vrot.lane.b32.xlu2 %v7669_v63, %s5450_s27  ;;  %v1710_v27 = vadd.f32 %v1686_v5, %v1618_v57 }
 0x561   : > { %2942 = vrot.lane.b32.xlu1 %v7687_v34, %s5450_s27 }
 0x562   : > { %2940 = vrot.lane.b32.xlu0 %v7685_v4, %s5450_s27  ;;  %v7736_v17 = vpop.permute.xlu2 %2498 }
 0x563   : > { %v2040_v44 = vpop.permute.xlu1 %2039 }
 0x564   : > { %v1675_v26 = vpop.permute.xlu0 %1674  ;;  %v2053_v50 = vsel %vm741_vm1, %v9641_v35, %v2040_v44  ;;  %v2054_v28 = vsel %vm741_vm1, %v2040_v44, %v7701_v11  ;;  %v2359_v35 = vmul.f32 %v9618_v53, %v9671_v33  ;;  %v2510_v53 = vsel %vm741_vm1, %v9651_v21, %v7736_v17 }
 0x565   : > { %v1687_v42 = vsel %vm834_vm2, %v1673_v54, %v1675_v26 }
 0x566   : > { %v1711_v9 = vadd.f32 %v1687_v42, %v1619_v48  ;;  %v9673_v42 = vld [vmem:[#allocation5_spill] sm:$0xff] }
 0x567   : > { %v9674_v48 = vld [vmem:[#allocation81_spill] sm:$0xff] }
 0x568   : > { %1380 = vrot.lane.b32.xlu2 %v1346_v20, %s5446_s19 }
 0x56a   : > { %1382 = vrot.lane.b32.xlu0 %v1347_v49, %s5446_s19  ;;  %v2586_v18 = vpop.permute.xlu2 %2585 }
 0x56b   : > { %v1765_v46 = vpop.permute.xlu1 %1764  ;;  %v2597_v21 = vsel %vm834_vm2, %v9654_v22, %v2586_v18  ;;  %v9679_v22 = vld [vmem:[#allocation51_spill] sm:$0xff] }
 0x56c   : > { %v1778_v31 = vsel %vm927_vm3, %v9631_v14, %v1765_v46  ;;  %v1779_v55 = vsel %vm927_vm3, %v1765_v46, %v1767_v0  ;;  %v2412_v52 = vpop.permute.xlu0 %2411  ;;  %v1960_v14 = vsel %vm648_vm0, %v7703_v40, %v7681_v32  ;;  %v1890_v0 = vmul.f32 %v9454_v24, %v9623_v43  ;;  %v9676_v24 = vld [vmem:[#allocation41_spill] sm:$0xff] }
 0x56d   : > { %v1802_v30 = vadd.f32 %v1778_v31, %v1710_v27  ;;  %v1803_v10 = vadd.f32 %v1779_v55, %v1711_v9  ;;  %v1985_v41 = vadd.f32 %v1960_v14, %v1891_v56  ;;  %v2423_v40 = vsel %vm648_vm0, %v9642_v47, %v2412_v52  ;;  %v9678_v56 = vld [vmem:[#allocation26_spill] sm:$0xff] }
 0x56e   : > { %v1984_v15 = vadd.f32 %v1959_v8, %v1890_v0  ;;  %v2447_v60 = vadd.f32 %v2412_v52, %v2360_v58  ;;  %v2446_v51 = vadd.f32 %v2423_v40, %v2359_v35  ;;  %v585_v27 = vmul.f32 %v9674_v48, %v9673_v42  ;;  %v9677_v0 = vld [vmem:[#allocation46_spill] sm:$0xff]  ;;  %v9681_v40 = vld [vmem:[#allocation59_spill] sm:$0xff] }
 0x56f   : > { %1836 = vrot.lane.b32.xlu1 %v1802_v30, %s5447_s20  ;;  %v2079_v59 = vadd.f32 %v2054_v28, %v1985_v41  ;;  %v1986_v46 = vadd.f32 %v7681_v32, %v1892_v29  ;;  %v9686_v42 = vld [vmem:[#allocation7_spill] sm:$0xff] }
 0x570   : > { %1838 = vrot.lane.b32.xlu2 %v1803_v10, %s5447_s20  ;;  %v2078_v1 = vadd.f32 %v2053_v50, %v1984_v15  ;;  %v2534_v57 = vadd.f32 %v7736_v17, %v2447_v60  ;;  %v2533_v9 = vadd.f32 %v2510_v53, %v2446_v51  ;;  %v747_v50 = vsel %vm741_vm1, %v9678_v56, %v9677_v0  ;;  %v9685_v53 = vld [vmem:[#allocation15_spill] sm:$0xff] }
 0x571   : > { %v2080_v31 = vadd.f32 %v7701_v11, %v1986_v46  ;;  %v9691_v56 = vld [vmem:[#allocation27_spill] sm:$0xff] }
 0x572   : > { %v7763_v54 = vpop.permute.xlu2 %1374  ;;  %v2621_v17 = vadd.f32 %v2586_v18, %v2534_v57  ;;  %v2620_v30 = vadd.f32 %v2597_v21, %v2533_v9  ;;  %v9680_v18 = vld [vmem:[#allocation31_spill] sm:$0xff]  ;;  %v9687_v9 = vld [vmem:[#allocation6_spill] sm:$0xff] }
 0x573   : > { %v2136_v45 = vpop.permute.xlu1 %2135 }
 0x574   : > { %v2134_v36 = vpop.permute.xlu0 %2133  ;;  %v2174_v10 = vadd.f32 %v2136_v45, %v2080_v31  ;;  %v9689_v31 = vld [vmem:[#allocation42_spill] sm:$0xff] }
 0x575   : > { %v2147_v13 = vsel %vm834_vm2, %v9650_v38, %v2134_v36  ;;  %v2148_v26 = vsel %vm834_vm2, %v2134_v36, %v2136_v45 }
 0x576   : > { %v2172_v20 = vadd.f32 %v2147_v13, %v2078_v1  ;;  %v2173_v39 = vadd.f32 %v2148_v26, %v2079_v59  ;;  %v9682_v13 = vld [vmem:[#allocation36_spill] sm:$0xff]  ;;  %v9683_v1 = vld [vmem:[#allocation2_spill] sm:$0xff] }
 0x577   : > { %v933_v26 = vsel %vm927_vm3, %v9682_v13, %v9681_v40  ;;  %v586_v59 = vmul.f32 %v9674_v48, %v9683_v1 }
 0x57a   : > { %v7788_v12 = vpop.permute.xlu2 %1376 }
 0x57b   : > { %v2230_v44 = vpop.permute.xlu1 %2229 }
 0x57c   : > { %v2228_v2 = vpop.permute.xlu0 %2227  ;;  %v2268_v11 = vadd.f32 %v2230_v44, %v2174_v10 }
 0x57d   : > { %v2241_v47 = vsel %vm927_vm3, %v9653_v25, %v2228_v2  ;;  %v2242_v38 = vsel %vm927_vm3, %v2228_v2, %v2230_v44  ;;  %v9675_v25 = vld [vmem:[#allocation10_spill] sm:$0xff] }
 0x57e   : > { %v2266_v5 = vadd.f32 %v2241_v47, %v2172_v20  ;;  %v2267_v49 = vadd.f32 %v2242_v38, %v2173_v39  ;;  %v654_v3 = vsel %vm648_vm0, %v9676_v24, %v9675_v25  ;;  %v9684_v20 = vld [vmem:[#allocation23_spill] sm:$0xff] }
 0x57f   : > { %v678_v55 = vadd.f32 %v654_v3, %v585_v27  ;;  %v655_v39 = vsel %vm648_vm0, %v9675_v25, %v9684_v20  ;;  %v588_v25 = vmul.f32 %v9674_v48, %v9687_v9  ;;  %v9688_v3 = vld [vmem:[#allocation11_spill] sm:$0xff]  ;;  %v656_v21 = vsel %vm648_vm0, %v9684_v20, %v9689_v31 }
 0x580   : > { %2302 = vrot.lane.b32.xlu0 %v2266_v5, %s5448_s23  ;;  %2304 = vrot.lane.b32.xlu1 %v2267_v49, %s5448_s23  ;;  %v679_v47 = vadd.f32 %v655_v39, %v586_v59 }
 0x581   : > { %v771_v15 = vadd.f32 %v747_v50, %v678_v55  ;;  %v749_v50 = vsel %vm741_vm1, %v9685_v53, %v9691_v56 }
 0x582   : > { %v7812_v14 = vpop.permute.xlu2 %2296 }
 0x583   : > { %v1373_v52 = vpop.permute.xlu1 %1372 }
 0x584   : > { %v2673_v32 = vpop.permute.xlu0 %2672  ;;  %v1390_v35 = vsel %vm1384_vm4, %v9666_v23, %v1373_v52  ;;  %v748_v23 = vsel %vm741_vm1, %v9677_v0, %v9685_v53 }
 0x585   : > { %v2684_v36 = vsel %vm927_vm3, %v9661_v61, %v2673_v32  ;;  %v2708_v8 = vadd.f32 %v2673_v32, %v2621_v17  ;;  %v840_v61 = vsel %vm834_vm2, %v9680_v18, %v9679_v22  ;;  %v772_v27 = vadd.f32 %v748_v23, %v679_v47  ;;  %v9690_v17 = vld [vmem:[#allocation19_spill] sm:$0xff] }
 0x586   : > { %v2707_v28 = vadd.f32 %v2684_v36, %v2620_v30  ;;  %v864_v45 = vadd.f32 %v840_v61, %v771_v15  ;;  %v841_v55 = vsel %vm834_vm2, %v9679_v22, %v9690_v17  ;;  %v9693_v22 = vld [vmem:[#allocation63_spill] sm:$0xff]  ;;  %v1391_v61 = vsel %vm1384_vm4, %v1373_v52, %v7763_v54 }
 0x587   : > { %v865_v32 = vadd.f32 %v841_v55, %v772_v27  ;;  %v934_v18 = vsel %vm927_vm3, %v9681_v40, %v9693_v22 }
 0x588   : > { %2306 = vrot.lane.b32.xlu1 %v2268_v11, %s5448_s23  ;;  %2743 = vrot.lane.b32.xlu0 %v2708_v8, %s5449_s24  ;;  %v957_v60 = vadd.f32 %v933_v26, %v864_v45  ;;  %s9244_s23 = smov 46  }
 0x589   : > { %2741 = vrot.lane.b32.xlu2 %v2707_v28, %s5449_s24  ;;  %v9692_v28 = vld [vmem:[#allocation47_spill] sm:$0xff]  ;;  %v958_v13 = vadd.f32 %v934_v18, %v865_v32 }
 0x58a   : > { %v2734_v44 = vpop.permute.xlu2 %2733  ;;  %v1413_v2 = vadd.f32 %v1390_v35, %v957_v60  ;;  %v750_v15 = vsel %vm741_vm1, %v9691_v56, %v9692_v28  ;;  %v9694_v35 = vld [vmem:[#allocation32_spill] sm:$0xff] }
 0x58b   : > { %v7823_v41 = vpop.permute.xlu1 %1830  ;;  %v2751_v46 = vsel %vm2745_vm7, %v7659_v19, %v2734_v44  ;;  %v1414_v59 = vadd.f32 %v1391_v61, %v958_v13  ;;  %v842_v40 = vsel %vm834_vm2, %v9690_v17, %v9694_v35  ;;  %v9695_v60 = vld [vmem:[#allocation52_spill] sm:$0xff] }
 0x58c   : > { %v1829_v58 = vpop.permute.xlu0 %1828  ;;  %v843_v52 = vsel %vm834_vm2, %v9694_v35, %v9695_v60 }
 0x58d   : > { %v1846_v51 = vsel %vm1840_vm5, %v7451_v37, %v1829_v58  ;;  %v587_v37 = vmul.f32 %v9674_v48, %v9686_v42  ;;  %v1847_v1 = vsel %vm1840_vm5, %v1829_v58, %v7823_v41 }
 0x58e   : > { %v1869_v38 = vadd.f32 %v1846_v51, %v1413_v2  ;;  %v1870_v39 = vadd.f32 %v1847_v1, %v1414_v59 }
 0x58f   : > { %v680_v10 = vadd.f32 %v656_v21, %v587_v37  ;;  %v1392_v37 = vsel %vm1384_vm4, %v7763_v54, %v7788_v12 }
 0x591   : > { %v773_v45 = vadd.f32 %v749_v50, %v680_v10 }
 0x592   : > { %v7859_v30 = vpop.permute.xlu2 %2300 }
 0x593   : > { %v2295_v29 = vpop.permute.xlu1 %2294  ;;  %v866_v20 = vadd.f32 %v842_v40, %v773_v45 }
 0x594   : > { %v7837_v5 = vpop.permute.xlu0 %1378  ;;  %v2314_v49 = vsel %vm2308_vm6, %v7568_v6, %v2295_v29  ;;  %v657_v6 = vsel %vm648_vm0, %v9689_v31, %v9688_v3  ;;  %v2315_v51 = vsel %vm2308_vm6, %v2295_v29, %v7812_v14 }
 0x595   : > { %v2338_v57 = vadd.f32 %v2314_v49, %v1869_v38  ;;  %v681_v36 = vadd.f32 %v657_v6, %v588_v25  ;;  %v9696_v49 = vld [vmem:[#allocation37_spill] sm:$0xff]  ;;  %v2339_v53 = vadd.f32 %v2315_v51, %v1870_v39  ;;  %v1393_v29 = vsel %vm1384_vm4, %v7788_v12, %v7837_v5 }
 0x596   : > { %v935_v58 = vsel %vm927_vm3, %v9693_v22, %v9696_v49 }
 0x597   : > { %v2774_v24 = vadd.f32 %v2751_v46, %v2338_v57  ;;  %v774_v26 = vadd.f32 %v750_v15, %v681_v36  ;;  %v9697_v57 = vld [vmem:[#allocation60_spill] sm:$0xff]  ;;  %v959_v46 = vadd.f32 %v935_v58, %v866_v20 }
 0x598   : > { %v936_v42 = vsel %vm927_vm3, %v9696_v49, %v9697_v57 }
 0x599   : > { %v2792_v19 = vadd.f32 %v7657_v7, %v2774_v24  ;;  %v867_v2 = vadd.f32 %v843_v52, %v774_v26  ;;  %v1415_v6 = vadd.f32 %v1392_v37, %v959_v46 }
 0x59a   : > { %v2823_v47 = vpop.permute.xlu2 %2822 }
 0x59b   : > { %v7862_v8 = vpop.permute.xlu1 %1834  ;;  %v7864_v0 = vmax.f32 %v2792_v19, 0.0  ;;  %v960_v9 = vadd.f32 %v936_v42, %v867_v2 }
 0x59c   : > { %v1833_v11 = vpop.permute.xlu0 %1832 }
 0x59d   : > { %2887 = vrot.lane.b32.xlu1 %v7864_v0, %s5446_s19  ;;  %2832 = vrot.lane.b32.xlu2 %v7864_v0, %s5420_s30  ;;  %v1848_v24 = vsel %vm1840_vm5, %v7823_v41, %v1833_v11  ;;  %v1849_v31 = vsel %vm1840_vm5, %v1833_v11, %v7862_v8  ;;  %v1416_v21 = vadd.f32 %v1393_v29, %v960_v9 }
 0x59f   : > { %v1872_v55 = vadd.f32 %v1849_v31, %v1416_v21 }
 0x5a2   : > { %v2829_v56 = vpop.permute.xlu2 %2828 }
 0x5a3   : > { %v2299_v38 = vpop.permute.xlu1 %2298 }
 0x5a4   : > { %v2736_v23 = vpop.permute.xlu0 %2735  ;;  %v2316_v54 = vsel %vm2308_vm6, %v7812_v14, %v2299_v38  ;;  %v2317_v12 = vsel %vm2308_vm6, %v2299_v38, %v7859_v30 }
 0x5a5   : > { %v2752_v27 = vsel %vm2745_vm7, %v2734_v44, %v2736_v23  ;;  %v1871_v44 = vadd.f32 %v1848_v24, %v1415_v6  ;;  %v2341_v32 = vadd.f32 %v2317_v12, %v1872_v55 }
 0x5a6   : > { %v2775_v25 = vadd.f32 %v2752_v27, %v2339_v53 }
 0x5a7   : > { %v2340_v41 = vadd.f32 %v2316_v54, %v1871_v44 }
 0x5a8   : > { %v2793_v17 = vadd.f32 %v7657_v7, %v2775_v25 }
 0x5aa   : > { %v7913_v19 = vmax.f32 %v2793_v17, 0.0  ;;  %v2880_v1 = vpop.permute.xlu2 %2879 }
 0x5ab   : > { %v7915_v10 = vpop.permute.xlu1 %2739 }
 0x5ac   : > { %v2738_v36 = vpop.permute.xlu0 %2737  ;;  %2834 = vrot.lane.b32.xlu0 %v7913_v19, %s5420_s30  ;;  %2889 = vrot.lane.b32.xlu2 %v7913_v19, %s5446_s19 }
 0x5ad   : > { %v2753_v14 = vsel %vm2745_vm7, %v2736_v23, %v2738_v36  ;;  %v2754_v50 = vsel %vm2745_vm7, %v2738_v36, %v7915_v10 }
 0x5ae   : > { %v2776_v11 = vadd.f32 %v2753_v14, %v2340_v41  ;;  %v2777_v15 = vadd.f32 %v2754_v50, %v2341_v32 }
 0x5b0   : > { %v2794_v22 = vadd.f32 %v7657_v7, %v2776_v11  ;;  %v2795_v18 = vadd.f32 %v7657_v7, %v2777_v15 }
 0x5b2   : > { %v7926_v61 = vmax.f32 %v2794_v22, 0.0  ;;  %v7928_v45 = vmax.f32 %v2795_v18, 0.0  ;;  %v7944_v40 = vpop.permute.xlu2 %2885 }
 0x5b3   : > { %v2827_v13 = vpop.permute.xlu1 %2826 }
 0x5b4   : > { %v2825_v26 = vpop.permute.xlu0 %2824  ;;  %2836 = vrot.lane.b32.xlu0 %v7926_v61, %s5420_s30  ;;  %2944 = vrot.lane.b32.xlu2 %v7864_v0, %s5450_s27  ;;  %v2846_v25 = vsel %vm648_vm0, %v2827_v13, %v2829_v56 }
 0x5b5   : > { %2838 = vrot.lane.b32.xlu1 %v7928_v45, %s5420_s30  ;;  %v2845_v20 = vsel %vm648_vm0, %v2825_v26, %v2827_v13  ;;  %v2844_v39 = vsel %vm648_vm0, %v2823_v47, %v2825_v26  ;;  %v2867_v21 = vadd.f32 %v2846_v25, %v7669_v63  ;;  %v9698_v13 = vld [vmem:[#allocation3_spill] sm:$0xff]  ;;  %v9704_v25 = vld [vmem:[#allocation64_spill] sm:$0xff] }
 0x5b6   : > { %v2866_v38 = vadd.f32 %v2845_v20, %v7671_v16  ;;  %v2865_v58 = vadd.f32 %v2844_v39, %v7673_v62  ;;  %v589_v26 = vmul.f32 %v9674_v48, %v9698_v13 }
 0x5ba   : > { %v2939_v53 = vpop.permute.xlu2 %2938 }
 0x5bb   : > { %v2878_v59 = vpop.permute.xlu1 %2877 }
 0x5bc   : > { %v7936_v35 = vpop.permute.xlu0 %2830  ;;  %2946 = vrot.lane.b32.xlu0 %v7913_v19, %s5450_s27  ;;  %2893 = vrot.lane.b32.xlu2 %v7928_v45, %s5446_s19  ;;  %v2901_v49 = vsel %vm1384_vm4, %v2878_v59, %v2880_v1 }
 0x5bd   : > { %2891 = vrot.lane.b32.xlu1 %v7926_v61, %s5446_s19  ;;  %v2923_v37 = vadd.f32 %v2901_v49, %v2865_v58  ;;  %v2847_v16 = vsel %vm648_vm0, %v2829_v56, %v7936_v35 }
 0x5be   : > { %v2868_v17 = vadd.f32 %v2847_v16, %v7685_v4  ;;  %v937_v16 = vsel %vm927_vm3, %v9697_v57, %v9704_v25  ;;  %v9706_v57 = vld [vmem:[#allocation38_spill] sm:$0xff] }
 0x5c3   : > { %v2884_v52 = vpop.permute.xlu1 %2883 }
 0x5c4   : > { %v2882_v51 = vpop.permute.xlu0 %2881  ;;  %2948 = vrot.lane.b32.xlu0 %v7926_v61, %s5450_s27  ;;  %v2904_v6 = vsel %vm1384_vm4, %v2884_v52, %v7944_v40 }
 0x5c5   : > { %2950 = vrot.lane.b32.xlu1 %v7928_v45, %s5450_s27  ;;  %v2902_v2 = vsel %vm1384_vm4, %v2880_v1, %v2882_v51  ;;  %v2903_v62 = vsel %vm1384_vm4, %v2882_v51, %v2884_v52  ;;  %v2926_v55 = vadd.f32 %v2904_v6, %v2868_v17  ;;  %v1381_v52 = vpop.permute.xlu2 %1380  ;;  %v9699_v51 = vld [vmem:[#allocation24_spill] sm:$0xff] }
 0x5c6   : > { %v2924_v23 = vadd.f32 %v2902_v2, %v2866_v38  ;;  %v2925_v44 = vadd.f32 %v2903_v62, %v2867_v21  ;;  %v658_v20 = vsel %vm648_vm0, %v9688_v3, %v9699_v51  ;;  %v590_v2 = vmul.f32 %v9674_v48, %v9623_v43  ;;  %v9700_v38 = vld [vmem:[#allocation16_spill] sm:$0xff]  ;;  %v9702_v3 = vld [vmem:[#allocation21_spill] sm:$0xff] }
 0x5c7   : > { %v682_v39 = vadd.f32 %v658_v20, %v589_v26  ;;  %v751_v49 = vsel %vm741_vm1, %v9692_v28, %v9700_v38  ;;  %v844_v43 = vsel %vm834_vm2, %v9695_v60, %v9702_v3 }
 0x5c9   : > { %v775_v58 = vadd.f32 %v751_v49, %v682_v39  ;;  %v9708_v39 = vld [vmem:[#allocation48_spill] sm:$0xff] }
 0x5cb   : > { %v2937_v42 = vpop.permute.xlu1 %2936  ;;  %v868_v28 = vadd.f32 %v844_v43, %v775_v58 }
 0x5cc   : > { %v2935_v29 = vpop.permute.xlu0 %2934  ;;  %v2960_v27 = vsel %vm2958_vm8, %v2937_v42, %v2939_v53 }
 0x5cd   : > { %v2959_v46 = vsel %vm2958_vm8, %v2935_v29, %v2937_v42  ;;  %v2982_v9 = vadd.f32 %v2960_v27, %v2924_v23  ;;  %v9703_v27 = vld [vmem:[#allocation28_spill] sm:$0xff]  ;;  %v961_v60 = vadd.f32 %v937_v16, %v868_v28  ;;  %v9710_v28 = vld [vmem:[#allocation61_spill] sm:$0xff] }
 0x5ce   : > { %v2981_v47 = vadd.f32 %v2959_v46, %v2923_v37  ;;  %v1839_v37 = vpop.permute.xlu2 %1838  ;;  %v752_v46 = vsel %vm741_vm1, %v9700_v38, %v9703_v27 }
 0x5cf   : > { %v2993_v24 = vmul.f32 0.25, %v2982_v9 }
 0x5d0   : > { %v2992_v31 = vmul.f32 0.25, %v2981_v47 }
 0x5d2   : > { %v7966_v54 = vpack.c.bf16 %v2993_v24, %v2992_v31  ;;  %v1394_v24 = vsel %vm1384_vm4, %v7837_v5, %v1381_v52  ;;  %v9705_v31 = vld [vmem:[#allocation33_spill] sm:$0xff]  ;;  %v938_v5 = vsel %vm927_vm3, %v9704_v25, %v9706_v57 }
 0x5d3   : > { %v7968_v12 = vpop.permute.xlu1 %2942  ;;  %v845_v62 = vsel %vm834_vm2, %v9702_v3, %v9705_v31  ;;  %v1417_v21 = vadd.f32 %v1394_v24, %v961_v60 }
 0x5d4   : > { %v3015_v41 = vunpack.c.h.b16 %v7966_v54  ;;  %v2941_v32 = vpop.permute.xlu0 %2940 }
 0x5d5   : > { %v2961_v36 = vsel %vm2958_vm8, %v2939_v53, %v2941_v32  ;;  %v2962_v56 = vsel %vm2958_vm8, %v2941_v32, %v7968_v12  ;;  %v9701_v53 = vld [vmem:[#allocation43_spill] sm:$0xff] }
 0x5d6   : > { %v7974_v14 = vpack.c.b16 %v3015_v41, %v3015_v41  ;;  %v2983_v50 = vadd.f32 %v2961_v36, %v2925_v44  ;;  %v2984_v63 = vadd.f32 %v2962_v56, %v2926_v55  ;;  %v659_v23 = vsel %vm648_vm0, %v9699_v51, %v9701_v53 }
 0x5d7   : > { %v683_v42 = vadd.f32 %v659_v23, %v590_v2  ;;  %v9709_v23 = vld [vmem:[#allocation54_spill] sm:$0xff] }
 0x5d8   : > { %v2994_v11 = vmul.f32 0.25, %v2983_v50  ;;  %v2995_v4 = vmul.f32 0.25, %v2984_v63  ;;  %3256 = vrot.lane.b32.xlu2 %v7974_v14, %s5451_s28 }
 0x5d9   : > { %v776_v9 = vadd.f32 %v752_v46, %v683_v42  ;;  %v846_v42 = vsel %vm834_vm2, %v9705_v31, %v9709_v23  ;;  %v3014_v46 = vunpack.c.l.b16 %v7966_v54  ;;  %vm4719_vm2 = vcmask 1040384  }
 0x5da   : > { %v3004_v15 = vpack.c.bf16 %v2995_v4, %v2994_v11 }
 0x5db   : > { %v869_v17 = vadd.f32 %v845_v62, %v776_v9  ;;  %v8065_v24 = vpack.c.b16 %v3014_v46, %v3014_v46 }
 0x5dc   : > { %v3016_v22 = vunpack.c.l.b16 %v3004_v15  ;;  %v3017_v18 = vunpack.c.h.b16 %v3004_v15  ;;  %v1383_v29 = vpop.permute.xlu0 %1382 }
 0x5dd   : > { %v1395_v32 = vsel %vm1384_vm4, %v1381_v52, %v1383_v29  ;;  %v962_v56 = vadd.f32 %v938_v5, %v869_v17 }
 0x5de   : > { %v7980_v1 = vpack.c.b16 %v3016_v22, %v3016_v22  ;;  %v7982_v59 = vpack.c.b16 %v3017_v18, %v3017_v18  ;;  %v9707_v18 = vld [vmem:[#allocation12_spill] sm:$0xff] }
 0x5df   : > { %v1418_v15 = vadd.f32 %v1395_v32, %v962_v56  ;;  %v660_v13 = vsel %vm648_vm0, %v9701_v53, %v9707_v18 }
 0x5e0   : > { %3260 = vrot.lane.b32.xlu1 %v7982_v59, %s5451_s28  ;;  %3258 = vrot.lane.b32.xlu0 %v7980_v1, %s5451_s28 }
 0x5e1   : > { %3196 = vrot.lane.b32.xlu2 %v7974_v14, %s5449_s24  ;;  %v1837_v47 = vpop.permute.xlu1 %1836 }
 0x5e2   : > { %v1850_v6 = vsel %vm1840_vm5, %v7862_v8, %v1837_v47  ;;  %v591_v8 = vmul.f32 %v9674_v48, %v9671_v33  ;;  %v1851_v11 = vsel %vm1840_vm5, %v1837_v47, %v1839_v37 }
 0x5e3   : > { %v1873_v44 = vadd.f32 %v1850_v6, %v1417_v21  ;;  %v2742_v55 = vpop.permute.xlu2 %2741  ;;  %v1874_v52 = vadd.f32 %v1851_v11, %v1418_v15 }
 0x5e4   : > { %v2755_v4 = vsel %vm2745_vm7, %v7915_v10, %v2742_v55  ;;  %v753_v10 = vsel %vm741_vm1, %v9703_v27, %v9708_v39  ;;  %v939_v27 = vsel %vm927_vm3, %v9706_v57, %v9710_v28 }
 0x5e8   : > { %3198 = vrot.lane.b32.xlu0 %v7980_v1, %s5449_s24  ;;  %3226 = vrot.lane.b32.xlu1 %v7974_v14, %s5452_s29 }
 0x5e9   : > { %3228 = vrot.lane.b32.xlu2 %v7980_v1, %s5452_s29 }
 0x5f1   : > { %3200 = vrot.lane.b32.xlu2 %v7982_v59, %s5449_s24 }
 0x5f2   : > { %v2303_v41 = vpop.permute.xlu0 %2302  ;;  %v2305_v63 = vpop.permute.xlu1 %2304 }
 0x5f3   : > { %v2318_v36 = vsel %vm2308_vm6, %v7859_v30, %v2303_v41  ;;  %v2319_v26 = vsel %vm2308_vm6, %v2303_v41, %v2305_v63  ;;  %v684_v30 = vadd.f32 %v660_v13, %v591_v8 }
 0x5f4   : > { %v2342_v50 = vadd.f32 %v2318_v36, %v1873_v44  ;;  %v2343_v51 = vadd.f32 %v2319_v26, %v1874_v52 }
 0x5f5   : > { %v777_v38 = vadd.f32 %v753_v10, %v684_v30 }
 0x5f6   : > { %v2778_v22 = vadd.f32 %v2755_v4, %v2342_v50 }
 0x5f7   : > { %v2833_v58 = vpop.permute.xlu2 %2832  ;;  %v870_v3 = vadd.f32 %v846_v42, %v777_v38 }
 0x5f8   : > { %v2796_v33 = vadd.f32 %v7657_v7, %v2778_v22  ;;  %v2848_v54 = vsel %vm648_vm0, %v7936_v35, %v2833_v58 }
 0x5f9   : > { %v963_v9 = vadd.f32 %v939_v27, %v870_v3 }
 0x5fa   : > { %v8041_v48 = vmax.f32 %v2796_v33, 0.0  ;;  %v2744_v20 = vpop.permute.xlu0 %2743  ;;  %v2307_v25 = vpop.permute.xlu1 %2306 }
 0x5fb   : > { %v2756_v2 = vsel %vm2745_vm7, %v2742_v55, %v2744_v20  ;;  %v1419_v47 = vadd.f32 %v1383_v29, %v963_v9  ;;  %v2320_v60 = vsel %vm2308_vm6, %v2305_v63, %v2307_v25  ;;  %v2869_v29 = vadd.f32 %v2848_v54, %v7687_v34 }
 0x5fc   : > { %v2779_v49 = vadd.f32 %v2756_v2, %v2343_v51  ;;  %2840 = vrot.lane.b32.xlu0 %v8041_v48, %s5420_s30  ;;  %vm4775_vm6 = vcmask 654336  }
 0x5fd   : > { %v1875_v31 = vadd.f32 %v1839_v37, %v1419_v47 }
 0x5fe   : > { %v2797_v53 = vadd.f32 %v7657_v7, %v2779_v49 }
 0x5ff   : > { %v2344_v62 = vadd.f32 %v2320_v60, %v1875_v31 }
 0x600   : > { %v8053_v43 = vmax.f32 %v2797_v53, 0.0 }
 0x601   : > { %v2780_v37 = vadd.f32 %v2744_v20, %v2344_v62 }
 0x602   : > { %2897 = vrot.lane.b32.xlu2 %v8053_v43, %s5446_s19  ;;  %2842 = vrot.lane.b32.xlu1 %v8053_v43, %s5420_s30 }
 0x603   : > { %v2798_v41 = vadd.f32 %v7657_v7, %v2780_v37 }
 0x604   : > { %3230 = vrot.lane.b32.xlu0 %v7982_v59, %s5452_s29 }
 0x605   : > { %v2810_v34 = vmax.f32 %v2798_v41, 0.0 }
 0x606   : > { %v2890_v16 = vpop.permute.xlu2 %2889 }
 0x60a   : > { %3163 = vrot.lane.b32.xlu2 %v8065_v24, %s5453_s17  ;;  %2895 = vrot.lane.b32.xlu1 %v8041_v48, %s5446_s19 }
 0x60c   : > { %3130 = vrot.lane.b32.xlu0 %v8065_v24, %s9244_s23 }
 0x60e   : > { %v2945_v6 = vpop.permute.xlu2 %2944 }
 0x60f   : > { %v2888_v21 = vpop.permute.xlu1 %2887  ;;  %v2963_v55 = vsel %vm2958_vm8, %v7968_v12, %v2945_v6 }
 0x610   : > { %v2905_v17 = vsel %vm1384_vm4, %v7944_v40, %v2888_v21  ;;  %v2906_v32 = vsel %vm1384_vm4, %v2888_v21, %v2890_v16 }
 0x611   : > { %v2927_v44 = vadd.f32 %v2905_v17, %v2869_v29 }
 0x612   : > { %2954 = vrot.lane.b32.xlu2 %v8053_v43, %s5450_s27  ;;  %3132 = vrot.lane.b32.xlu1 %v7974_v14, %s9244_s23 }
 0x613   : > { %v2985_v35 = vadd.f32 %v2963_v55, %v2927_v44 }
 0x614   : > { %3165 = vrot.lane.b32.xlu0 %v7974_v14, %s5453_s17 }
 0x615   : > { %v2996_v4 = vmul.f32 0.25, %v2985_v35 }
 0x616   : > { %v8110_v36 = vpop.permute.xlu2 %2893 }
 0x61a   : > { %2899 = vrot.lane.b32.xlu2 %v2810_v34, %s5446_s19  ;;  %2952 = vrot.lane.b32.xlu1 %v8041_v48, %s5450_s27  ;;  %s5458_s19 = smov 110  }
 0x61c   : > { %3134 = vrot.lane.b32.xlu0 %v7980_v1, %s9244_s23 }
 0x61e   : > { %v2835_v40 = vpop.permute.xlu0 %2834 }
 0x61f   : > { %v2849_v12 = vsel %vm648_vm0, %v2833_v58, %v2835_v40 }
 0x620   : > { %v2870_v5 = vadd.f32 %v2849_v12, %v7864_v0 }
 0x622   : > { %3097 = vrot.lane.b32.xlu2 %v8065_v24, %s5447_s20  ;;  %3167 = vrot.lane.b32.xlu1 %v7980_v1, %s5453_s17  ;;  %v2928_v56 = vadd.f32 %v2906_v32, %v2870_v5 }
 0x624   : > { %3064 = vrot.lane.b32.xlu0 %v8065_v24, %s5424_s18 }
 0x626   : > { %v2837_v7 = vpop.permute.xlu0 %2836 }
 0x627   : > { %v8100_v57 = vpop.permute.xlu1 %2838  ;;  %v2850_v0 = vsel %vm648_vm0, %v2835_v40, %v2837_v7 }
 0x628   : > { %v2851_v15 = vsel %vm648_vm0, %v2837_v7, %v8100_v57  ;;  %v2871_v13 = vadd.f32 %v2850_v0, %v7913_v19 }
 0x629   : > { %v2872_v52 = vadd.f32 %v2851_v15, %v7926_v61 }
 0x62a   : > { %3068 = vrot.lane.b32.xlu2 %v7980_v1, %s5424_s18  ;;  %3066 = vrot.lane.b32.xlu1 %v7974_v14, %s5424_s18 }
 0x62c   : > { %3099 = vrot.lane.b32.xlu0 %v7974_v14, %s5447_s20 }
 0x62e   : > { %v2947_v8 = vpop.permute.xlu0 %2946 }
 0x62f   : > { %v2964_v50 = vsel %vm2958_vm8, %v2945_v6, %v2947_v8  ;;  %v2892_v63 = vpop.permute.xlu1 %2891 }
 0x630   : > { %v2986_v11 = vadd.f32 %v2964_v50, %v2928_v56  ;;  %v2907_v18 = vsel %vm1384_vm4, %v2890_v16, %v2892_v63  ;;  %v2908_v30 = vsel %vm1384_vm4, %v2892_v63, %v8110_v36 }
 0x631   : > { %v2929_v51 = vadd.f32 %v2907_v18, %v2871_v13  ;;  %v2930_v10 = vadd.f32 %v2908_v30, %v2872_v52 }
 0x632   : > { %v2997_v22 = vmul.f32 0.25, %v2986_v11  ;;  %3036 = vrot.lane.b32.xlu2 %v7974_v14, %s5421_s0  ;;  %2956 = vrot.lane.b32.xlu1 %v2810_v34, %s5450_s27  ;;  %v3257_v20 = vpop.permute.xlu2 %3256 }
 0x634   : > { %v3005_v26 = vpack.c.bf16 %v2997_v22, %v2996_v4  ;;  %3101 = vrot.lane.b32.xlu0 %v7980_v1, %s5447_s20 }
 0x636   : > { %v3019_v33 = vunpack.c.h.b16 %v3005_v26  ;;  %v2949_v39 = vpop.permute.xlu0 %2948  ;;  %v3018_v42 = vunpack.c.l.b16 %v3005_v26 }
 0x637   : > { %v2965_v2 = vsel %vm2958_vm8, %v2947_v8, %v2949_v39  ;;  %v8127_v38 = vpop.permute.xlu1 %2950 }
 0x638   : > { %v8129_v49 = vpack.c.b16 %v3019_v33, %v3019_v33  ;;  %v2987_v19 = vadd.f32 %v2965_v2, %v2929_v51  ;;  %v2966_v58 = vsel %vm2958_vm8, %v2949_v39, %v8127_v38  ;;  %v8139_v27 = vpack.c.b16 %v3018_v42, %v3018_v42 }
 0x639   : > { %v2988_v53 = vadd.f32 %v2966_v58, %v2930_v10 }
 0x63a   : > { %v2998_v23 = vmul.f32 0.25, %v2987_v19  ;;  %3034 = vrot.lane.b32.xlu1 %v8065_v24, %s5421_s0  ;;  %3264 = vrot.lane.b32.xlu2 %v8129_v49, %s5451_s28 }
 0x63b   : > { %v2999_v61 = vmul.f32 0.25, %v2988_v53  ;;  %v3197_v46 = vpop.permute.xlu2 %3196 }
 0x63c   : > { %3038 = vrot.lane.b32.xlu0 %v7980_v1, %s5421_s0 }
 0x63d   : > { %v3006_v3 = vpack.c.bf16 %v2999_v61, %v2998_v23 }
 0x63f   : > { %v3020_v28 = vunpack.c.l.b16 %v3006_v3  ;;  %v3021_v47 = vunpack.c.h.b16 %v3006_v3 }
 0x641   : > { %v8141_v9 = vpack.c.b16 %v3020_v28, %v3020_v28  ;;  %v8149_v25 = vpack.c.b16 %v3021_v47, %v3021_v47 }
 0x642   : > { %3262 = vrot.lane.b32.xlu1 %v8139_v27, %s5451_s28 }
 0x643   : > { %3266 = vrot.lane.b32.xlu2 %v8141_v9, %s5451_s28  ;;  %v3229_v16 = vpop.permute.xlu2 %3228 }
 0x644   : > { %3202 = vrot.lane.b32.xlu0 %v8139_v27, %s5449_s24 }
 0x64a   : > { %3232 = vrot.lane.b32.xlu1 %v8139_v27, %s5452_s29 }
 0x64b   : > { %3268 = vrot.lane.b32.xlu2 %v8149_v25, %s5451_s28  ;;  %v8166_v29 = vpop.permute.xlu2 %3200 }
 0x64c   : > { %3204 = vrot.lane.b32.xlu0 %v8129_v49, %s5449_s24 }
 0x652   : > { %v8157_v60 = vpop.permute.xlu1 %3260  ;;  %v3259_v31 = vpop.permute.xlu0 %3258  ;;  %3234 = vrot.lane.b32.xlu1 %v8129_v49, %s5452_s29 }
 0x653   : > { %3206 = vrot.lane.b32.xlu2 %v8141_v9, %s5449_s24  ;;  %v3277_v54 = vsel %vm3276_vm9, %v3257_v20, %v3259_v31  ;;  %v3278_v62 = vsel %vm3276_vm9, %v3259_v31, %v8157_v60 }
 0x654   : > { %3136 = vrot.lane.b32.xlu0 %v7982_v59, %s9244_s23  ;;  %v3484_v6 = vsel %vm3286_vm10, %v3277_v54, 0  ;;  %v3487_v21 = vsel %vm3286_vm10, %v3278_v62, 0 }
 0x655   : > { %3516 = vmatpush.bf16.msra.mxu0 %v3484_v6  ;;  %3534 = vmatpush.bf16.msra.mxu1 %v3487_v21 }
 0x65a   : > { %v3199_v37 = vpop.permute.xlu0 %3198  ;;  %v3227_v17 = vpop.permute.xlu1 %3226  ;;  %3169 = vrot.lane.b32.xlu1 %v7982_v59, %s5453_s17 }
 0x65b   : > { %v3217_v44 = vsel %vm2745_vm7, %v3197_v46, %v3199_v37  ;;  %v3247_v55 = vsel %vm3246_vm11, %v3227_v17, %v3229_v16  ;;  %3171 = vrot.lane.b32.xlu2 %v8139_v27, %s5453_s17  ;;  %v3218_v8 = vsel %vm2745_vm7, %v3199_v37, %v8166_v29 }
 0x65c   : > { %3236 = vrot.lane.b32.xlu0 %v8141_v9, %s5452_s29  ;;  %v8180_v35 = vpop.permute.xlu2 %2897  ;;  %v3409_v41 = vsel %vm3286_vm10, %v3217_v44, %v3247_v55 }
 0x65d   : > { %3517 = vmatpush.bf16.msra.mxu0 %v3409_v41 }
 0x662   : > { %3138 = vrot.lane.b32.xlu1 %v8139_v27, %s9244_s23 }
 0x663   : > { %3070 = vrot.lane.b32.xlu2 %v7982_v59, %s5424_s18 }
 0x664   : > { %3208 = vrot.lane.b32.xlu0 %v8149_v25, %s5449_s24  ;;  %v3164_v34 = vpop.permute.xlu2 %3163 }
 0x66a   : > { %3238 = vrot.lane.b32.xlu1 %v8149_v25, %s5452_s29 }
 0x66b   : > { %3173 = vrot.lane.b32.xlu2 %v8129_v49, %s5453_s17 }
 0x66c   : > { %3103 = vrot.lane.b32.xlu0 %v7982_v59, %s5447_s20  ;;  %v8195_v40 = vpop.permute.xlu2 %2954 }
 0x66e   : > { %v2841_v7 = vpop.permute.xlu0 %2840 }
 0x66f   : > { %v2852_v18 = vsel %vm648_vm0, %v8100_v57, %v2841_v7 }
 0x670   : > { %v2873_v20 = vadd.f32 %v2852_v18, %v7928_v45 }
 0x672   : > { %3140 = vrot.lane.b32.xlu1 %v8129_v49, %s9244_s23 }
 0x673   : > { %3142 = vrot.lane.b32.xlu2 %v8141_v9, %s9244_s23 }
 0x674   : > { %v8201_v12 = vpop.permute.xlu1 %2842  ;;  %3072 = vrot.lane.b32.xlu0 %v8139_v27, %s5424_s18  ;;  %v8205_v5 = vpop.permute.xlu2 %2899 }
 0x675   : > { %v2853_v13 = vsel %vm648_vm0, %v2841_v7, %v8201_v12  ;;  %v2875_v55 = vadd.f32 %v8201_v12, %v8053_v43  ;;  %vm4366_vm0 = vcmask 1047552  }
 0x676   : > { %v8207_v32 = vpop.permute.xlu0 %3230  ;;  %v2874_v57 = vadd.f32 %v2853_v13, %v8041_v48 }
 0x677   : > { %v3248_v56 = vsel %vm3246_vm11, %v3229_v16, %v8207_v32 }
 0x678   : > { %v3413_v50 = vsel %vm3286_vm10, %v3218_v8, %v3248_v56 }
 0x679   : > { %3535 = vmatpush.bf16.msra.mxu1 %v3413_v50 }
 0x67a   : > { %3105 = vrot.lane.b32.xlu1 %v8139_v27, %s5447_s20 }
 0x67b   : > { %3074 = vrot.lane.b32.xlu2 %v8129_v49, %s5424_s18 }
 0x67c   : > { %v2896_v63 = vpop.permute.xlu1 %2895  ;;  %3175 = vrot.lane.b32.xlu0 %v8141_v9, %s5453_s17  ;;  %v3098_v11 = vpop.permute.xlu2 %3097 }
 0x67d   : > { %v2909_v33 = vsel %vm1384_vm4, %v8110_v36, %v2896_v63  ;;  %v2910_v51 = vsel %vm1384_vm4, %v2896_v63, %v8180_v35 }
 0x67e   : > { %v3131_v0 = vpop.permute.xlu0 %3130  ;;  %v2931_v39 = vadd.f32 %v2909_v33, %v2873_v20  ;;  %v2932_v10 = vadd.f32 %v2910_v51, %v2874_v57 }
 0x682   : > { %3040 = vrot.lane.b32.xlu1 %v7982_v59, %s5421_s0 }
 0x683   : > { %3076 = vrot.lane.b32.xlu2 %v8141_v9, %s5424_s18 }
 0x684   : > { %v3133_v4 = vpop.permute.xlu1 %3132  ;;  %3107 = vrot.lane.b32.xlu0 %v8129_v49, %s5447_s20  ;;  %v8226_v15 = vpop.permute.xlu2 %3068 }
 0x685   : > { %v3153_v26 = vsel %vm3152_vm12, %v3131_v0, %v3133_v4 }
 0x686   : > { %v3166_v22 = vpop.permute.xlu0 %3165 }
 0x687   : > { %v3186_v30 = vsel %vm3185_vm13, %v3164_v34, %v3166_v22  ;;  %v2911_v34 = vsel %vm1384_vm4, %v8180_v35, %v8205_v5 }
 0x688   : > { %v3369_v52 = vsel %vm3286_vm10, %v3153_v26, %v3186_v30  ;;  %v2933_v8 = vadd.f32 %v2911_v34, %v2875_v55 }
 0x689   : > { %3518 = vmatpush.bf16.msra.mxu0 %v3369_v52 }
 0x68a   : > { %3042 = vrot.lane.b32.xlu1 %v8139_v27, %s5421_s0 }
 0x68b   : > { %3046 = vrot.lane.b32.xlu2 %v8141_v9, %s5421_s0 }
 0x68c   : > { %v2953_v2 = vpop.permute.xlu1 %2952  ;;  %3109 = vrot.lane.b32.xlu0 %v8141_v9, %s5447_s20  ;;  %v3037_v58 = vpop.permute.xlu2 %3036 }
 0x68d   : > { %v2967_v36 = vsel %vm2958_vm8, %v8127_v38, %v2953_v2  ;;  %v2968_v45 = vsel %vm2958_vm8, %v2953_v2, %v8195_v40 }
 0x68e   : > { %v2989_v19 = vadd.f32 %v2967_v36, %v2931_v39  ;;  %v2990_v48 = vadd.f32 %v2968_v45, %v2932_v10  ;;  %v8251_v53 = vpop.permute.xlu0 %3134  ;;  %v8327_v36 = vld [vmem:[%s9009_s5] sm:$0xff] }
 0x68f   : > { %v3154_v38 = vsel %vm3152_vm12, %v3133_v4, %v8251_v53 }
 0x690   : > { %v3000_v23 = vmul.f32 0.25, %v2989_v19  ;;  %v3001_v61 = vmul.f32 0.25, %v2990_v48 }
 0x692   : > { %v3007_v42 = vpack.c.bf16 %v3001_v61, %v3000_v23  ;;  %3044 = vrot.lane.b32.xlu1 %v8129_v49, %s5421_s0 }
 0x694   : > { %v3022_v3 = vunpack.c.l.b16 %v3007_v42  ;;  %v3023_v28 = vunpack.c.h.b16 %v3007_v42  ;;  %v8255_v46 = vpop.permute.xlu1 %3167  ;;  %v3265_v6 = vpop.permute.xlu2 %3264 }
 0x695   : > { %v3187_v47 = vsel %vm3185_vm13, %v3166_v22, %v8255_v46 }
 0x696   : > { %v8261_v16 = vpack.c.b16 %v3022_v3, %v3022_v3  ;;  %v3065_v31 = vpop.permute.xlu0 %3064  ;;  %v3373_v54 = vsel %vm3286_vm10, %v3154_v38, %v3187_v47  ;;  %v8264_v62 = vpack.c.b16 %v3023_v28, %v3023_v28 }
 0x697   : > { %3536 = vmatpush.bf16.msra.mxu1 %v3373_v54 }
 0x698   : > { %3210 = vrot.lane.b32.xlu2 %v8261_v16, %s5449_s24  ;;  %3270 = vrot.lane.b32.xlu0 %v8261_v16, %s5451_s28 }
 0x69a   : > { %3272 = vrot.lane.b32.xlu1 %v8264_v62, %s5451_s28 }
 0x69c   : > { %v3067_v21 = vpop.permute.xlu1 %3066 }
 0x69d   : > { %v3085_v17 = vsel %vm927_vm3, %v3065_v31, %v3067_v21  ;;  %v3267_v7 = vpop.permute.xlu2 %3266  ;;  %v3086_v63 = vsel %vm927_vm3, %v3067_v21, %v8226_v15 }
 0x69e   : > { %v3100_v37 = vpop.permute.xlu0 %3099  ;;  %v3281_v13 = vsel %vm3276_vm9, %v3265_v6, %v3267_v7 }
 0x69f   : > { %v3120_v44 = vsel %vm1840_vm5, %v3098_v11, %v3100_v37  ;;  %v3496_v20 = vsel %vm3286_vm10, %v3281_v13, 0 }
 0x6a0   : > { %3212 = vrot.lane.b32.xlu2 %v8264_v62, %s5449_s24  ;;  %3240 = vrot.lane.b32.xlu0 %v8261_v16, %s5452_s29  ;;  %v3329_v41 = vsel %vm3286_vm10, %v3085_v17, %v3120_v44 }
 0x6a1   : > { %3519 = vmatpush.bf16.msra.mxu0 %v3329_v41 }
 0x6a4   : > { %v2957_v56 = vpop.permute.xlu1 %2956 }
 0x6a5   : > { %v2969_v50 = vsel %vm2958_vm8, %v8195_v40, %v2957_v56  ;;  %v8297_v4 = vpop.permute.xlu2 %3268 }
 0x6a6   : > { %v2991_v43 = vadd.f32 %v2969_v50, %v2933_v8  ;;  %v8286_v12 = vpop.permute.xlu0 %3101  ;;  %v3282_v51 = vsel %vm3276_vm9, %v3267_v7, %v8297_v4  ;;  %v3449_v50 = vld [vmem:[%s9009_s5 + $0x8] sm:$0xf] }
 0x6a7   : > { %v3121_v11 = vsel %vm1840_vm5, %v3100_v37, %v8286_v12 }
 0x6a8   : > { %v3002_v0 = vmul.f32 0.25, %v2991_v43  ;;  %3177 = vrot.lane.b32.xlu2 %v8149_v25, %s5453_s17  ;;  %3242 = vrot.lane.b32.xlu0 %v8264_v62, %s5452_s29  ;;  %v3333_v35 = vsel %vm3286_vm10, %v3086_v63, %v3121_v11  ;;  %v3473_v43 = vunpack.c.l.b16 %v3449_v50 }
 0x6a9   : > { %3537 = vmatpush.bf16.msra.mxu1 %v3333_v35 }
 0x6aa   : > { %v3008_v40 = vpack.c.bf16 %v3002_v0, %v3002_v0  ;;  %v8391_v11 = vpack.c.b16 %v3473_v43, %v3473_v43 }
 0x6ac   : > { %v3095_v5 = vunpack.c.l.b16 %v3008_v40  ;;  %v3035_v22 = vpop.permute.xlu1 %3034  ;;  %v3450_v40 = vld [vmem:[%s9010_s6] sm:$0xff] }
 0x6ad   : > { %v3055_v18 = vsel %vm741_vm1, %v3035_v22, %v3037_v58 }
 0x6ae   : > { %v8301_v26 = vpack.c.b16 %v3095_v5, %v3095_v5  ;;  %v8303_v30 = vpop.permute.xlu0 %3038  ;;  %v3289_v52 = vsel %vm3286_vm10, %v8065_v24, %v3055_v18  ;;  %v3499_v24 = vsel %vm3286_vm10, %v3282_v51, 0 }
 0x6af   : > { %v3056_v33 = vsel %vm741_vm1, %v3037_v58, %v8303_v30  ;;  %3520 = vmatpush.bf16.msra.mxu0 %v3289_v52 }
 0x6b0   : > { %3146 = vrot.lane.b32.xlu2 %v8261_v16, %s9244_s23  ;;  %3214 = vrot.lane.b32.xlu0 %v8301_v26, %s5449_s24  ;;  %v3293_v57 = vsel %vm3286_vm10, %v7974_v14, %v3056_v33  ;;  %v3207_v14 = vpop.permute.xlu2 %3206  ;;  %s5459_s24 = smov 120  }
 0x6b1   : > { %3274 = vrot.lane.b32.xlu1 %v8301_v26, %s5451_s28  ;;  %3538 = vmatpush.bf16.msra.mxu1 %v3293_v57 }
 0x6b2   : > { %4909 = vmatmul.msk.bf16.vlgmr.msra.gmra.mxu0 %vm3476_vm14, %v8327_v36 }
 0x6b3   : > { %3588 = vmatpush.bf16.msrb.mxu0 %v3496_v20 }
 0x6b4   : > { %v3263_v39 = vpop.permute.xlu1 %3262  ;;  %4911 = vmatmul.msk.bf16.vlgmr.msra.gmra.mxu1 %vm3476_vm14, %v8327_v36 }
 0x6b5   : > { %3606 = vmatpush.bf16.msrb.mxu1 %v3499_v24  ;;  %v3279_v10 = vsel %vm3276_vm9, %v8157_v60, %v3263_v39  ;;  %v3280_v2 = vsel %vm3276_vm9, %v3263_v39, %v3265_v6 }
 0x6b6   : > { %v3203_v45 = vpop.permute.xlu0 %3202  ;;  %v3490_v19 = vsel %vm3286_vm10, %v3279_v10, 0  ;;  %v3493_v48 = vsel %vm3286_vm10, %v3280_v2, 0 }
 0x6b7   : > { %3552 = vmatpush.bf16.msra.mxu2 %v3490_v19  ;;  %3570 = vmatpush.bf16.msra.mxu3 %v3493_v48  ;;  %v3219_v58 = vsel %vm2745_vm7, %v8166_v29, %v3203_v45  ;;  %v3451_v19 = vld [vmem:[%s9010_s6 + $0x8] sm:$0xff] }
 0x6b8   : > { %3111 = vrot.lane.b32.xlu2 %v8149_v25, %s5447_s20  ;;  %3179 = vrot.lane.b32.xlu0 %v8261_v16, %s5453_s17  ;;  %v3172_v3 = vpop.permute.xlu2 %3171 }
 0x6b9   : > { %3144 = vrot.lane.b32.xlu1 %v8149_v25, %s9244_s23 }
 0x6bc   : > { %v3233_v60 = vpop.permute.xlu1 %3232 }
 0x6bd   : > { %v3249_v23 = vsel %vm3246_vm11, %v8207_v32, %v3233_v60 }
 0x6be   : > { %v3205_v61 = vpop.permute.xlu0 %3204  ;;  %v3417_v42 = vsel %vm3286_vm10, %v3219_v58, %v3249_v23 }
 0x6bf   : > { %3553 = vmatpush.bf16.msra.mxu2 %v3417_v42  ;;  %v3220_v29 = vsel %vm2745_vm7, %v3203_v45, %v3205_v61  ;;  %v3221_v44 = vsel %vm2745_vm7, %v3205_v61, %v3207_v14 }
 0x6c0   : > { %3080 = vrot.lane.b32.xlu2 %v8261_v16, %s5424_s18  ;;  %3148 = vrot.lane.b32.xlu0 %v8264_v62, %s9244_s23  ;;  %v3071_v31 = vpop.permute.xlu2 %3070 }
 0x6c1   : > { %3244 = vrot.lane.b32.xlu1 %v8301_v26, %s5452_s29  ;;  %v3087_v13 = vsel %vm927_vm3, %v8226_v15, %v3071_v31 }
 0x6c2   : > { %4910 = vmatmul.msk.bf16.gmra.mxu0 %vm3476_vm14, %v8391_v11 }
 0x6c4   : > { %v3235_v28 = vpop.permute.xlu1 %3234  ;;  %4912 = vmatmul.msk.bf16.gmra.mxu1 %vm3476_vm14, %v8391_v11 }
 0x6c5   : > { %v3250_v38 = vsel %vm3246_vm11, %v3233_v60, %v3235_v28 }
 0x6c6   : > { %v3137_v32 = vpop.permute.xlu0 %3136  ;;  %v3421_v47 = vsel %vm3286_vm10, %v3220_v29, %v3250_v38 }
 0x6c7   : > { %3571 = vmatpush.bf16.msra.mxu3 %v3421_v47  ;;  %v3155_v6 = vsel %vm3152_vm12, %v8251_v53, %v3137_v32 }
 0x6c8   : > { %3183 = vrot.lane.b32.xlu2 %v8301_v26, %s5453_s17  ;;  %3113 = vrot.lane.b32.xlu0 %v8261_v16, %s5447_s20  ;;  %v3174_v53 = vpop.permute.xlu2 %3173 }
 0x6c9   : > { %3078 = vrot.lane.b32.xlu1 %v8149_v25, %s5424_s18  ;;  %v3190_v20 = vsel %vm3185_vm13, %v3172_v3, %v3174_v53 }
 0x6cc   : > { %v3170_v54 = vpop.permute.xlu1 %3169 }
 0x6cd   : > { %v3188_v21 = vsel %vm3185_vm13, %v8255_v46, %v3170_v54  ;;  %v3189_v34 = vsel %vm3185_vm13, %v3170_v54, %v3172_v3 }
 0x6ce   : > { %v3237_v37 = vpop.permute.xlu0 %3236  ;;  %v3377_v17 = vsel %vm3286_vm10, %v3155_v6, %v3188_v21 }
 0x6cf   : > { %v3251_v55 = vsel %vm3246_vm11, %v3235_v28, %v3237_v37  ;;  %3554 = vmatpush.bf16.msra.mxu2 %v3377_v17 }
 0x6d0   : > { %3115 = vrot.lane.b32.xlu2 %v8264_v62, %s5447_s20  ;;  %3048 = vrot.lane.b32.xlu0 %v8149_v25, %s5421_s0  ;;  %v3425_v41 = vsel %vm3286_vm10, %v3221_v44, %v3251_v55  ;;  %v8400_v5 = vpop.permute.xlu2 %3142  ;;  %v3452_v55 = vld [vmem:[%s9010_s6 + $0x10] sm:$0xff] }
 0x6d1   : > { %3181 = vrot.lane.b32.xlu1 %v8264_v62, %s5453_s17  ;;  %3589 = vmatpush.bf16.msrb.mxu0 %v3425_v41  ;;  %s5456_s17 = smov 118  }
 0x6d4   : > { %v3139_v46 = vpop.permute.xlu1 %3138 }
 0x6d5   : > { %v3156_v7 = vsel %vm3152_vm12, %v3137_v32, %v3139_v46 }
 0x6d6   : > { %v8377_v8 = vpop.permute.xlu0 %3208  ;;  %v3381_v56 = vsel %vm3286_vm10, %v3156_v7, %v3189_v34 }
 0x6d7   : > { %3572 = vmatpush.bf16.msra.mxu3 %v3381_v56  ;;  %v3222_v0 = vsel %vm2745_vm7, %v3207_v14, %v8377_v8 }
 0x6d8   : > { %3052 = vrot.lane.b32.xlu2 %v8264_v62, %s5421_s0  ;;  %3050 = vrot.lane.b32.xlu0 %v8261_v16, %s5421_s0  ;;  %v3075_v15 = vpop.permute.xlu2 %3074 }
 0x6d9   : > { %3150 = vrot.lane.b32.xlu1 %v8301_v26, %s9244_s23  ;;  %s5460_s23 = smov 112  }
 0x6dc   : > { %v8389_v63 = vpop.permute.xlu1 %3238 }
 0x6dd   : > { %v3252_v35 = vsel %vm3246_vm11, %v3237_v37, %v8389_v63 }
 0x6de   : > { %v3104_v22 = vpop.permute.xlu0 %3103  ;;  %v3429_v18 = vsel %vm3286_vm10, %v3222_v0, %v3252_v35 }
 0x6df   : > { %v3122_v52 = vsel %vm1840_vm5, %v8286_v12, %v3104_v22  ;;  %3607 = vmatpush.bf16.msrb.mxu1 %v3429_v18 }
 0x6e0   : > { %3455 = vperm.xlu0 %5399, %v3450_v40   ;;  %v3337_v33 = vsel %vm3286_vm10, %v3087_v13, %v3122_v52  ;;  %v8432_v58 = vpop.permute.xlu2 %3076  ;;  %3465 = vperm.xlu2 %5406, %v3452_v55  }
 0x6e1   : > { %3082 = vrot.lane.b32.xlu1 %v8264_v62, %s5424_s18  ;;  %3555 = vmatpush.bf16.msra.mxu2 %v3337_v33  ;;  %v3090_v54 = vsel %vm927_vm3, %v3075_v15, %v8432_v58 }
 0x6e4   : > { %v3141_v51 = vpop.permute.xlu1 %3140 }
 0x6e5   : > { %v3157_v57 = vsel %vm3152_vm12, %v3139_v46, %v3141_v51  ;;  %v3158_v48 = vsel %vm3152_vm12, %v3141_v51, %v8400_v5 }
 0x6e6   : > { %v3073_v24 = vpop.permute.xlu0 %3072  ;;  %v3385_v39 = vsel %vm3286_vm10, %v3157_v57, %v3190_v20 }
 0x6e7   : > { %3590 = vmatpush.bf16.msrb.mxu0 %v3385_v39  ;;  %v3088_v10 = vsel %vm927_vm3, %v3071_v31, %v3073_v24  ;;  %v3089_v28 = vsel %vm927_vm3, %v3073_v24, %v3075_v15 }
 0x6e8   : > { %v8443_v32 = vpop.permute.xlu2 %3046 }
 0x6e9   : > { %3117 = vrot.lane.b32.xlu1 %v8301_v26, %s5447_s20  ;;  %s5457_s20 = smov 119  }
 0x6ec   : > { %v3106_v12 = vpop.permute.xlu1 %3105 }
 0x6ed   : > { %v3123_v2 = vsel %vm1840_vm5, %v3104_v22, %v3106_v12 }
 0x6ee   : > { %v8421_v14 = vpop.permute.xlu0 %3175  ;;  %v3341_v45 = vsel %vm3286_vm10, %v3088_v10, %v3123_v2 }
 0x6ef   : > { %v3191_v60 = vsel %vm3185_vm13, %v3174_v53, %v8421_v14  ;;  %3573 = vmatpush.bf16.msra.mxu3 %v3341_v45 }
 0x6f0   : > { %v3389_v26 = vsel %vm3286_vm10, %v3158_v48, %v3191_v60 }
 0x6f1   : > { %3460 = vperm.xlu1 %5405, %v3451_v19   ;;  %3608 = vmatpush.bf16.msrb.mxu1 %v3389_v26 }
 0x6f2   : > { %v3211_v37 = vpop.permute.xlu2 %3210 }
 0x6f4   : > { %v3041_v23 = vpop.permute.xlu1 %3040 }
 0x6f5   : > { %v3057_v61 = vsel %vm741_vm1, %v8303_v30, %v3041_v23 }
 0x6f6   : > { %v3108_v42 = vpop.permute.xlu0 %3107  ;;  %v3297_v3 = vsel %vm3286_vm10, %v7980_v1, %v3057_v61 }
 0x6f7   : > { %v3124_v29 = vsel %vm1840_vm5, %v3106_v12, %v3108_v42  ;;  %3556 = vmatpush.bf16.msra.mxu2 %v3297_v3 }
 0x6f8   : > { %v3345_v38 = vsel %vm3286_vm10, %v3089_v28, %v3124_v29 }
 0x6f9   : > { %3591 = vmatpush.bf16.msrb.mxu0 %v3345_v38 }
 0x6fa   : > { %4913 = vmatmul.msk.bf16.vlgmr.msra.gmra.mxu2 %vm3476_vm14, %v8327_v36  ;;  %v3213_v56 = vpop.permute.xlu2 %3212 }
 0x6fb   : > { %v3224_v18 = vsel %vm2745_vm7, %v3211_v37, %v3213_v56 }
 0x6fc   : > { %v3043_v47 = vpop.permute.xlu1 %3042 }
 0x6fd   : > { %v3058_v30 = vsel %vm741_vm1, %v3041_v23, %v3043_v47 }
 0x6fe   : > { %v8446_v31 = vpop.permute.xlu0 %3109  ;;  %v3301_v1 = vsel %vm3286_vm10, %v7982_v59, %v3058_v30 }
 0x6ff   : > { %v3125_v6 = vsel %vm1840_vm5, %v3108_v42, %v8446_v31  ;;  %3574 = vmatpush.bf16.msra.mxu3 %v3301_v1 }
 0x700   : > { %v3349_v21 = vsel %vm3286_vm10, %v3090_v54, %v3125_v6 }
 0x701   : > { %3609 = vmatpush.bf16.msrb.mxu1 %v3349_v21 }
 0x702   : > { %4915 = vmatmul.msk.bf16.vlgmr.msra.gmra.mxu3 %vm3476_vm14, %v8327_v36  ;;  %v3178_v40 = vpop.permute.xlu2 %3177 }
 0x703   : > { %v3192_v12 = vsel %vm3185_vm13, %v8421_v14, %v3178_v40 }
 0x704   : > { %v3045_v17 = vpop.permute.xlu1 %3044 }
 0x705   : > { %v3059_v44 = vsel %vm741_vm1, %v3043_v47, %v3045_v17  ;;  %v3060_v59 = vsel %vm741_vm1, %v3045_v17, %v8443_v32 }
 0x706   : > { %v3305_v41 = vsel %vm3286_vm10, %v8139_v27, %v3059_v44  ;;  %v3309_v53 = vsel %vm3286_vm10, %v8129_v49, %v3060_v59 }
 0x707   : > { %3592 = vmatpush.bf16.msrb.mxu0 %v3305_v41  ;;  %3610 = vmatpush.bf16.msrb.mxu1 %v3309_v53  ;;  %v5253_v41 = vld [vmem:[%s9011_s7 + $0x30] sm:$0xff] }
 0x70a   : > { %v3271_v46 = vpop.permute.xlu0 %3270  ;;  %4917 = vmatmul.msk.bf16.vlgmr.msrb.gmra.mxu0 %vm3476_vm14, %v8327_v36  ;;  %4919 = vmatmul.msk.bf16.vlgmr.msrb.gmra.mxu1 %vm3476_vm14, %v8327_v36  ;;  %v3147_v52 = vpop.permute.xlu2 %3146 }
 0x70b   : > { %v3283_v34 = vsel %vm3276_vm9, %v8297_v4, %v3271_v46  ;;  %4914 = vmatmul.msk.bf16.gmra.mxu2 %vm3476_vm14, %v8391_v11  ;;  %v3223_v4 = vsel %vm2745_vm7, %v8377_v8, %v3211_v37  ;;  %v5254_v37 = vld [vmem:[%s9011_s7 + $0x38] sm:$0xff] }
 0x70c   : > { %v3273_v27 = vpop.permute.xlu1 %3272  ;;  %v3502_v7 = vsel %vm3286_vm10, %v3283_v34, 0 }
 0x70d   : > { %3624 = vmatpush.bf16.msrb.mxu2 %v3502_v7  ;;  %v3284_v49 = vsel %vm3276_vm9, %v3271_v46, %v3273_v27  ;;  %v5262_v46 = vld [vmem:[%s9011_s7 + $0x78] sm:$0xff]  ;;  %v5252_v7 = vld [vmem:[%s9011_s7 + $0x28] sm:$0xff] }
 0x70e   : > { %v3505_v50 = vsel %vm3286_vm10, %v3284_v49, 0 }
 0x70f   : > { %3642 = vmatpush.bf16.msrb.mxu3 %v3505_v50 }
 0x712   : > { %v3241_v43 = vpop.permute.xlu0 %3240  ;;  %4916 = vmatmul.msk.bf16.gmra.mxu3 %vm3476_vm14, %v8391_v11  ;;  %v3112_v10 = vpop.permute.xlu2 %3111 }
 0x713   : > { %v3253_v0 = vsel %vm3246_vm11, %v8389_v63, %v3241_v43  ;;  %v3126_v38 = vsel %vm1840_vm5, %v8446_v31, %v3112_v10 }
 0x714   : > { %v3433_v35 = vsel %vm3286_vm10, %v3223_v4, %v3253_v0  ;;  %v5261_v0 = vld [vmem:[%s9011_s7 + $0x70] sm:$0xff] }
 0x715   : > { %3625 = vmatpush.bf16.msrb.mxu2 %v3433_v35  ;;  %v5251_v35 = vld [vmem:[%s9011_s7 + $0x20] sm:$0xff] }
 0x71a   : > { %v3243_v22 = vpop.permute.xlu0 %3242  ;;  %4918 = vmatmul.msk.bf16.gmra.mxu0 %vm3476_vm14, %v8391_v11  ;;  %4920 = vmatmul.msk.bf16.gmra.mxu1 %vm3476_vm14, %v8391_v11 }
 0x71b   : > { %v3254_v13 = vsel %vm3246_vm11, %v3241_v43, %v3243_v22 }
 0x71c   : > { %v3437_v8 = vsel %vm3286_vm10, %v3224_v18, %v3254_v13 }
 0x71d   : > { %3643 = vmatpush.bf16.msrb.mxu3 %v3437_v8 }
 0x722   : > { %v3215_v63 = vpop.permute.xlu0 %3214 }
 0x723   : > { %v3275_v33 = vpop.permute.xlu1 %3274  ;;  %v3225_v23 = vsel %vm2745_vm7, %v3213_v56, %v3215_v63 }
 0x724   : > { %v3285_v51 = vsel %vm3276_vm9, %v3273_v27, %v3275_v33  ;;  %v3511_v20 = vsel %vm3286_vm10, %v3275_v33, 0 }
 0x725   : > { %v3508_v57 = vsel %vm3286_vm10, %v3285_v51, 0  ;;  %3678 = vmatpush.bf16.msra.mxu1 %v3511_v20  ;;  %v5259_v20 = vld [vmem:[%s9011_s7 + $0x60] sm:$0xff] }
 0x726   : > { %3660 = vmatpush.bf16.msra.mxu0 %v3508_v57  ;;  %v5249_v57 = vld [vmem:[%s9011_s7 + $0x10] sm:$0xff] }
 0x72a   : > { %v3180_v24 = vpop.permute.xlu0 %3179 }
 0x72b   : > { %v3193_v39 = vsel %vm3185_vm13, %v3178_v40, %v3180_v24  ;;  %v3145_v15 = vpop.permute.xlu1 %3144 }
 0x72c   : > { %v3159_v2 = vsel %vm3152_vm12, %v8400_v5, %v3145_v15  ;;  %v3160_v45 = vsel %vm3152_vm12, %v3145_v15, %v3147_v52  ;;  %v3081_v5 = vpop.permute.xlu2 %3080  ;;  %v5258_v15 = vld [vmem:[%s9011_s7 + $0x58] sm:$0xff] }
 0x72d   : > { %v3393_v19 = vsel %vm3286_vm10, %v3159_v2, %v3192_v12  ;;  %v3397_v48 = vsel %vm3286_vm10, %v3160_v45, %v3193_v39  ;;  %v5269_v2 = vld [vmem:[%s9011_s7 + $0xb0] sm:$0xff] }
 0x72e   : > { %3626 = vmatpush.bf16.msrb.mxu2 %v3393_v19  ;;  %3644 = vmatpush.bf16.msrb.mxu3 %v3397_v48 }
 0x72f   : > { %v3522_v27 = vpop.f32.mrf.mxu0 }
 0x731   : > { %v8541_v43 = vpop.f32.mrf.mxu1 }
 0x732   : > { %v3149_v60 = vpop.permute.xlu0 %3148 }
 0x733   : > { %v3245_v26 = vpop.permute.xlu1 %3244 }
 0x734   : > { %v3255_v61 = vsel %vm3246_vm11, %v3243_v22, %v3245_v26  ;;  %v3445_v14 = vsel %vm3286_vm10, %v3215_v63, %v3245_v26  ;;  %v3184_v6 = vpop.permute.xlu2 %3183  ;;  %v5250_v22 = vld [vmem:[%s9011_s7 + $0x18] sm:$0xff] }
 0x735   : > { %3679 = vmatpush.bf16.msra.mxu1 %v3445_v14  ;;  %v3441_v42 = vsel %vm3286_vm10, %v3225_v23, %v3255_v61  ;;  %v5247_v23 = vld [vmem:[%s9011_s7] sm:$0xff]  ;;  %v5268_v61 = vld [vmem:[%s9011_s7 + $0xa8] sm:$0xff]  ;;  %v5278_v14 = vld [vmem:[%s9011_s7 + $0xf8] sm:$0xff] }
 0x736   : > { %3661 = vmatpush.bf16.msra.mxu0 %v3441_v42  ;;  %v5286_v42 = vld [vmem:[%s9011_s7 + $0x138] sm:$0xff] }
 0x737   : > { %v3524_v18 = vpop.f32.mrf.mxu0 }
 0x73a   : > { %v3114_v3 = vpop.permute.xlu0 %3113 }
 0x73b   : > { %v3127_v28 = vsel %vm1840_vm5, %v3112_v10, %v3114_v3  ;;  %v3079_v29 = vpop.permute.xlu1 %3078  ;;  %v5248_v10 = vld [vmem:[%s9011_s7 + $0x8] sm:$0xff] }
 0x73c   : > { %v3091_v47 = vsel %vm927_vm3, %v8432_v58, %v3079_v29  ;;  %v3092_v30 = vsel %vm927_vm3, %v3079_v29, %v3081_v5  ;;  %v3161_v58 = vsel %vm3152_vm12, %v3147_v52, %v3149_v60  ;;  %v3542_v52 = vpop.f32.mrf.mxu1 }
 0x73d   : > { %v3353_v1 = vsel %vm3286_vm10, %v3091_v47, %v3126_v38  ;;  %v3357_v54 = vsel %vm3286_vm10, %v3092_v30, %v3127_v28  ;;  %v5256_v28 = vld [vmem:[%s9011_s7 + $0x48] sm:$0xff]  ;;  %v5267_v38 = vld [vmem:[%s9011_s7 + $0xa0] sm:$0xff] }
 0x73e   : > { %3627 = vmatpush.bf16.msrb.mxu2 %v3353_v1  ;;  %3645 = vmatpush.bf16.msrb.mxu3 %v3357_v54  ;;  %v5285_v1 = vld [vmem:[%s9011_s7 + $0x130] sm:$0xff] }
 0x73f   : > { %v3527_v45 = vpop.f32.mrf.mxu0 }
 0x742   : > { %v3049_v21 = vpop.permute.xlu0 %3048 }
 0x743   : > { %v3061_v31 = vsel %vm741_vm1, %v8443_v32, %v3049_v21  ;;  %v3182_v17 = vpop.permute.xlu1 %3181  ;;  %v3116_v32 = vpop.permute.xlu2 %3115 }
 0x744   : > { %v3194_v44 = vsel %vm3185_vm13, %v3180_v24, %v3182_v17  ;;  %v3313_v59 = vsel %vm3286_vm10, %v8141_v9, %v3061_v31  ;;  %v3195_v49 = vsel %vm3185_vm13, %v3182_v17, %v3184_v6  ;;  %v3128_v13 = vsel %vm1840_vm5, %v3114_v3, %v3116_v32  ;;  %v5270_v24 = vld [vmem:[%s9011_s7 + $0xb8] sm:$0xff]  ;;  %v8585_v19 = vpop.f32.mrf.mxu1  ;;  %v5255_v31 = vld [vmem:[%s9011_s7 + $0x40] sm:$0xff] }
 0x745   : > { %3628 = vmatpush.bf16.msrb.mxu2 %v3313_v59  ;;  %v3401_v55 = vsel %vm3286_vm10, %v3161_v58, %v3194_v44  ;;  %v5294_v17 = vld [vmem:[%s9011_s7 + $0x178] sm:$0xff]  ;;  %v5276_v59 = vld [vmem:[%s9011_s7 + $0xe8] sm:$0xff] }
 0x746   : > { %3662 = vmatpush.bf16.msra.mxu0 %v3401_v55  ;;  %v5266_v58 = vld [vmem:[%s9011_s7 + $0x98] sm:$0xff]  ;;  %v5284_v55 = vld [vmem:[%s9011_s7 + $0x128] sm:$0xff] }
 0x747   : > { %v3529_v47 = vpop.f32.mrf.mxu0 }
 0x748   : > { %4921 = vmatmul.msk.bf16.vlgmr.msrb.gmra.mxu2 %vm3476_vm14, %v8327_v36 }
 0x749   : > { %4372 = vmatpush.bf16.msra.mxu2 %v5254_v37 }
 0x74a   : > { %v3051_v53 = vpop.permute.xlu0 %3050 }
 0x74b   : > { %v3062_v9 = vsel %vm741_vm1, %v3049_v21, %v3051_v53  ;;  %v3151_v34 = vpop.permute.xlu1 %3150  ;;  %v3053_v63 = vpop.permute.xlu2 %3052 }
 0x74c   : > { %v3162_v56 = vsel %vm3152_vm12, %v3149_v60, %v3151_v34  ;;  %v3317_v50 = vsel %vm3286_vm10, %v8149_v25, %v3062_v9  ;;  %v5260_v25 = vld [vmem:[%s9011_s7 + $0x68] sm:$0xff]  ;;  %v3063_v51 = vsel %vm741_vm1, %v3051_v53, %v3053_v63  ;;  %v5257_v60 = vld [vmem:[%s9011_s7 + $0x50] sm:$0xff]  ;;  %v3547_v54 = vpop.f32.mrf.mxu1  ;;  %v5275_v34 = vld [vmem:[%s9011_s7 + $0xe0] sm:$0xff]  ;;  %vm4358_vm1 = vcmask 646144  }
 0x74d   : > { %4373 = vmatpush.bf16.msra.mxu2 %v5253_v41  ;;  %3646 = vmatpush.bf16.msrb.mxu3 %v3317_v50  ;;  %v3405_v4 = vsel %vm3286_vm10, %v3162_v56, %v3195_v49  ;;  %v3321_v39 = vsel %vm3286_vm10, %v8261_v16, %v3063_v51  ;;  %v5292_v56 = vld [vmem:[%s9011_s7 + $0x168] sm:$0xff] }
 0x74e   : > { %3680 = vmatpush.bf16.msra.mxu1 %v3405_v4  ;;  %v5264_v50 = vld [vmem:[%s9011_s7 + $0x88] sm:$0xff]  ;;  %v5282_v4 = vld [vmem:[%s9011_s7 + $0x118] sm:$0xff] }
 0x750   : > { %4923 = vmatmul.msk.bf16.vlgmr.msrb.gmra.mxu3 %vm3476_vm14, %v8327_v36 }
 0x751   : > { %4390 = vmatpush.bf16.msra.mxu3 %v5262_v46  ;;  %4374 = vmatpush.bf16.msra.mxu2 %v5252_v7  ;;  %v5265_v46 = vld [vmem:[%s9011_s7 + $0x90] sm:$0xff] }
 0x752   : > { %v8593_v26 = vpop.permute.xlu0 %3455 }
 0x753   : > { %v3083_v40 = vpop.permute.xlu1 %3082  ;;  %v3523_v3 = vadd.f32 %v3522_v27, %v8593_v26  ;;  %v8650_v53 = vpop.permute.xlu2 %3465  ;;  %v5283_v27 = vld [vmem:[%s9011_s7 + $0x120] sm:$0xff] }
 0x754   : > { %v3093_v8 = vsel %vm927_vm3, %v3081_v5, %v3083_v40  ;;  %v3325_v5 = vsel %vm3286_vm10, %v8264_v62, %v3053_v63  ;;  %v5277_v62 = vld [vmem:[%s9011_s7 + $0xf0] sm:$0xff]  ;;  %v3528_v49 = vadd.f32 %v3527_v45, %v8650_v53  ;;  %v5272_v63 = vld [vmem:[%s9011_s7 + $0xc8] sm:$0xff]  ;;  %vm4691_vm3 = vcmask 80896  }
 0x755   : > { %4391 = vmatpush.bf16.msra.mxu3 %v5261_v0  ;;  %4375 = vmatpush.bf16.msra.mxu2 %v5251_v35  ;;  %v3361_v33 = vsel %vm3286_vm10, %v3093_v8, %v3128_v13  ;;  %v3693_v6 = vmax.f32 %v3523_v3, 0.0  ;;  %v5291_v35 = vld [vmem:[%s9011_s7 + $0x160] sm:$0xff]  ;;  %v5290_v8 = vld [vmem:[%s9011_s7 + $0x158] sm:$0xff] }
 0x756   : > { %3663 = vmatpush.bf16.msra.mxu0 %v3361_v33  ;;  %v3713_v0 = vmax.f32 %v3528_v49, 0.0  ;;  %v5289_v33 = vld [vmem:[%s9011_s7 + $0x150] sm:$0xff] }
 0x758   : > { %4922 = vmatmul.msk.bf16.gmra.mxu2 %vm3476_vm14, %v8391_v11  ;;  %v3733_v13 = vpack.c.bf16 %v3713_v0, %v3713_v0 }
 0x759   : > { %4392 = vmatpush.bf16.msra.mxu3 %v5260_v25  ;;  %4376 = vmatpush.bf16.msra.mxu2 %v5250_v22  ;;  %v5263_v25 = vld [vmem:[%s9011_s7 + $0x80] sm:$0xff]  ;;  %v5273_v22 = vld [vmem:[%s9011_s7 + $0xd0] sm:$0xff] }
 0x75a   : > { %3664 = vmatpush.bf16.msra.mxu0 %v3321_v39  ;;  %v5288_v39 = vld [vmem:[%s9011_s7 + $0x148] sm:$0xff] }
 0x75b   : > { %v3118_v12 = vpop.permute.xlu1 %3117 }
 0x75c   : > { %v3129_v16 = vsel %vm1840_vm5, %v3116_v32, %v3118_v12  ;;  %v5293_v32 = vld [vmem:[%s9011_s7 + $0x170] sm:$0xff]  ;;  %vm4715_vm5 = vcmask 138240  }
 0x75d   : > { %4393 = vmatpush.bf16.msra.mxu3 %v5259_v20  ;;  %4377 = vmatpush.bf16.msra.mxu2 %v5249_v57  ;;  %v3365_v48 = vsel %vm3286_vm10, %v3083_v40, %v3129_v16  ;;  %v3546_v40 = vadd.f32 %v8585_v19, %v8650_v53  ;;  %v5271_v20 = vld [vmem:[%s9011_s7 + $0xc0] sm:$0xff]  ;;  %v5302_v16 = vld [vmem:[%s9011_s7 + $0x1b8] sm:$0xff] }
 0x75e   : > { %4408 = vmatpush.bf16.msrb.mxu0 %v5270_v24  ;;  %3681 = vmatpush.bf16.msra.mxu1 %v3365_v48  ;;  %v5279_v24 = vld [vmem:[%s9011_s7 + $0x100] sm:$0xff] }
 0x75f   : > { %4925 = vmatmul.msk.bf16.vlgmr.msra.gmra.mxu0 %vm3476_vm14, %v8327_v36 }
 0x760   : > { %4924 = vmatmul.msk.bf16.gmra.mxu3 %vm3476_vm14, %v8391_v11 }
 0x761   : > { %4394 = vmatpush.bf16.msra.mxu3 %v5258_v15  ;;  %4378 = vmatpush.bf16.msra.mxu2 %v5248_v10  ;;  %v5287_v15 = vld [vmem:[%s9011_s7 + $0x140] sm:$0xff] }
 0x762   : > { %4409 = vmatpush.bf16.msrb.mxu0 %v5269_v2  ;;  %3682 = vmatpush.bf16.msra.mxu1 %v3325_v5  ;;  %v5309_v5 = vld [vmem:[%s9011_s7 + $0x1f0] sm:$0xff] }
 0x763   : > { %v8615_v29 = vpop.permute.xlu1 %3460 }
 0x764   : > { %v3525_v30 = vadd.f32 %v3524_v18, %v8615_v29  ;;  %v3543_v37 = vadd.f32 %v3542_v52, %v8615_v29  ;;  %v5281_v18 = vld [vmem:[%s9011_s7 + $0x110] sm:$0xff]  ;;  %v3714_v52 = vmax.f32 %v3546_v40, 0.0 }
 0x765   : > { %4395 = vmatpush.bf16.msra.mxu3 %v5257_v60  ;;  %4379 = vmatpush.bf16.msra.mxu2 %v5247_v23  ;;  %v5310_v60 = vld [vmem:[%s9011_s7 + $0x1f8] sm:$0xff] }
 0x766   : > { %4410 = vmatpush.bf16.msrb.mxu0 %v5268_v61  ;;  %4426 = vmatpush.bf16.msrb.mxu1 %v5278_v14  ;;  %v3703_v21 = vmax.f32 %v3525_v30, 0.0  ;;  %v3704_v41 = vmax.f32 %v3543_v37, 0.0  ;;  %v3734_v51 = vpack.c.bf16 %v3714_v52, %v3714_v52  ;;  %v5318_v14 = vld [vmem:[%s9011_s7 + $0x238] sm:$0xff]  ;;  %v5300_v30 = vld [vmem:[%s9011_s7 + $0x1a8] sm:$0xff] }
 0x767   : > { %4927 = vmatmul.msk.bf16.vlgmr.msra.gmra.mxu1 %vm3476_vm14, %v8327_v36  ;;  %v3541_v36 = vadd.f32 %v8541_v43, %v8593_v26  ;;  %v5274_v43 = vld [vmem:[%s9011_s7 + $0xd8] sm:$0xff] }
 0x768   : > { %v3723_v44 = vpack.c.bf16 %v3703_v21, %v3693_v6 }
 0x769   : > { %4444 = vmatpush.bf16.msrb.mxu2 %v5286_v42  ;;  %4396 = vmatpush.bf16.msra.mxu3 %v5256_v28  ;;  %v3694_v9 = vmax.f32 %v3541_v36, 0.0  ;;  %v5301_v42 = vld [vmem:[%s9011_s7 + $0x1b0] sm:$0xff] }
 0x76a   : > { %4411 = vmatpush.bf16.msrb.mxu0 %v5267_v38  ;;  %4427 = vmatpush.bf16.msrb.mxu1 %v5277_v62 }
 0x76b   : > { %4380 = vmatmul.bf16.vlgmr.msra.gmra.mxu2 %v3723_v44  ;;  %v3724_v7 = vpack.c.bf16 %v3704_v41, %v3694_v9 }
 0x76d   : > { %4445 = vmatpush.bf16.msrb.mxu2 %v5285_v1  ;;  %4397 = vmatpush.bf16.msra.mxu3 %v5255_v31 }
 0x76e   : > { %4412 = vmatpush.bf16.msrb.mxu0 %v5266_v58  ;;  %4428 = vmatpush.bf16.msrb.mxu1 %v5276_v59  ;;  %v5299_v59 = vld [vmem:[%s9011_s7 + $0x1a0] sm:$0xff] }
 0x76f   : > { %4926 = vmatmul.msk.bf16.gmra.mxu0 %vm3476_vm14, %v8391_v11 }
 0x770   : > { %4398 = vmatmul.bf16.vlgmr.msra.gmra.mxu3 %v3724_v7 }
 0x771   : > { %4462 = vmatpush.bf16.msrb.mxu3 %v5294_v17  ;;  %4446 = vmatpush.bf16.msrb.mxu2 %v5284_v55 }
 0x772   : > { %4413 = vmatpush.bf16.msrb.mxu0 %v5265_v46  ;;  %4429 = vmatpush.bf16.msrb.mxu1 %v5275_v34 }
 0x775   : > { %4463 = vmatpush.bf16.msrb.mxu3 %v5293_v32  ;;  %4447 = vmatpush.bf16.msrb.mxu2 %v5283_v27 }
 0x776   : > { %4414 = vmatpush.bf16.msrb.mxu0 %v5264_v50  ;;  %4430 = vmatpush.bf16.msrb.mxu1 %v5274_v43 }
 0x777   : > { %4928 = vmatmul.msk.bf16.gmra.mxu1 %vm3476_vm14, %v8391_v11  ;;  %v5280_v11 = vld [vmem:[%s9011_s7 + $0x108] sm:$0xff] }
 0x779   : > { %4464 = vmatpush.bf16.msrb.mxu3 %v5292_v56  ;;  %4448 = vmatpush.bf16.msrb.mxu2 %v5282_v4 }
 0x77a   : > { %4415 = vmatpush.bf16.msrb.mxu0 %v5263_v25  ;;  %4431 = vmatpush.bf16.msrb.mxu1 %v5273_v22 }
 0x77b   : > { %4385 = vmatmul.bf16.gmra.mxu2 %v3733_v13 }
 0x77d   : > { %4465 = vmatpush.bf16.msrb.mxu3 %v5291_v35  ;;  %4449 = vmatpush.bf16.msrb.mxu2 %v5281_v18  ;;  %v3558_v57 = vpop.f32.mrf.mxu2 }
 0x77e   : > { %4432 = vmatpush.bf16.msrb.mxu1 %v5272_v63  ;;  %v3559_v12 = vadd.f32 %v3558_v57, %v8593_v26  ;;  %4480 = vmatpush.bf16.msra.mxu0 %v5302_v16  ;;  %v5297_v57 = vld [vmem:[%s9011_s7 + $0x190] sm:$0xff] }
 0x780   : > { %4403 = vmatmul.bf16.gmra.mxu3 %v3734_v51  ;;  %v3695_v23 = vmax.f32 %v3559_v12, 0.0  ;;  %v5308_v51 = vld [vmem:[%s9011_s7 + $0x1e8] sm:$0xff]  ;;  %v5306_v12 = vld [vmem:[%s9011_s7 + $0x1d8] sm:$0xff] }
 0x781   : > { %4466 = vmatpush.bf16.msrb.mxu3 %v5290_v8  ;;  %4450 = vmatpush.bf16.msrb.mxu2 %v5280_v11 }
 0x782   : > { %4433 = vmatpush.bf16.msrb.mxu1 %v5271_v20  ;;  %4481 = vmatpush.bf16.msra.mxu0 %v5301_v42  ;;  %v5317_v20 = vld [vmem:[%s9011_s7 + $0x230] sm:$0xff]  ;;  %v5322_v42 = vld [vmem:[%s9011_s7 + $0x258] sm:$0xff] }
 0x785   : > { %4467 = vmatpush.bf16.msrb.mxu3 %v5289_v33  ;;  %4451 = vmatpush.bf16.msrb.mxu2 %v5279_v24  ;;  %v3560_v10 = vpop.f32.mrf.mxu2  ;;  %v3576_v2 = vpop.f32.mrf.mxu3  ;;  %v5298_v33 = vld [vmem:[%s9011_s7 + $0x198] sm:$0xff]  ;;  %v5307_v24 = vld [vmem:[%s9011_s7 + $0x1e0] sm:$0xff] }
 0x786   : > { %v3561_v45 = vadd.f32 %v3560_v10, %v8615_v29  ;;  %4498 = vmatpush.bf16.msra.mxu1 %v5310_v60  ;;  %v3577_v28 = vadd.f32 %v3576_v2, %v8593_v26  ;;  %4482 = vmatpush.bf16.msra.mxu0 %v5300_v30  ;;  %v5315_v10 = vld [vmem:[%s9011_s7 + $0x220] sm:$0xff]  ;;  %v5305_v60 = vld [vmem:[%s9011_s7 + $0x1d0] sm:$0xff] }
 0x787   : > { %v3594_v19 = vpop.f32.mrf.mxu0  ;;  %v3612_v48 = vpop.f32.mrf.mxu1  ;;  %v5323_v2 = vld [vmem:[%s9011_s7 + $0x260] sm:$0xff] }
 0x788   : > { %v3705_v61 = vmax.f32 %v3561_v45, 0.0  ;;  %v3595_v38 = vadd.f32 %v3594_v19, %v8593_v26  ;;  %v3613_v62 = vadd.f32 %v3612_v48, %v8593_v26  ;;  %v3696_v6 = vmax.f32 %v3577_v28, 0.0  ;;  %v5295_v48 = vld [vmem:[%s9011_s7 + $0x180] sm:$0xff]  ;;  %v5312_v28 = vld [vmem:[%s9011_s7 + $0x208] sm:$0xff] }
 0x789   : > { %4468 = vmatpush.bf16.msrb.mxu3 %v5288_v39  ;;  %4516 = vmatpush.bf16.msra.mxu2 %v5318_v14  ;;  %v5316_v39 = vld [vmem:[%s9011_s7 + $0x228] sm:$0xff]  ;;  %v5455_v45 = vmov 65535  }
 0x78a   : > { %v3725_v3 = vpack.c.bf16 %v3705_v61, %v3695_v23  ;;  %4499 = vmatpush.bf16.msra.mxu1 %v5309_v5  ;;  %v3697_v44 = vmax.f32 %v3595_v38, 0.0  ;;  %v3698_v55 = vmax.f32 %v3613_v62, 0.0  ;;  %4483 = vmatpush.bf16.msra.mxu0 %v5299_v59  ;;  %v4367_v16 = vsel %vm4365_vm15, 4294967295, %v5455_v45  ;;  %v5314_v61 = vld [vmem:[%s9011_s7 + $0x218] sm:$0xff]  ;;  %v5304_v14 = vld [vmem:[%s9011_s7 + $0x1c8] sm:$0xff]  ;;  %v5313_v5 = vld [vmem:[%s9011_s7 + $0x210] sm:$0xff] }
 0x78b   : > { %v4368_v19 = vsel %vm4366_vm0, %v4367_v16, 0  ;;  %v5321_v38 = vld [vmem:[%s9011_s7 + $0x250] sm:$0xff]  ;;  %v5320_v62 = vld [vmem:[%s9011_s7 + $0x248] sm:$0xff] }
 0x78c   : > { %4416 = vmatmul.bf16.vlgmr.msrb.gmra.mxu0 %v3725_v3  ;;  %v4370_v23 = vand.u32 %v5323_v2, %v4368_v19  ;;  %v5303_v3 = vld [vmem:[%s9011_s7 + $0x1c0] sm:$0xff] }
 0x78d   : > { %4469 = vmatpush.bf16.msrb.mxu3 %v5287_v15  ;;  %v3578_v47 = vpop.f32.mrf.mxu3  ;;  %4517 = vmatpush.bf16.msra.mxu2 %v5317_v20  ;;  %v5296_v15 = vld [vmem:[%s9011_s7 + $0x188] sm:$0xff] }
 0x78e   : > { %v3579_v1 = vadd.f32 %v3578_v47, %v8615_v29  ;;  %v3563_v54 = vpop.f32.mrf.mxu2  ;;  %4484 = vmatpush.bf16.msra.mxu0 %v5298_v33  ;;  %4500 = vmatpush.bf16.msra.mxu1 %v5308_v51  ;;  %v5311_v47 = vld [vmem:[%s9011_s7 + $0x200] sm:$0xff] }
 0x78f   : > { %v3596_v21 = vpop.f32.mrf.mxu0  ;;  %v3614_v37 = vpop.f32.mrf.mxu1  ;;  %v3564_v36 = vadd.f32 %v3563_v54, %v8650_v53 }
 0x790   : > { %v3706_v31 = vmax.f32 %v3579_v1, 0.0  ;;  %v3597_v17 = vadd.f32 %v3596_v21, %v8615_v29  ;;  %v3615_v58 = vadd.f32 %v3614_v37, %v8615_v29  ;;  %v5319_v1 = vld [vmem:[%s9011_s7 + $0x240] sm:$0xff] }
 0x791   : > { %v3715_v27 = vmax.f32 %v3564_v36, 0.0  ;;  %4518 = vmatpush.bf16.msra.mxu2 %v5316_v39  ;;  %4537 = vmatpush.bf16.msra.mxu3 %v4370_v23 }
 0x792   : > { %v3726_v41 = vpack.c.bf16 %v3706_v31, %v3696_v6  ;;  %v3707_v32 = vmax.f32 %v3597_v17, 0.0  ;;  %v3708_v46 = vmax.f32 %v3615_v58, 0.0  ;;  %4485 = vmatpush.bf16.msra.mxu0 %v5297_v57  ;;  %4501 = vmatpush.bf16.msra.mxu1 %v5307_v24 }
 0x793   : > { %v3735_v4 = vpack.c.bf16 %v3715_v27, %v3715_v27 }
 0x794   : > { %v3727_v9 = vpack.c.bf16 %v3707_v32, %v3697_v44  ;;  %v3728_v34 = vpack.c.bf16 %v3708_v46, %v3698_v55  ;;  %4434 = vmatmul.bf16.vlgmr.msrb.gmra.mxu1 %v3726_v41 }
 0x795   : > { %v3581_v7 = vpop.f32.mrf.mxu3  ;;  %4519 = vmatpush.bf16.msra.mxu2 %v5315_v10  ;;  %4538 = vmatpush.bf16.msra.mxu3 %v5322_v42 }
 0x796   : > { %4452 = vmatmul.bf16.vlgmr.msrb.gmra.mxu2 %v3727_v9  ;;  %4470 = vmatmul.bf16.vlgmr.msrb.gmra.mxu3 %v3728_v34  ;;  %v3565_v49 = vpop.f32.mrf.mxu2  ;;  %v3582_v43 = vadd.f32 %v3581_v7, %v8650_v53 }
 0x797   : > { %v3599_v56 = vpop.f32.mrf.mxu0  ;;  %v3617_v50 = vpop.f32.mrf.mxu1  ;;  %4486 = vmatpush.bf16.msra.mxu0 %v5296_v15  ;;  %4502 = vmatpush.bf16.msra.mxu1 %v5306_v12 }
 0x798   : > { %v3600_v0 = vadd.f32 %v3599_v56, %v8650_v53  ;;  %v3618_v35 = vadd.f32 %v3617_v50, %v8650_v53  ;;  %v3716_v25 = vmax.f32 %v3582_v43, 0.0 }
 0x799   : > { %4520 = vmatpush.bf16.msra.mxu2 %v5314_v61  ;;  %4539 = vmatpush.bf16.msra.mxu3 %v5321_v38 }
 0x79a   : > { %v3717_v22 = vmax.f32 %v3600_v0, 0.0  ;;  %v3718_v18 = vmax.f32 %v3618_v35, 0.0  ;;  %v3736_v52 = vpack.c.bf16 %v3716_v25, %v3716_v25 }
 0x79b   : > { %4487 = vmatpush.bf16.msra.mxu0 %v5295_v48  ;;  %4503 = vmatpush.bf16.msra.mxu1 %v5305_v60 }
 0x79c   : > { %4421 = vmatmul.bf16.gmra.mxu0 %v3735_v4  ;;  %v3737_v63 = vpack.c.bf16 %v3717_v22, %v3717_v22  ;;  %v3738_v11 = vpack.c.bf16 %v3718_v18, %v3718_v18 }
 0x79d   : > { %v3583_v40 = vpop.f32.mrf.mxu3  ;;  %4521 = vmatpush.bf16.msra.mxu2 %v5313_v5  ;;  %4540 = vmatpush.bf16.msra.mxu3 %v5320_v62 }
 0x79f   : > { %v3601_v13 = vpop.f32.mrf.mxu0  ;;  %v3619_v8 = vpop.f32.mrf.mxu1  ;;  %4504 = vmatpush.bf16.msra.mxu1 %v5304_v14 }
 0x7a1   : > { %4522 = vmatpush.bf16.msra.mxu2 %v5312_v28  ;;  %4541 = vmatpush.bf16.msra.mxu3 %v5319_v1 }
 0x7a3   : > { %4505 = vmatpush.bf16.msra.mxu1 %v5303_v3 }
 0x7a4   : > { %4439 = vmatmul.bf16.gmra.mxu1 %v3736_v52 }
 0x7a5   : > { %4523 = vmatpush.bf16.msra.mxu2 %v5311_v47 }
 0x7a6   : > { %4457 = vmatmul.bf16.gmra.mxu2 %v3737_v63  ;;  %4475 = vmatmul.bf16.gmra.mxu3 %v3738_v11 }
 0x7cb   : > { %v3630_v30 = vpop.f32.mrf.mxu2 }
 0x7cc   : > { %v3631_v54 = vadd.f32 %v3630_v30, %v8593_v26 }
 0x7ce   : > { %v3699_v31 = vmax.f32 %v3631_v54, 0.0 }
 0x7d3   : > { %v3632_v6 = vpop.f32.mrf.mxu2  ;;  %v3648_v21 = vpop.f32.mrf.mxu3 }
 0x7d4   : > { %v3633_v37 = vadd.f32 %v3632_v6, %v8615_v29  ;;  %v3649_v36 = vadd.f32 %v3648_v21, %v8593_v26 }
 0x7d6   : > { %v3709_v17 = vmax.f32 %v3633_v37, 0.0  ;;  %v3700_v32 = vmax.f32 %v3649_v36, 0.0 }
 0x7d8   : > { %v3729_v58 = vpack.c.bf16 %v3709_v17, %v3699_v31 }
 0x7da   : > { %4488 = vmatmul.bf16.vlgmr.msra.gmra.mxu0 %v3729_v58 }
 0x7db   : > { %v3635_v59 = vpop.f32.mrf.mxu2  ;;  %v3650_v55 = vpop.f32.mrf.mxu3 }
 0x7dc   : > { %v3666_v44 = vpop.f32.mrf.mxu0  ;;  %v3651_v41 = vadd.f32 %v3650_v55, %v8615_v29  ;;  %v3636_v9 = vadd.f32 %v3635_v59, %v8650_v53 }
 0x7dd   : > { %v3667_v27 = vadd.f32 %v3666_v44, %v8593_v26 }
 0x7de   : > { %v3710_v46 = vmax.f32 %v3651_v41, 0.0  ;;  %v3719_v4 = vmax.f32 %v3636_v9, 0.0 }
 0x7df   : > { %v3701_v0 = vmax.f32 %v3667_v27, 0.0 }
 0x7e0   : > { %v3730_v34 = vpack.c.bf16 %v3710_v46, %v3700_v32  ;;  %v3739_v22 = vpack.c.bf16 %v3719_v4, %v3719_v4 }
 0x7e2   : > { %4506 = vmatmul.bf16.vlgmr.msra.gmra.mxu1 %v3730_v34 }
 0x7e3   : > { %v3653_v50 = vpop.f32.mrf.mxu3  ;;  %v3637_v43 = vpop.f32.mrf.mxu2 }
 0x7e4   : > { %v3668_v7 = vpop.f32.mrf.mxu0  ;;  %v3684_v49 = vpop.f32.mrf.mxu1  ;;  %v3654_v40 = vadd.f32 %v3653_v50, %v8650_v53 }
 0x7e5   : > { %v3669_v56 = vadd.f32 %v3668_v7, %v8615_v29  ;;  %v3685_v18 = vadd.f32 %v3684_v49, %v8593_v26 }
 0x7e6   : > { %v3720_v11 = vmax.f32 %v3654_v40, 0.0 }
 0x7e7   : > { %v3711_v35 = vmax.f32 %v3669_v56, 0.0  ;;  %v3702_v33 = vmax.f32 %v3685_v18, 0.0 }
 0x7e8   : > { %v3740_v39 = vpack.c.bf16 %v3720_v11, %v3720_v11 }
 0x7e9   : > { %v3731_v25 = vpack.c.bf16 %v3711_v35, %v3701_v0 }
 0x7ea   : > { %4493 = vmatmul.bf16.gmra.mxu0 %v3739_v22 }
 0x7eb   : > { %4524 = vmatmul.bf16.vlgmr.msra.gmra.mxu2 %v3731_v25  ;;  %v3655_v63 = vpop.f32.mrf.mxu3 }
 0x7ec   : > { %v3671_v13 = vpop.f32.mrf.mxu0  ;;  %v3686_v8 = vpop.f32.mrf.mxu1 }
 0x7ed   : > { %v3687_v52 = vadd.f32 %v3686_v8, %v8615_v29  ;;  %v3672_v57 = vadd.f32 %v3671_v13, %v8650_v53 }
 0x7ee   : > { %v4381_v20 = vpop.f32.mrf.mxu2 }
 0x7ef   : > { %v3712_v51 = vmax.f32 %v3687_v52, 0.0  ;;  %v3721_v12 = vmax.f32 %v3672_v57, 0.0 }
 0x7f1   : > { %v3732_v24 = vpack.c.bf16 %v3712_v51, %v3702_v33  ;;  %v3741_v16 = vpack.c.bf16 %v3721_v12, %v3721_v12 }
 0x7f2   : > { %4511 = vmatmul.bf16.gmra.mxu1 %v3740_v39 }
 0x7f3   : > { %5237 = vmatmul.msk.bf16.vlgmr.msra.gmra.mxu3 %vm4358_vm1, %v3732_v24  ;;  %v4399_v10 = vpop.f32.mrf.mxu3 }
 0x7f4   : > { %v3689_v15 = vpop.f32.mrf.mxu1  ;;  %v3673_v26 = vpop.f32.mrf.mxu0  ;;  %v4400_v2 = vadd.f32 %v4399_v10, %v4381_v20 }
 0x7f5   : > { %v3690_v29 = vadd.f32 %v3689_v15, %v8650_v53 }
 0x7f6   : > { %v4383_v45 = vpop.f32.mrf.mxu2 }
 0x7f7   : > { %v3722_v48 = vmax.f32 %v3690_v29, 0.0 }
 0x7f9   : > { %v3742_v14 = vpack.c.bf16 %v3722_v48, %v3722_v48 }
 0x7fb   : > { %4529 = vmatmul.bf16.gmra.mxu2 %v3741_v16  ;;  %v4401_v60 = vpop.f32.mrf.mxu3 }
 0x7fc   : > { %v3691_v19 = vpop.f32.mrf.mxu1  ;;  %v4402_v23 = vadd.f32 %v4401_v60, %v4383_v45 }
 0x7fe   : > { %v4386_v61 = vpop.f32.mrf.mxu2 }
 0x803   : > { %5238 = vmatmul.msk.bf16.gmra.mxu3 %vm4358_vm1, %v3742_v14  ;;  %v4404_v42 = vpop.f32.mrf.mxu3 }
 0x804   : > { %v4405_v5 = vadd.f32 %v4404_v42, %v4386_v61 }
 0x806   : > { %v4388_v3 = vpop.f32.mrf.mxu2 }
 0x809   : > { %v4417_v28 = vpop.f32.mrf.mxu0 }
 0x80a   : > { %v4418_v38 = vadd.f32 %v4417_v28, %v4400_v2 }
 0x80b   : > { %v4406_v47 = vpop.f32.mrf.mxu3 }
 0x811   : > { %v4419_v30 = vpop.f32.mrf.mxu0  ;;  %v4435_v62 = vpop.f32.mrf.mxu1 }
 0x812   : > { %v4420_v1 = vadd.f32 %v4419_v30, %v4402_v23  ;;  %v4436_v53 = vadd.f32 %v4435_v62, %v4418_v38  ;;  %v4623_v30 = vld [vmem:[%s9013_s9] sm:$0x7] }
 0x819   : > { %v4437_v54 = vpop.f32.mrf.mxu1  ;;  %v4453_v6 = vpop.f32.mrf.mxu2 }
 0x81a   : > { %v4438_v21 = vadd.f32 %v4437_v54, %v4420_v1  ;;  %v4454_v37 = vadd.f32 %v4453_v6, %v4436_v53  ;;  %v4471_v31 = vpop.f32.mrf.mxu3  ;;  %v4422_v17 = vpop.f32.mrf.mxu0 }
 0x81b   : > { %v4423_v58 = vadd.f32 %v4422_v17, %v4405_v5 }
 0x81c   : > { %v4472_v36 = vadd.f32 %v4471_v31, %v4454_v37  ;;  %v4622_v31 = vld [vmem:[%s9012_s8] sm:$0xf] }
 0x81d   : > { %4630 = vst [vmem:[#allocation1] ss:$4 sm:$0xff] %v4622_v31  ;;  %v4765_v31 = vld [vmem:[%s9016_s12 + $0x8] sm:$0xff] }
 0x821   : > { %v4455_v44 = vpop.f32.mrf.mxu2  ;;  %v4440_v59 = vpop.f32.mrf.mxu1 }
 0x822   : > { %v4456_v55 = vadd.f32 %v4455_v44, %v4438_v21  ;;  %v4473_v41 = vpop.f32.mrf.mxu3  ;;  %v4441_v32 = vadd.f32 %v4440_v59, %v4423_v58  ;;  %v4424_v46 = vpop.f32.mrf.mxu0 }
 0x824   : > { %v4474_v9 = vadd.f32 %v4473_v41, %v4456_v55 }
 0x829   : > { %v4458_v34 = vpop.f32.mrf.mxu2  ;;  %v4442_v27 = vpop.f32.mrf.mxu1 }
 0x82a   : > { %v4459_v7 = vadd.f32 %v4458_v34, %v4441_v32  ;;  %v4476_v49 = vpop.f32.mrf.mxu3 }
 0x82c   : > { %v4477_v56 = vadd.f32 %v4476_v49, %v4459_v7  ;;  %v4631_v7 = vld.sshfl [vmem:[#allocation1] sm:$0xff pattern:$0x73625140] }
 0x831   : > { %v4460_v50 = vpop.f32.mrf.mxu2 }
 0x832   : > { %v4478_v43 = vpop.f32.mrf.mxu3  ;;  %v4632_v50 = vld.sshfl [vmem:[#allocation1 + $0x8] sm:$0xff pattern:$0x73625140] }
 0x857   : > { %v4489_v4 = vpop.f32.mrf.mxu0 }
 0x858   : > { %v4490_v18 = vadd.f32 %v4489_v4, %v4472_v36  ;;  %v4710_v4 = vld [vmem:[%s9014_s10 + $0x78] sm:$0xff] }
 0x859   : > { %4723 = vmatpush.msrb.mxu2 %v4710_v4  ;;  %v4774_v4 = vld [vmem:[%s9017_s13] sm:$0x1] }
 0x85f   : > { %v4491_v0 = vpop.f32.mrf.mxu0  ;;  %v4507_v35 = vpop.f32.mrf.mxu1 }
 0x860   : > { %v4508_v52 = vadd.f32 %v4507_v35, %v4490_v18  ;;  %v4492_v20 = vadd.f32 %v4491_v0, %v4474_v9  ;;  %v4709_v0 = vld [vmem:[%s9014_s10 + $0x70] sm:$0xff]  ;;  %v4708_v35 = vld [vmem:[%s9014_s10 + $0x68] sm:$0xff]  ;;  %v4706_v18 = vld [vmem:[%s9014_s10 + $0x58] sm:$0xff] }
 0x861   : > { %4724 = vmatpush.msrb.mxu2 %v4709_v0 }
 0x863   : > { %4725 = vmatpush.msrb.mxu2 %v4708_v35 }
 0x867   : > { %v4494_v25 = vpop.f32.mrf.mxu0  ;;  %v4509_v40 = vpop.f32.mrf.mxu1 }
 0x868   : > { %v4510_v39 = vadd.f32 %v4509_v40, %v4492_v20  ;;  %v4495_v29 = vadd.f32 %v4494_v25, %v4477_v56  ;;  %v4713_v25 = vld [vmem:[%s9014_s10 + $0x90] sm:$0x1]  ;;  %v4707_v40 = vld [vmem:[%s9014_s10 + $0x60] sm:$0xff] }
 0x869   : > { %5240 = vmatpush.msk.msrb.mxu3 %vm4719_vm2, %v4713_v25  ;;  %4726 = vmatpush.msrb.mxu2 %v4707_v40  ;;  %v4701_v20 = vld [vmem:[%s9014_s10 + $0x30] sm:$0xff]  ;;  %v4810_v40 = vld [vmem:[%s9019_s15] sm:$0x1] }
 0x86b   : > { %4727 = vmatpush.msrb.mxu2 %v4706_v18 }
 0x86e   : > { %v4525_v22 = vpop.f32.mrf.mxu2 }
 0x86f   : > { %v4496_v13 = vpop.f32.mrf.mxu0  ;;  %v4512_v8 = vpop.f32.mrf.mxu1  ;;  %v4526_v63 = vadd.f32 %v4525_v22, %v4508_v52  ;;  %v4712_v22 = vld [vmem:[%s9014_s10 + $0x88] sm:$0xff] }
 0x870   : > { %v4513_v19 = vadd.f32 %v4512_v8, %v4495_v29  ;;  %4757 = vmatpush.msrb.mxu3 %v4712_v22  ;;  %v4705_v13 = vld [vmem:[%s9014_s10 + $0x50] sm:$0xff]  ;;  %v4704_v52 = vld [vmem:[%s9014_s10 + $0x48] sm:$0xff] }
 0x871   : > { %4728 = vmatpush.msrb.mxu2 %v4705_v13  ;;  %v4697_v29 = vld [vmem:[%s9014_s10 + $0x10] sm:$0xff] }
 0x873   : > { %4729 = vmatpush.msrb.mxu2 %v4704_v52 }
 0x876   : > { %v4527_v11 = vpop.f32.mrf.mxu2  ;;  %v4543_v33 = vpop.f32.mrf.mxu3 }
 0x877   : > { %v4544_v51 = vadd.f32 %v4543_v33, %v4526_v63  ;;  %v4514_v24 = vpop.f32.mrf.mxu1  ;;  %v4528_v26 = vadd.f32 %v4527_v11, %v4510_v39  ;;  %v4703_v63 = vld [vmem:[%s9014_s10 + $0x40] sm:$0xff]  ;;  %v4702_v11 = vld [vmem:[%s9014_s10 + $0x38] sm:$0xff] }
 0x878   : > { %4730 = vmatpush.msrb.mxu2 %v4703_v63 }
 0x879   : > { %v4552_v57 = vpack.c.bf16 %v4544_v51, %v4544_v51 }
 0x87a   : > { %4731 = vmatpush.msrb.mxu2 %v4702_v11 }
 0x87b   : > { %v4558_v15 = vunpack.c.l.b16 %v4552_v57 }
 0x87c   : > { %4732 = vmatpush.msrb.mxu2 %v4701_v20 }
 0x87d   : > { %v4564_v12 = vpack.c.b16 %v4558_v15, %v4558_v15 }
 0x87e   : > { %v4530_v10 = vpop.f32.mrf.mxu2  ;;  %v4545_v2 = vpop.f32.mrf.mxu3 }
 0x87f   : > { %v4546_v45 = vadd.f32 %v4545_v2, %v4528_v26  ;;  %4586 = vrot.lane.b32.xlu2 %v4564_v12, %s5456_s17  ;;  %v4531_v60 = vadd.f32 %v4530_v10, %v4513_v19  ;;  %v4696_v19 = vld [vmem:[%s9014_s10 + $0x8] sm:$0xff] }
 0x881   : > { %v4553_v16 = vpack.c.bf16 %v4546_v45, %v4546_v45  ;;  %v4698_v45 = vld [vmem:[%s9014_s10 + $0x18] sm:$0xff] }
 0x883   : > { %v4559_v48 = vunpack.c.l.b16 %v4553_v16 }
 0x885   : > { %v8830_v23 = vpack.c.b16 %v4559_v48, %v4558_v15  ;;  %v4700_v15 = vld [vmem:[%s9014_s10 + $0x28] sm:$0xff] }
 0x886   : > { %v4532_v61 = vpop.f32.mrf.mxu2  ;;  %v4548_v14 = vpop.f32.mrf.mxu3  ;;  %4733 = vmatpush.msrb.mxu2 %v4700_v15 }
 0x887   : > { %v4549_v42 = vadd.f32 %v4548_v14, %v4531_v60  ;;  %4581 = vrot.lane.b32.xlu0 %v8830_v23, %s5457_s20  ;;  %v4695_v60 = vld [vmem:[%s9014_s10] sm:$0xff]  ;;  %v4773_v61 = vld [vmem:[%s9016_s12 + $0x48] sm:$0xff] }
 0x888   : > { %v4772_v14 = vld [vmem:[%s9016_s12 + $0x40] sm:$0xff] }
 0x889   : > { %v4554_v5 = vpack.c.bf16 %v4549_v42, %v4549_v42  ;;  %v4771_v42 = vld [vmem:[%s9016_s12 + $0x38] sm:$0xff] }
 0x88b   : > { %v4560_v3 = vunpack.c.l.b16 %v4554_v5  ;;  %v4770_v5 = vld [vmem:[%s9016_s12 + $0x30] sm:$0xff] }
 0x88d   : > { %v4562_v28 = vpack.c.b16 %v4560_v3, %v4560_v3  ;;  %v4565_v38 = vpack.c.b16 %v4560_v3, %v4559_v48 }
 0x88e   : > { %v4550_v47 = vpop.f32.mrf.mxu3 }
 0x88f   : > { %4583 = vrot.lane.b32.xlu1 %v4562_v28, %s5457_s20  ;;  %4603 = vrot.lane.b32.xlu2 %v4562_v28, %s5458_s19 }
 0x890   : > { %4573 = vrot.lane.b32.xlu0 %v4562_v28, %s5421_s0 }
 0x897   : > { %4578 = vrot.lane.b32.xlu1 %v4565_v38, %s5459_s24  ;;  %4601 = vrot.lane.b32.xlu2 %v8830_v23, %s5458_s19  ;;  %s9711_s19 = smov 46  }
 0x898   : > { %4571 = vrot.lane.b32.xlu0 %v8830_v23, %s5421_s0  ;;  %s542_s0 = scalar_lea.vmem %s9020_s16, %s9713_s22 }
 0x89f   : > { %4576 = vrot.lane.b32.xlu1 %v4564_v12, %s5459_s24  ;;  %4568 = vrot.lane.b32.xlu2 %v4565_v38, %s5420_s30  ;;  %s536_s24 = scalar_lea.vmem %s9005_s1, %s9713_s22 }
 0x8a0   : > { %4593 = vrot.lane.b32.xlu0 %v4562_v28, %s5460_s23  ;;  %v5408_v43 = vld [vmem:[%s536_s24] ss:$0 sm:$0xff] }
 0x8a7   : > { %4598 = vrot.lane.b32.xlu1 %v4565_v38, %s5461_s25  ;;  %4566 = vrot.lane.b32.xlu2 %v4564_v12, %s5420_s30  ;;  %s5462_s30 = smov 10  }
 0x8a8   : > { %4591 = vrot.lane.b32.xlu0 %v8830_v23, %s5460_s23 }
 0x8af   : > { %4596 = vrot.lane.b32.xlu1 %v4564_v12, %s5461_s25  ;;  %4626 = vperm.xlu2 %5406, %v4623_v30   ;;  %v4699_v12 = vld [vmem:[%s9014_s10 + $0x20] sm:$0xff] }
 0x8b0   : > { %4734 = vmatpush.msrb.mxu2 %v4699_v12 }
 0x8b2   : > { %4735 = vmatpush.msrb.mxu2 %v4698_v45 }
 0x8b4   : > { %4736 = vmatpush.msrb.mxu2 %v4697_v29 }
 0x8b6   : > { %4737 = vmatpush.msrb.mxu2 %v4696_v19 }
 0x8b7   : > { %4588 = vrot.lane.b32.xlu1 %v4565_v38, %s5456_s17  ;;  %s539_s17 = scalar_lea.vmem %s9006_s2, %s9713_s22  ;;  %4679 = vrot.lane.b32.xlu2 %v5408_v43, %s5462_s30  ;;  %v4800_v43 = vld [vmem:[%s9018_s14] sm:$0xff] }
 0x8b8   : > { %v5407_v48 = vld [vmem:[%s539_s17] ss:$0 sm:$0xff]  ;;  %4738 = vmatpush.msrb.mxu2 %v4695_v60 }
 0x8d9   : > { %v4587_v62 = vpop.permute.xlu2 %4586 }
 0x8e9   : > { %v4604_v1 = vpop.permute.xlu2 %4603 }
 0x8ea   : > { %v4637_v53 = vsel %vm3286_vm10, %v4604_v1, 0 }
 0x8eb   : > { %4654 = vmatpush.bf16.msrb.mxu1 %v4637_v53 }
 0x8f1   : > { %v4602_v54 = vpop.permute.xlu2 %4601 }
 0x8f2   : > { %4655 = vmatpush.bf16.msrb.mxu1 %v4602_v54  ;;  %v4769_v54 = vld [vmem:[%s9016_s12 + $0x28] sm:$0xff] }
 0x8f9   : > { %v4582_v6 = vpop.permute.xlu0 %4581  ;;  %v4569_v36 = vpop.permute.xlu2 %4568 }
 0x901   : > { %v4584_v21 = vpop.permute.xlu1 %4583  ;;  %v4567_v32 = vpop.permute.xlu2 %4566 }
 0x902   : > { %v4616_v37 = vsel %vm3286_vm10, %v4584_v21, %v4587_v62  ;;  %v4574_v17 = vpop.permute.xlu0 %4573  ;;  %v4608_v9 = vsel %vm3286_vm10, %v4562_v28, %v4567_v32  ;;  %v4767_v21 = vld [vmem:[%s9016_s12 + $0x18] sm:$0xff] }
 0x903   : > { %4639 = vmatpush.bf16.msrb.mxu0 %v4616_v37  ;;  %v4766_v37 = vld [vmem:[%s9016_s12 + $0x10] sm:$0xff]  ;;  %v4803_v32 = vld [vmem:[%s9018_s14 + $0x18] sm:$0xff] }
 0x907   : > { %4640 = vmatpush.bf16.msrb.mxu0 %v4582_v6  ;;  %v4768_v6 = vld [vmem:[%s9016_s12 + $0x20] sm:$0xff] }
 0x909   : > { %v4579_v58 = vpop.permute.xlu1 %4578  ;;  %v4627_v33 = vpop.permute.xlu2 %4626 }
 0x90a   : > { %v4572_v59 = vpop.permute.xlu0 %4571 }
 0x90b   : > { %4641 = vmatpush.bf16.msrb.mxu0 %v4579_v58  ;;  %v4809_v58 = vld [vmem:[%s9018_s14 + $0x48] sm:$0xff] }
 0x911   : > { %v4577_v44 = vpop.permute.xlu1 %4576  ;;  %v4680_v30 = vpop.permute.xlu2 %4679 }
 0x912   : > { %v4612_v55 = vsel %vm3286_vm10, %v4574_v17, %v4577_v44  ;;  %v4594_v46 = vpop.permute.xlu0 %4593  ;;  %v4764_v17 = vld [vmem:[%s9016_s12] sm:$0xff]  ;;  %v4807_v44 = vld [vmem:[%s9018_s14 + $0x38] sm:$0xff] }
 0x913   : > { %4642 = vmatpush.bf16.msrb.mxu0 %v4612_v55  ;;  %v4805_v55 = vld [vmem:[%s9018_s14 + $0x28] sm:$0xff] }
 0x917   : > { %4643 = vmatpush.bf16.msrb.mxu0 %v4572_v59  ;;  %v4806_v59 = vld [vmem:[%s9018_s14 + $0x30] sm:$0xff] }
 0x919   : > { %v4599_v41 = vpop.permute.xlu1 %4598 }
 0x91a   : > { %4656 = vmatpush.bf16.msrb.mxu1 %v4599_v41  ;;  %v4592_v49 = vpop.permute.xlu0 %4591  ;;  %v4804_v41 = vld [vmem:[%s9018_s14 + $0x20] sm:$0xff] }
 0x91b   : > { %4644 = vmatpush.bf16.msrb.mxu0 %v4569_v36  ;;  %v4808_v36 = vld [vmem:[%s9018_s14 + $0x40] sm:$0xff] }
 0x91f   : > { %4645 = vmatpush.bf16.msrb.mxu0 %v4608_v9 }
 0x921   : > { %v4597_v34 = vpop.permute.xlu1 %4596 }
 0x922   : > { %v4620_v27 = vsel %vm3286_vm10, %v4594_v46, %v4597_v34  ;;  %v4714_v46 = vld [vmem:[%s9015_s11] sm:$0x1] }
 0x923   : > { %4646 = vmatpush.bf16.msrb.mxu0 %v8830_v23  ;;  %4657 = vmatpush.bf16.msrb.mxu1 %v4620_v27  ;;  %v4711_v23 = vld [vmem:[%s9014_s10 + $0x80] sm:$0xff] }
 0x924   : > { %4758 = vmatpush.msrb.mxu3 %v4711_v23 }
 0x926   : > { %4647 = vmatmul.bf16.vlgmr.msrb.gmra.mxu0 %v4631_v7 }
 0x927   : > { %4658 = vmatpush.bf16.msrb.mxu1 %v4592_v49  ;;  %4785 = vmatpush.msra.mxu0 %v4773_v61 }
 0x929   : > { %v4589_v56 = vpop.permute.xlu1 %4588  ;;  %4786 = vmatpush.msra.mxu0 %v4772_v14 }
 0x92b   : > { %4659 = vmatpush.bf16.msrb.mxu1 %v4589_v56  ;;  %4787 = vmatpush.msra.mxu0 %v4771_v42  ;;  %v4802_v56 = vld [vmem:[%s9018_s14 + $0x10] sm:$0xff] }
 0x92d   : > { %4788 = vmatpush.msra.mxu0 %v4770_v5 }
 0x92e   : > { %5239 = vmatmul.msk.bf16.vlgmr.msrb.gmra.mxu1 %vm1384_vm4, %v4632_v50  ;;  %vm4693_vm4 = vcmask 105472   ;;  %v4801_v50 = vld [vmem:[%s9018_s14 + $0x8] sm:$0xff] }
 0x92f   : > { %4789 = vmatpush.msra.mxu0 %v4769_v54  ;;  %4820 = vmatpush.msra.mxu1 %v4809_v58 }
 0x931   : > { %4790 = vmatpush.msra.mxu0 %v4768_v6  ;;  %4821 = vmatpush.msra.mxu1 %v4808_v36 }
 0x933   : > { %4791 = vmatpush.msra.mxu0 %v4767_v21  ;;  %4822 = vmatpush.msra.mxu1 %v4807_v44 }
 0x935   : > { %4792 = vmatpush.msra.mxu0 %v4766_v37  ;;  %4823 = vmatpush.msra.mxu1 %v4806_v59 }
 0x937   : > { %4793 = vmatpush.msra.mxu0 %v4765_v31  ;;  %4824 = vmatpush.msra.mxu1 %v4805_v55 }
 0x939   : > { %4794 = vmatpush.msra.mxu0 %v4764_v17  ;;  %4825 = vmatpush.msra.mxu1 %v4804_v41 }
 0x93b   : > { %4826 = vmatpush.msra.mxu1 %v4803_v32 }
 0x93d   : > { %4827 = vmatpush.msra.mxu1 %v4802_v56 }
 0x93f   : > { %4828 = vmatpush.msra.mxu1 %v4801_v50 }
 0x941   : > { %4829 = vmatpush.msra.mxu1 %v4800_v43 }
 0x9a3   : > { %v4648_v8 = vpop.f32.mrf.mxu0 }
 0x9a4   : > { %v4649_v51 = vadd.f32 %v4648_v8, %v4627_v33 }
 0x9ab   : > { %v4661_v57 = vpop.f32.mrf.mxu1  ;;  %v4650_v24 = vpop.f32.mrf.mxu0 }
 0x9ac   : > { %v4662_v39 = vadd.f32 %v4661_v57, %v4649_v51 }
 0x9ae   : > { %v4665_v26 = vmax.f32 %v4662_v39, 0.0 }
 0x9b0   : > { %v4669_v10 = vrot.slane %v4665_v26, 1  ;;  %v4673_v2 = vrot.slane %v4665_v26, 2 }
 0x9b2   : > { %4674 = vrot.lane.b32.xlu1 %v4673_v2, %s5451_s28  ;;  %4670 = vrot.lane.b32.xlu0 %v4669_v10, %s9711_s19  ;;  %s5463_s28 = smov 13  }
 0x9b3   : > { %v4663_v16 = vpop.f32.mrf.mxu1 }
 0x9ba   : > { %4684 = vrot.lane.b32.xlu0 %v5407_v48, %s5463_s28 }
 0xa24   : > { %v4675_v3 = vpop.permute.xlu1 %4674  ;;  %v4671_v28 = vpop.permute.xlu0 %4670 }
 0xa25   : > { %v4688_v38 = vsel %vm3152_vm12, %v4665_v26, %v4671_v28  ;;  %v4692_v62 = vsel %vm4691_vm3, %v4675_v3, %v4680_v30 }
 0xa26   : > { %v4690_v47 = vsel %vm3276_vm9, %v4688_v38, %v4675_v3 }
 0xa27   : > { %4739 = vmatmul.f32.vlgmr.msrb.gmra.mxu2 %v4690_v47 }
 0xa2c   : > { %v4685_v1 = vpop.permute.xlu0 %4684 }
 0xa2d   : > { %v4694_v53 = vsel %vm4693_vm4, %v4692_v62, %v4685_v1 }
 0xa2e   : > { %5241 = vmatmul.msk.f32.vlgmr.msrb.gmra.mxu3 %vm4715_vm5, %v4694_v53 }
 0xaaa   : > { %v4740_v9 = vpop.f32.mrf.mxu2 }
 0xaab   : > { %v4741_v34 = vadd.f32 %v4740_v9, %v4714_v46 }
 0xab1   : > { %v4760_v27 = vpop.f32.mrf.mxu3 }
 0xab2   : > { %v4761_v7 = vadd.f32 %v4760_v27, %v4741_v34 }
 0xab4   : > { %v4763_v49 = vmax.f32 %v4761_v7, 0.0 }
 0xab6   : > { %5242 = vmatmul.msk.f32.vlgmr.msra.gmra.mxu0 %vm4775_vm6, %v4763_v49 }
 0xb33   : > { %v4796_v0 = vpop.f32.mrf.mxu0 }
 0xb34   : > { %v4797_v35 = vadd.f32 %v4796_v0, %v4774_v4 }
 0xb36   : > { %v4799_v25 = vmax.f32 %v4797_v35, 0.0 }
 0xb38   : > { %5243 = vmatmul.msk.f32.vlgmr.msra.gmra.mxu1 %vm4775_vm6, %v4799_v25 }
 0xbb5   : > { %v4831_v22 = vpop.f32.mrf.mxu1 }
 0xbb6   : > { %v4832_v18 = vadd.f32 %v4831_v22, %v4810_v40 }
 0xbb8   : > { %4834 = vst [vmem:[%s542_s0] sm:$0x1] %v4832_v18 }
 0xbb9 PF: > { %s26_s21 = sadd.s32 1, %s5415_s21  }
 0xbba   : > { %p23_p4 = scmp.ge.s32.totalorder %s26_s21, 4  }
 0xbbc   :  { %25 = sbr.rel (!%p23_p4) target bundleno = 2 (0x2), region = 120 }

</bundles_post_ra>
